<compile_context>
chip_gen: v6e
topology: v6e:2x2x1
jax: 0.10.0
libtpu: 0.0.40
codegen_flags: <defaults>
</compile_context>

<pallas_src>
import functools

import jax
import jax.numpy as jnp
from jax.experimental import pallas as pl
from jax.experimental.pallas import tpu as pltpu

EPS = 1e-5
LANE = 128
TM_TARGET = 1024       # target rows per M tile; auto-shrinks if round-up waste is big


def _round_up(x, m):
    return (x + m - 1) // m * m


def _m_tiling(m):
    m8 = _round_up(max(m, 8), 8)
    tm = min(TM_TARGET, m8)
    # Shrink the tile if the round-up padding would waste > ~12.5% of the rows.
    while tm > 128 and (_round_up(m8, tm) - m8) > m8 // 8:
        tm //= 2
    return tm, _round_up(m8, tm)


def _k_n_tiles(kp, npad):
    tk = 256 if kp % 256 == 0 else 128
    tn = 256 if npad % 256 == 0 else 128
    return tk, tn


# ----------------------------- Pallas kernels ------------------------------ #

def _matmul_stats_kernel(p_ref, w_ref, y_ref, s1_ref, s2_ref, acc_ref):
    """Tiled conv-as-matmul; emits per-(M-tile, channel) sum and sum-of-squares."""
    k = pl.program_id(2)

    @pl.when(k == 0)
    def _():
        acc_ref[...] = jnp.zeros_like(acc_ref)

    acc_ref[...] += jnp.dot(p_ref[...], w_ref[...],
                            preferred_element_type=jnp.float32)

    @pl.when(k == pl.num_programs(2) - 1)
    def _():
        acc = acc_ref[...]
        y_ref[...] = acc
        ssum = jnp.sum(acc, axis=0, keepdims=True)
        ssq = jnp.sum(acc * acc, axis=0, keepdims=True)
        s1_ref[...] = jnp.broadcast_to(ssum, s1_ref.shape)
        s2_ref[...] = jnp.broadcast_to(ssq, s2_ref.shape)


def _matmul_bias_tanh_kernel(p_ref, w_ref, b_ref, o_ref, acc_ref):
    """Final 7x7 conv (bias=True, no norm) + Tanh, tiled."""
    k = pl.program_id(2)

    @pl.when(k == 0)
    def _():
        acc_ref[...] = jnp.zeros_like(acc_ref)

    acc_ref[...] += jnp.dot(p_ref[...], w_ref[...],
                            preferred_element_type=jnp.float32)

    @pl.when(k == pl.num_programs(2) - 1)
    def _():
        o_ref[...] = jnp.tanh(acc_ref[...] + b_ref[...])


def _scale_shift_kernel(y_ref, s_ref, t_ref, o_ref, *, act):
    """BatchNorm (precomputed scale/shift) + activation. act in {'relu','none'}.
    nn.LeakyReLU(True) has negative_slope==1.0 -> exact identity ('none')."""
    out = y_ref[...] * s_ref[...] + t_ref[...]
    if act == "relu":
        out = jnp.maximum(out, 0.0)
    o_ref[...] = out


def _scale_shift_residual_kernel(y_ref, s_ref, t_ref, r_ref, o_ref):
    """Second conv of a ResnetBlock: BN (scale/shift) + residual add."""
    o_ref[...] = y_ref[...] * s_ref[...] + t_ref[...] + r_ref[...]


# --------------------------- pallas_call wrappers --------------------------- #

def _conv_matmul_bn_stats(patches, w_bf16, m_true):
    """patches (M, K) bf16, w_bf16 (Kp, Np) bf16 -> y (Mp, Np) f32, mean/var (Np,)."""
    m, kdim = patches.shape
    kp, npad = w_bf16.shape
    tm, mp = _m_tiling(m)
    tk, tn = _k_n_tiles(kp, npad)
    nmt = mp // tm

    p = jnp.pad(patches, ((0, mp - m), (0, kp - kdim)))   # already bf16

    y, s1, s2 = pl.pallas_call(
        _matmul_stats_kernel,
        out_shape=(jax.ShapeDtypeStruct((mp, npad), jnp.float32),
                   jax.ShapeDtypeStruct((nmt * 8, npad), jnp.float32),
                   jax.ShapeDtypeStruct((nmt * 8, npad), jnp.float32)),
        grid_spec=pltpu.PrefetchScalarGridSpec(
            num_scalar_prefetch=0,
            grid=(mp // tm, npad // tn, kp // tk),
            in_specs=[pl.BlockSpec((tm, tk), lambda i, j, k: (i, k)),
                      pl.BlockSpec((tk, tn), lambda i, j, k: (k, j))],
            out_specs=(pl.BlockSpec((tm, tn), lambda i, j, k: (i, j)),
                       pl.BlockSpec((8, tn), lambda i, j, k: (i, j)),
                       pl.BlockSpec((8, tn), lambda i, j, k: (i, j))),
            scratch_shapes=[pltpu.VMEM((tm, tn), jnp.float32)]),
        compiler_params=pltpu.CompilerParams(
            dimension_semantics=("parallel", "parallel", "arbitrary")),
    )(p, w_bf16)

    # Tiny reduction: per-tile sums -> batch mean / biased variance (padded rows are
    # exact zeros so they contribute nothing; divide by the true M).
    tot = jnp.sum(s1.reshape(nmt, 8, npad)[:, 0, :], axis=0)
    tot2 = jnp.sum(s2.reshape(nmt, 8, npad)[:, 0, :], axis=0)
    mean = tot / m_true
    var = jnp.maximum(tot2 / m_true - mean * mean, 0.0)
    return y, mean, var, (tm, tn)


def _apply_bn_act(y, mean, var, gamma, beta, tm, tn, act, residual=None):
    """Tiled normalize + scale + activation (+ residual)."""
    mp, npad = y.shape
    inv = jax.lax.rsqrt(var + EPS)
    scale = (gamma * inv).reshape(1, npad)
    shift = (beta - mean * gamma * inv).reshape(1, npad)

    big_spec = pl.BlockSpec((tm, tn), lambda i, j: (i, j))
    vec_spec = pl.BlockSpec((1, tn), lambda i, j: (0, j))

    if residual is None:
        kernel = functools.partial(_scale_shift_kernel, act=act)
        in_specs = [big_spec, vec_spec, vec_spec]
        args = (y, scale, shift)
    else:
        kernel = _scale_shift_residual_kernel
        in_specs = [big_spec, vec_spec, vec_spec, big_spec]
        args = (y, scale, shift, residual)

    return pl.pallas_call(
        kernel,
        out_shape=jax.ShapeDtypeStruct((mp, npad), jnp.float32),
        grid_spec=pltpu.PrefetchScalarGridSpec(
            num_scalar_prefetch=0,
            grid=(mp // tm, npad // tn),
            in_specs=in_specs,
            out_specs=big_spec),
        compiler_params=pltpu.CompilerParams(
            dimension_semantics=("parallel", "parallel")),
    )(*args)


def _conv_bias_tanh(patches, w_bf16, bias_pad):
    m, kdim = patches.shape
    kp, npad = w_bf16.shape
    tm, mp = _m_tiling(m)
    tk, tn = _k_n_tiles(kp, npad)

    p = jnp.pad(patches, ((0, mp - m), (0, kp - kdim)))   # already bf16

    out = pl.pallas_call(
        _matmul_bias_tanh_kernel,
        out_shape=jax.ShapeDtypeStruct((mp, npad), jnp.float32),
        grid_spec=pltpu.PrefetchScalarGridSpec(
            num_scalar_prefetch=0,
            grid=(mp // tm, npad // tn, kp // tk),
            in_specs=[pl.BlockSpec((tm, tk), lambda i, j, k: (i, k)),
                      pl.BlockSpec((tk, tn), lambda i, j, k: (k, j)),
                      pl.BlockSpec((1, tn), lambda i, j, k: (0, j))],
            out_specs=pl.BlockSpec((tm, tn), lambda i, j, k: (i, j)),
            scratch_shapes=[pltpu.VMEM((tm, tn), jnp.float32)]),
        compiler_params=pltpu.CompilerParams(
            dimension_semantics=("parallel", "parallel", "arbitrary")),
    )(p, w_bf16, bias_pad)
    return out[:m]


# ------------------------------ JAX glue ----------------------------------- #

def _im2col(x, kh, kw, stride):
    """x: (N, Hp, Wp, C) already padded (bf16); 'valid' conv with the given stride."""
    n, hp, wp, c = x.shape
    oh = (hp - kh) // stride + 1
    ow = (wp - kw) // stride + 1
    cols = []
    for dh in range(kh):
        for dw in range(kw):
            sl = x[:, dh:dh + (oh - 1) * stride + 1:stride,
                      dw:dw + (ow - 1) * stride + 1:stride, :]
            cols.append(sl)
    p = jnp.stack(cols, axis=3)                     # (n, oh, ow, kh*kw, c)
    return p.reshape(n * oh * ow, kh * kw * c), (n, oh, ow)


def _dilate2d(x, s):
    n, h, w, c = x.shape
    y = jnp.zeros((n, (h - 1) * s + 1, (w - 1) * s + 1, c), x.dtype)
    return y.at[:, ::s, ::s, :].set(x)


def _conv_bn_act_layer(x, arr, meta, *, stride, pad, pad_mode, act, residual=None):
    k, cout = meta["k"], meta["cout"]
    # Cast to bf16 *before* the KH*KW patch blow-up (halves the im2col HBM footprint;
    # MXU operands are bit-identical to casting after).
    xb = x.astype(jnp.bfloat16)
    if pad > 0:
        xb = jnp.pad(xb, ((0, 0), (pad, pad), (pad, pad), (0, 0)), mode=pad_mode)
    patches, (n, oh, ow) = _im2col(xb, k, k, stride)
    m = patches.shape[0]
    y, mean, var, (tm, tn) = _conv_matmul_bn_stats(patches, arr["w"], m)
    mp, npad = y.shape
    r = None
    if residual is not None:
        rflat = residual.reshape(m, -1)
        r = jnp.pad(rflat, ((0, mp - m), (0, npad - rflat.shape[1])))
    out = _apply_bn_act(y, mean, var, arr["gamma"], arr["beta"], tm, tn, act, r)
    return out[:m, :cout].reshape(n, oh, ow, cout)


def _resnet_block(x, a1, m1, a2, m2):
    # ReflectionPad(1) -> Conv3x3 -> BN -> LeakyReLU(True) (== identity)
    h = _conv_bn_act_layer(x, a1, m1, stride=1, pad=1, pad_mode="reflect", act="none")
    # ReflectionPad(1) -> Conv3x3 -> BN, residual add fused into the normalize kernel
    return _conv_bn_act_layer(h, a2, m2, stride=1, pad=1, pad_mode="reflect",
                              act="none", residual=x)


def _conv_transpose_layer(x, arr, meta):
    # ConvTranspose2d(k=3, stride=2, padding=1, output_padding=1, bias=False)
    xd = _dilate2d(x.astype(jnp.bfloat16), 2)
    xd = jnp.pad(xd, ((0, 0), (1, 2), (1, 2), (0, 0)))   # (k-1-p, k-1-p+output_padding)
    patches, (n, oh, ow) = _im2col(xd, 3, 3, 1)
    m = patches.shape[0]
    y, mean, var, (tm, tn) = _conv_matmul_bn_stats(patches, arr["w"], m)
    out = _apply_bn_act(y, mean, var, arr["gamma"], arr["beta"], tm, tn, "relu")
    return out[:m, :meta["cout"]].reshape(n, oh, ow, meta["cout"])


def _final_layer(x, arr, meta):
    xb = jnp.pad(x.astype(jnp.bfloat16),
                 ((0, 0), (3, 3), (3, 3), (0, 0)), mode="reflect")
    patches, (n, oh, ow) = _im2col(xb, 7, 7, 1)
    y = _conv_bias_tanh(patches, arr["w"], arr["bias"])
    return y[:, :meta["cout"]].reshape(n, oh, ow, meta["cout"])


# --------------------- parameters (PyTorch layout) + prep -------------------- #

def init_params(key, input_nc, output_nc, ngf, n_blocks):
    keys = iter(jax.random.split(key, 4 * n_blocks + 16))

    def conv_w(k, cout, cin, ksz):
        return 0.02 * jax.random.normal(k, (cout, cin, ksz, ksz), jnp.float32)

    p = {}
    p["w_in"] = conv_w(next(keys), ngf, input_nc, 7)
    p["g_in"] = jnp.ones((ngf,), jnp.float32)
    p["b_in"] = jnp.zeros((ngf,), jnp.float32)

    p["down"] = []
    for i in range(2):
        cin, cout = ngf * 2 ** i, ngf * 2 ** (i + 1)
        p["down"].append(dict(w=conv_w(next(keys), cout, cin, 3),
                              g=jnp.ones((cout,), jnp.float32),
                              b=jnp.zeros((cout,), jnp.float32)))

    dim = ngf * 4
    p["blocks"] = []
    for _ in range(n_blocks):
        p["blocks"].append(dict(
            w1=conv_w(next(keys), dim, dim, 3),
            g1=jnp.ones((dim,), jnp.float32), b1=jnp.zeros((dim,), jnp.float32),
            w2=conv_w(next(keys), dim, dim, 3),
            g2=jnp.ones((dim,), jnp.float32), b2=jnp.zeros((dim,), jnp.float32)))

    p["up"] = []
    for i in range(2):
        cin = ngf * 2 ** (2 - i)
        cout = cin // 2
        p["up"].append(dict(
            w=0.02 * jax.random.normal(next(keys), (cin, cout, 3, 3), jnp.float32),
            g=jnp.ones((cout,), jnp.float32),
            b=jnp.zeros((cout,), jnp.float32)))

    p["w_out"] = conv_w(next(keys), output_nc, ngf, 7)
    p["bias_out"] = 0.02 * jax.random.normal(next(keys), (output_nc,), jnp.float32)
    return p


def _pad_vec(v, npad):
    v = v.reshape(-1)
    return jnp.pad(v, (0, npad - v.shape[0])).astype(jnp.float32)


def _prep_conv(w_oihw, gamma, beta):
    """Conv2d weight (Cout,Cin,KH,KW) -> padded (Kp,Np) bf16 in im2col order."""
    cout, cin, kh, kw = w_oihw.shape
    kdim = kh * kw * cin
    kp = _round_up(kdim, LANE)
    npad = _round_up(cout, LANE)
    w2d = jnp.transpose(w_oihw, (2, 3, 1, 0)).reshape(kdim, cout)
    w2d = jnp.pad(w2d, ((0, kp - kdim), (0, npad - cout))).astype(jnp.bfloat16)
    return (dict(w=w2d, gamma=_pad_vec(gamma, npad), beta=_pad_vec(beta, npad)),
            dict(k=kh, cout=cout))


def _prep_convT(w_iohw, gamma, beta):
    """ConvTranspose2d weight (Cin,Cout,KH,KW) -> equivalent fwd-conv padded 2D weight."""
    cin, cout, kh, kw = w_iohw.shape
    kdim = kh * kw * cin
    kp = _round_up(kdim, LANE)
    npad = _round_up(cout, LANE)
    w2d = jnp.transpose(w_iohw[:, :, ::-1, ::-1], (2, 3, 0, 1)).reshape(kdim, cout)
    w2d = jnp.pad(w2d, ((0, kp - kdim), (0, npad - cout))).astype(jnp.bfloat16)
    return (dict(w=w2d, gamma=_pad_vec(gamma, npad), beta=_pad_vec(beta, npad)),
            dict(k=kh, cout=cout))


def _prep_final(w_oihw, bias):
    cout, cin, kh, kw = w_oihw.shape
    kdim = kh * kw * cin
    kp = _round_up(kdim, LANE)
    npad = _round_up(cout, LANE)
    w2d = jnp.transpose(w_oihw, (2, 3, 1, 0)).reshape(kdim, cout)
    w2d = jnp.pad(w2d, ((0, kp - kdim), (0, npad - cout))).astype(jnp.bfloat16)
    return (dict(w=w2d, bias=_pad_vec(bias, npad).reshape(1, npad)),
            dict(k=kh, cout=cout))


def preprocess_params(p):
    """One-time weight layout/padding (outside the jitted forward)."""
    a_stem, m_stem = _prep_conv(p["w_in"], p["g_in"], p["b_in"])
    downs = [_prep_conv(d["w"], d["g"], d["b"]) for d in p["down"]]
    blocks = [(_prep_conv(b["w1"], b["g1"], b["b1"]),
               _prep_conv(b["w2"], b["g2"], b["b2"])) for b in p["blocks"]]
    ups = [_prep_convT(u["w"], u["g"], u["b"]) for u in p["up"]]
    a_fin, m_fin = _prep_final(p["w_out"], p["bias_out"])

    arrays = dict(stem=a_stem,
                  down=[a for a, _ in downs],
                  blocks=[(a1, a2) for (a1, _), (a2, _) in blocks],
                  up=[a for a, _ in ups],
                  final=a_fin)
    meta = dict(stem=m_stem,
                down=[m for _, m in downs],
                blocks=[(m1, m2) for (_, m1), (_, m2) in blocks],
                up=[m for _, m in ups],
                final=m_fin)
    return arrays, meta


# ------------------------------- forward ------------------------------------ #

def resnet_generator_forward(arrays, x_nchw, *, meta):
    x = jnp.transpose(x_nchw, (0, 2, 3, 1))                      # NCHW -> NHWC
    # ReflectionPad(3) -> Conv7x7 -> BN -> ReLU
    x = _conv_bn_act_layer(x, arrays["stem"], meta["stem"],
                           stride=1, pad=3, pad_mode="reflect", act="relu")
    # 2x downsampling: Conv3x3 s2 p1 (zero pad) -> BN -> ReLU
    for a, m in zip(arrays["down"], meta["down"]):
        x = _conv_bn_act_layer(x, a, m, stride=2, pad=1, pad_mode="constant", act="relu")
    # ResNet blocks
    for (a1, a2), (m1, m2) in zip(arrays["blocks"], meta["blocks"]):
        x = _resnet_block(x, a1, m1, a2, m2)
    # 2x upsampling: ConvTranspose3x3 s2 -> BN -> ReLU
    for a, m in zip(arrays["up"], meta["up"]):
        x = _conv_transpose_layer(x, a, m)
    # ReflectionPad(3) -> Conv7x7 (bias) -> Tanh
    x = _final_layer(x, arrays["final"], meta["final"])
    return jnp.transpose(x, (0, 3, 1, 2))                        # NHWC -> NCHW


# -------------------------------- main --------------------------------------- #

if __name__ == "__main__":
    # Small config: input_nc=4, output_nc=4, ngf=8, n_blocks=2, batch=2, 16x16 images.
    INPUT_NC, OUTPUT_NC, NGF, N_BLOCKS = 4, 4, 8, 2
    N, H, W = 2, 16, 16

    key = jax.random.PRNGKey(0)
    kx, kp = jax.random.split(key)
    x = jax.random.normal(kx, (N, INPUT_NC, H, W), jnp.float32)

    raw_params = init_params(kp, INPUT_NC, OUTPUT_NC, NGF, N_BLOCKS)
    arrays, meta = preprocess_params(raw_params)     # one-time, outside jit

    fwd = jax.jit(functools.partial(resnet_generator_forward, meta=meta))
    out = jax.block_until_ready(fwd(arrays, x))

    assert out.shape == (N, OUTPUT_NC, H, W), out.shape
    assert bool(jnp.all(jnp.isfinite(out)))
    assert bool(jnp.all(jnp.abs(out) <= 1.0 + 1e-6))  # tanh range
    print("KERNEL_OK")
</pallas_src>

<mosaic_0001>
module attributes {stable_mosaic.version = 11 : i64} {
  func.func @_matmul_stats_kernel(%arg0: i32, %arg1: i32, %arg2: i32, %arg3: memref<512x256xbf16, #tpu.memory_space<vmem>>, %arg4: memref<256x128xbf16, #tpu.memory_space<vmem>>, %arg5: memref<512x128xf32, #tpu.memory_space<vmem>>, %arg6: memref<8x128xf32, #tpu.memory_space<vmem>>, %arg7: memref<8x128xf32, #tpu.memory_space<vmem>>, %arg8: memref<512x128xf32, #tpu.memory_space<vmem>>) attributes {dimension_semantics = [#tpu.dimension_semantics<parallel>, #tpu.dimension_semantics<parallel>, #tpu.dimension_semantics<arbitrary>], iteration_bounds = array<i64: 1, 1, 1>, scalar_prefetch = 0 : i64, scratch_operands = 1 : i64, tpu.core_type = #tpu.core_type<tc>, window_params = [{transform_indices = @transform_0, window_bounds = array<i64: 512, 256>}, {transform_indices = @transform_1, window_bounds = array<i64: 256, 128>}, {transform_indices = @transform_2, window_bounds = array<i64: 512, 128>}, {transform_indices = @transform_3, window_bounds = array<i64: 8, 128>}, {transform_indices = @transform_4, window_bounds = array<i64: 8, 128>}]} {
    %c0_i32 = arith.constant 0 : i32
    %0 = arith.cmpi eq, %arg2, %c0_i32 : i32
    %1 = arith.extui %0 : i1 to i32
    %c0_i32_0 = arith.constant 0 : i32
    %2 = arith.cmpi ne, %1, %c0_i32_0 : i32
    scf.if %2 {
      %cst_10 = arith.constant 0.000000e+00 : f32
      %12 = vector.broadcast %cst_10 : f32 to vector<512x128xf32>
      %c0_11 = arith.constant 0 : index
      %c0_12 = arith.constant 0 : index
      %13 = vector.load %arg8[%c0_11, %c0_12] : memref<512x128xf32, #tpu.memory_space<vmem>>, vector<512x128xf32>
      tpu.vector_store %arg8[%c0_11, %c0_12], %12 {strides = array<i32>} : memref<512x128xf32, #tpu.memory_space<vmem>>, vector<512x128xf32>,
    } else {
    }
    %c0 = arith.constant 0 : index
    %c0_1 = arith.constant 0 : index
    %3 = vector.load %arg8[%c0, %c0_1] : memref<512x128xf32, #tpu.memory_space<vmem>>, vector<512x128xf32>
    %c0_2 = arith.constant 0 : index
    %c0_3 = arith.constant 0 : index
    %4 = vector.load %arg3[%c0_2, %c0_3] : memref<512x256xbf16, #tpu.memory_space<vmem>>, vector<512x256xbf16>
    %c0_4 = arith.constant 0 : index
    %c0_5 = arith.constant 0 : index
    %5 = vector.load %arg4[%c0_4, %c0_5] : memref<256x128xbf16, #tpu.memory_space<vmem>>, vector<256x128xbf16>
    %cst = arith.constant dense<0.000000e+00> : vector<512x128xf32>
    %6 = tpu.matmul %4, %5, %cst {dimension_numbers = #tpu.dot_dimension_numbers<[1], [0], [0], [1], [0, 0, 1, 1], [], []>} : vector<512x256xbf16>, vector<256x128xbf16>, vector<512x128xf32> -> vector<512x128xf32>
    %7 = arith.addf %3, %6 : vector<512x128xf32>
    %c0_6 = arith.constant 0 : index
    %c0_7 = arith.constant 0 : index
    %8 = vector.load %arg8[%c0_6, %c0_7] : memref<512x128xf32, #tpu.memory_space<vmem>>, vector<512x128xf32>
    tpu.vector_store %arg8[%c0_6, %c0_7], %7 {strides = array<i32>} : memref<512x128xf32, #tpu.memory_space<vmem>>, vector<512x128xf32>,
    %c0_i32_8 = arith.constant 0 : i32
    %9 = arith.cmpi eq, %arg2, %c0_i32_8 : i32
    %10 = arith.extui %9 : i1 to i32
    %c0_i32_9 = arith.constant 0 : i32
    %11 = arith.cmpi ne, %10, %c0_i32_9 : i32
    scf.if %11 {
      %c0_10 = arith.constant 0 : index
      %c0_11 = arith.constant 0 : index
      %12 = vector.load %arg8[%c0_10, %c0_11] : memref<512x128xf32, #tpu.memory_space<vmem>>, vector<512x128xf32>
      %c0_12 = arith.constant 0 : index
      %c0_13 = arith.constant 0 : index
      %13 = vector.load %arg5[%c0_12, %c0_13] : memref<512x128xf32, #tpu.memory_space<vmem>>, vector<512x128xf32>
      tpu.vector_store %arg5[%c0_12, %c0_13], %12 {strides = array<i32>} : memref<512x128xf32, #tpu.memory_space<vmem>>, vector<512x128xf32>,
      %cst_14 = arith.constant dense<0.000000e+00> : vector<128xf32>
      %14 = vector.multi_reduction <add>, %12, %cst_14 [0] : vector<512x128xf32> to vector<128xf32>
      %15 = vector.shape_cast %14 : vector<128xf32> to vector<1x128xf32>
      %16 = arith.mulf %12, %12 : vector<512x128xf32>
      %cst_15 = arith.constant dense<0.000000e+00> : vector<128xf32>
      %17 = vector.multi_reduction <add>, %16, %cst_15 [0] : vector<512x128xf32> to vector<128xf32>
      %18 = vector.shape_cast %17 : vector<128xf32> to vector<1x128xf32>
      %19 = vector.shape_cast %15 : vector<1x128xf32> to vector<1x128xf32>
      %20 = vector.broadcast %19 : vector<1x128xf32> to vector<8x128xf32>
      %c0_16 = arith.constant 0 : index
      %c0_17 = arith.constant 0 : index
      %21 = vector.load %arg6[%c0_16, %c0_17] : memref<8x128xf32, #tpu.memory_space<vmem>>, vector<8x128xf32>
      tpu.vector_store %arg6[%c0_16, %c0_17], %20 {strides = array<i32>} : memref<8x128xf32, #tpu.memory_space<vmem>>, vector<8x128xf32>,
      %22 = vector.shape_cast %18 : vector<1x128xf32> to vector<1x128xf32>
      %23 = vector.broadcast %22 : vector<1x128xf32> to vector<8x128xf32>
      %c0_18 = arith.constant 0 : index
      %c0_19 = arith.constant 0 : index
      %24 = vector.load %arg7[%c0_18, %c0_19] : memref<8x128xf32, #tpu.memory_space<vmem>>, vector<8x128xf32>
      tpu.vector_store %arg7[%c0_18, %c0_19], %23 {strides = array<i32>} : memref<8x128xf32, #tpu.memory_space<vmem>>, vector<8x128xf32>,
    } else {
    }
    return
  }
  func.func @transform_0(%arg0: i32, %arg1: i32, %arg2: i32) -> (i32, i32) {
    %c0_i32 = arith.constant 0 : i32
    return %arg0, %arg2 : i32, i32
  }
  func.func @transform_1(%arg0: i32, %arg1: i32, %arg2: i32) -> (i32, i32) {
    %c0_i32 = arith.constant 0 : i32
    return %arg2, %arg1 : i32, i32
  }
  func.func @transform_2(%arg0: i32, %arg1: i32, %arg2: i32) -> (i32, i32) {
    %c0_i32 = arith.constant 0 : i32
    return %arg0, %arg1 : i32, i32
  }
  func.func @transform_3(%arg0: i32, %arg1: i32, %arg2: i32) -> (i32, i32) {
    %c0_i32 = arith.constant 0 : i32
    return %arg0, %arg1 : i32, i32
  }
  func.func @transform_4(%arg0: i32, %arg1: i32, %arg2: i32) -> (i32, i32) {
    %c0_i32 = arith.constant 0 : i32
    return %arg0, %arg1 : i32, i32
  }
}

module attributes {stable_mosaic.version = 11 : i64} {
  func.func @_scale_shift_kernel(%arg0: i32, %arg1: i32, %arg2: memref<512x128xf32, #tpu.memory_space<vmem>>, %arg3: memref<1x128xf32, #tpu.memory_space<vmem>>, %arg4: memref<1x128xf32, #tpu.memory_space<vmem>>, %arg5: memref<512x128xf32, #tpu.memory_space<vmem>>) attributes {dimension_semantics = [#tpu.dimension_semantics<parallel>, #tpu.dimension_semantics<parallel>], iteration_bounds = array<i64: 1, 1>, scalar_prefetch = 0 : i64, scratch_operands = 0 : i64, tpu.core_type = #tpu.core_type<tc>, window_params = [{transform_indices = @transform_0, window_bounds = array<i64: 512, 128>}, {transform_indices = @transform_1, window_bounds = array<i64: 1, 128>}, {transform_indices = @transform_2, window_bounds = array<i64: 1, 128>}, {transform_indices = @transform_3, window_bounds = array<i64: 512, 128>}]} {
    %c0 = arith.constant 0 : index
    %c0_0 = arith.constant 0 : index
    %0 = vector.load %arg2[%c0, %c0_0] : memref<512x128xf32, #tpu.memory_space<vmem>>, vector<512x128xf32>
    %c0_1 = arith.constant 0 : index
    %c0_2 = arith.constant 0 : index
    %1 = vector.load %arg3[%c0_1, %c0_2] : memref<1x128xf32, #tpu.memory_space<vmem>>, vector<1x128xf32>
    %2 = vector.broadcast %1 : vector<1x128xf32> to vector<512x128xf32>
    %3 = arith.mulf %0, %2 : vector<512x128xf32>
    %c0_3 = arith.constant 0 : index
    %c0_4 = arith.constant 0 : index
    %4 = vector.load %arg4[%c0_3, %c0_4] : memref<1x128xf32, #tpu.memory_space<vmem>>, vector<1x128xf32>
    %5 = vector.broadcast %4 : vector<1x128xf32> to vector<512x128xf32>
    %6 = arith.addf %3, %5 : vector<512x128xf32>
    %cst = arith.constant 0.000000e+00 : f32
    %7 = vector.broadcast %cst : f32 to vector<512x128xf32>
    %8 = arith.maximumf %6, %7 : vector<512x128xf32>
    %c0_5 = arith.constant 0 : index
    %c0_6 = arith.constant 0 : index
    %9 = vector.load %arg5[%c0_5, %c0_6] : memref<512x128xf32, #tpu.memory_space<vmem>>, vector<512x128xf32>
    tpu.vector_store %arg5[%c0_5, %c0_6], %8 {strides = array<i32>} : memref<512x128xf32, #tpu.memory_space<vmem>>, vector<512x128xf32>,
    return
  }
  func.func @transform_0(%arg0: i32, %arg1: i32) -> (i32, i32) {
    %c0_i32 = arith.constant 0 : i32
    return %arg0, %arg1 : i32, i32
  }
  func.func @transform_1(%arg0: i32, %arg1: i32) -> (i32, i32) {
    %c0_i32 = arith.constant 0 : i32
    %c0_i32_0 = arith.constant 0 : i32
    return %c0_i32, %arg1 : i32, i32
  }
  func.func @transform_2(%arg0: i32, %arg1: i32) -> (i32, i32) {
    %c0_i32 = arith.constant 0 : i32
    %c0_i32_0 = arith.constant 0 : i32
    return %c0_i32, %arg1 : i32, i32
  }
  func.func @transform_3(%arg0: i32, %arg1: i32) -> (i32, i32) {
    %c0_i32 = arith.constant 0 : i32
    return %arg0, %arg1 : i32, i32
  }
}

module attributes {stable_mosaic.version = 11 : i64} {
  func.func @_matmul_stats_kernel(%arg0: i32, %arg1: i32, %arg2: i32, %arg3: memref<128x128xbf16, #tpu.memory_space<vmem>>, %arg4: memref<128x128xbf16, #tpu.memory_space<vmem>>, %arg5: memref<128x128xf32, #tpu.memory_space<vmem>>, %arg6: memref<8x128xf32, #tpu.memory_space<vmem>>, %arg7: memref<8x128xf32, #tpu.memory_space<vmem>>, %arg8: memref<128x128xf32, #tpu.memory_space<vmem>>) attributes {dimension_semantics = [#tpu.dimension_semantics<parallel>, #tpu.dimension_semantics<parallel>, #tpu.dimension_semantics<arbitrary>], iteration_bounds = array<i64: 1, 1, 1>, scalar_prefetch = 0 : i64, scratch_operands = 1 : i64, tpu.core_type = #tpu.core_type<tc>, window_params = [{transform_indices = @transform_0, window_bounds = array<i64: 128, 128>}, {transform_indices = @transform_1, window_bounds = array<i64: 128, 128>}, {transform_indices = @transform_2, window_bounds = array<i64: 128, 128>}, {transform_indices = @transform_3, window_bounds = array<i64: 8, 128>}, {transform_indices = @transform_4, window_bounds = array<i64: 8, 128>}]} {
    %c0_i32 = arith.constant 0 : i32
    %0 = arith.cmpi eq, %arg2, %c0_i32 : i32
    %1 = arith.extui %0 : i1 to i32
    %c0_i32_0 = arith.constant 0 : i32
    %2 = arith.cmpi ne, %1, %c0_i32_0 : i32
    scf.if %2 {
      %cst_10 = arith.constant 0.000000e+00 : f32
      %12 = vector.broadcast %cst_10 : f32 to vector<128x128xf32>
      %c0_11 = arith.constant 0 : index
      %c0_12 = arith.constant 0 : index
      %13 = vector.load %arg8[%c0_11, %c0_12] : memref<128x128xf32, #tpu.memory_space<vmem>>, vector<128x128xf32>
      tpu.vector_store %arg8[%c0_11, %c0_12], %12 {strides = array<i32>} : memref<128x128xf32, #tpu.memory_space<vmem>>, vector<128x128xf32>,
    } else {
    }
    %c0 = arith.constant 0 : index
    %c0_1 = arith.constant 0 : index
    %3 = vector.load %arg8[%c0, %c0_1] : memref<128x128xf32, #tpu.memory_space<vmem>>, vector<128x128xf32>
    %c0_2 = arith.constant 0 : index
    %c0_3 = arith.constant 0 : index
    %4 = vector.load %arg3[%c0_2, %c0_3] : memref<128x128xbf16, #tpu.memory_space<vmem>>, vector<128x128xbf16>
    %c0_4 = arith.constant 0 : index
    %c0_5 = arith.constant 0 : index
    %5 = vector.load %arg4[%c0_4, %c0_5] : memref<128x128xbf16, #tpu.memory_space<vmem>>, vector<128x128xbf16>
    %cst = arith.constant dense<0.000000e+00> : vector<128x128xf32>
    %6 = tpu.matmul %4, %5, %cst {dimension_numbers = #tpu.dot_dimension_numbers<[1], [0], [0], [1], [0, 0, 1, 1], [], []>} : vector<128x128xbf16>, vector<128x128xbf16>, vector<128x128xf32> -> vector<128x128xf32>
    %7 = arith.addf %3, %6 : vector<128x128xf32>
    %c0_6 = arith.constant 0 : index
    %c0_7 = arith.constant 0 : index
    %8 = vector.load %arg8[%c0_6, %c0_7] : memref<128x128xf32, #tpu.memory_space<vmem>>, vector<128x128xf32>
    tpu.vector_store %arg8[%c0_6, %c0_7], %7 {strides = array<i32>} : memref<128x128xf32, #tpu.memory_space<vmem>>, vector<128x128xf32>,
    %c0_i32_8 = arith.constant 0 : i32
    %9 = arith.cmpi eq, %arg2, %c0_i32_8 : i32
    %10 = arith.extui %9 : i1 to i32
    %c0_i32_9 = arith.constant 0 : i32
    %11 = arith.cmpi ne, %10, %c0_i32_9 : i32
    scf.if %11 {
      %c0_10 = arith.constant 0 : index
      %c0_11 = arith.constant 0 : index
      %12 = vector.load %arg8[%c0_10, %c0_11] : memref<128x128xf32, #tpu.memory_space<vmem>>, vector<128x128xf32>
      %c0_12 = arith.constant 0 : index
      %c0_13 = arith.constant 0 : index
      %13 = vector.load %arg5[%c0_12, %c0_13] : memref<128x128xf32, #tpu.memory_space<vmem>>, vector<128x128xf32>
      tpu.vector_store %arg5[%c0_12, %c0_13], %12 {strides = array<i32>} : memref<128x128xf32, #tpu.memory_space<vmem>>, vector<128x128xf32>,
      %cst_14 = arith.constant dense<0.000000e+00> : vector<128xf32>
      %14 = vector.multi_reduction <add>, %12, %cst_14 [0] : vector<128x128xf32> to vector<128xf32>
      %15 = vector.shape_cast %14 : vector<128xf32> to vector<1x128xf32>
      %16 = arith.mulf %12, %12 : vector<128x128xf32>
      %cst_15 = arith.constant dense<0.000000e+00> : vector<128xf32>
      %17 = vector.multi_reduction <add>, %16, %cst_15 [0] : vector<128x128xf32> to vector<128xf32>
      %18 = vector.shape_cast %17 : vector<128xf32> to vector<1x128xf32>
      %19 = vector.shape_cast %15 : vector<1x128xf32> to vector<1x128xf32>
      %20 = vector.broadcast %19 : vector<1x128xf32> to vector<8x128xf32>
      %c0_16 = arith.constant 0 : index
      %c0_17 = arith.constant 0 : index
      %21 = vector.load %arg6[%c0_16, %c0_17] : memref<8x128xf32, #tpu.memory_space<vmem>>, vector<8x128xf32>
      tpu.vector_store %arg6[%c0_16, %c0_17], %20 {strides = array<i32>} : memref<8x128xf32, #tpu.memory_space<vmem>>, vector<8x128xf32>,
      %22 = vector.shape_cast %18 : vector<1x128xf32> to vector<1x128xf32>
      %23 = vector.broadcast %22 : vector<1x128xf32> to vector<8x128xf32>
      %c0_18 = arith.constant 0 : index
      %c0_19 = arith.constant 0 : index
      %24 = vector.load %arg7[%c0_18, %c0_19] : memref<8x128xf32, #tpu.memory_space<vmem>>, vector<8x128xf32>
      tpu.vector_store %arg7[%c0_18, %c0_19], %23 {strides = array<i32>} : memref<8x128xf32, #tpu.memory_space<vmem>>, vector<8x128xf32>,
    } else {
    }
    return
  }
  func.func @transform_0(%arg0: i32, %arg1: i32, %arg2: i32) -> (i32, i32) {
    %c0_i32 = arith.constant 0 : i32
    return %arg0, %arg2 : i32, i32
  }
  func.func @transform_1(%arg0: i32, %arg1: i32, %arg2: i32) -> (i32, i32) {
    %c0_i32 = arith.constant 0 : i32
    return %arg2, %arg1 : i32, i32
  }
  func.func @transform_2(%arg0: i32, %arg1: i32, %arg2: i32) -> (i32, i32) {
    %c0_i32 = arith.constant 0 : i32
    return %arg0, %arg1 : i32, i32
  }
  func.func @transform_3(%arg0: i32, %arg1: i32, %arg2: i32) -> (i32, i32) {
    %c0_i32 = arith.constant 0 : i32
    return %arg0, %arg1 : i32, i32
  }
  func.func @transform_4(%arg0: i32, %arg1: i32, %arg2: i32) -> (i32, i32) {
    %c0_i32 = arith.constant 0 : i32
    return %arg0, %arg1 : i32, i32
  }
}

module attributes {stable_mosaic.version = 11 : i64} {
  func.func @_scale_shift_kernel(%arg0: i32, %arg1: i32, %arg2: memref<128x128xf32, #tpu.memory_space<vmem>>, %arg3: memref<1x128xf32, #tpu.memory_space<vmem>>, %arg4: memref<1x128xf32, #tpu.memory_space<vmem>>, %arg5: memref<128x128xf32, #tpu.memory_space<vmem>>) attributes {dimension_semantics = [#tpu.dimension_semantics<parallel>, #tpu.dimension_semantics<parallel>], iteration_bounds = array<i64: 1, 1>, scalar_prefetch = 0 : i64, scratch_operands = 0 : i64, tpu.core_type = #tpu.core_type<tc>, window_params = [{transform_indices = @transform_0, window_bounds = array<i64: 128, 128>}, {transform_indices = @transform_1, window_bounds = array<i64: 1, 128>}, {transform_indices = @transform_2, window_bounds = array<i64: 1, 128>}, {transform_indices = @transform_3, window_bounds = array<i64: 128, 128>}]} {
    %c0 = arith.constant 0 : index
    %c0_0 = arith.constant 0 : index
    %0 = vector.load %arg2[%c0, %c0_0] : memref<128x128xf32, #tpu.memory_space<vmem>>, vector<128x128xf32>
    %c0_1 = arith.constant 0 : index
    %c0_2 = arith.constant 0 : index
    %1 = vector.load %arg3[%c0_1, %c0_2] : memref<1x128xf32, #tpu.memory_space<vmem>>, vector<1x128xf32>
    %2 = vector.broadcast %1 : vector<1x128xf32> to vector<128x128xf32>
    %3 = arith.mulf %0, %2 : vector<128x128xf32>
    %c0_3 = arith.constant 0 : index
    %c0_4 = arith.constant 0 : index
    %4 = vector.load %arg4[%c0_3, %c0_4] : memref<1x128xf32, #tpu.memory_space<vmem>>, vector<1x128xf32>
    %5 = vector.broadcast %4 : vector<1x128xf32> to vector<128x128xf32>
    %6 = arith.addf %3, %5 : vector<128x128xf32>
    %cst = arith.constant 0.000000e+00 : f32
    %7 = vector.broadcast %cst : f32 to vector<128x128xf32>
    %8 = arith.maximumf %6, %7 : vector<128x128xf32>
    %c0_5 = arith.constant 0 : index
    %c0_6 = arith.constant 0 : index
    %9 = vector.load %arg5[%c0_5, %c0_6] : memref<128x128xf32, #tpu.memory_space<vmem>>, vector<128x128xf32>
    tpu.vector_store %arg5[%c0_5, %c0_6], %8 {strides = array<i32>} : memref<128x128xf32, #tpu.memory_space<vmem>>, vector<128x128xf32>,
    return
  }
  func.func @transform_0(%arg0: i32, %arg1: i32) -> (i32, i32) {
    %c0_i32 = arith.constant 0 : i32
    return %arg0, %arg1 : i32, i32
  }
  func.func @transform_1(%arg0: i32, %arg1: i32) -> (i32, i32) {
    %c0_i32 = arith.constant 0 : i32
    %c0_i32_0 = arith.constant 0 : i32
    return %c0_i32, %arg1 : i32, i32
  }
  func.func @transform_2(%arg0: i32, %arg1: i32) -> (i32, i32) {
    %c0_i32 = arith.constant 0 : i32
    %c0_i32_0 = arith.constant 0 : i32
    return %c0_i32, %arg1 : i32, i32
  }
  func.func @transform_3(%arg0: i32, %arg1: i32) -> (i32, i32) {
    %c0_i32 = arith.constant 0 : i32
    return %arg0, %arg1 : i32, i32
  }
}

module attributes {stable_mosaic.version = 11 : i64} {
  func.func @_matmul_stats_kernel(%arg0: i32, %arg1: i32, %arg2: i32, %arg3: memref<32x256xbf16, #tpu.memory_space<vmem>>, %arg4: memref<256x128xbf16, #tpu.memory_space<vmem>>, %arg5: memref<32x128xf32, #tpu.memory_space<vmem>>, %arg6: memref<8x128xf32, #tpu.memory_space<vmem>>, %arg7: memref<8x128xf32, #tpu.memory_space<vmem>>, %arg8: memref<32x128xf32, #tpu.memory_space<vmem>>) attributes {dimension_semantics = [#tpu.dimension_semantics<parallel>, #tpu.dimension_semantics<parallel>, #tpu.dimension_semantics<arbitrary>], iteration_bounds = array<i64: 1, 1, 1>, scalar_prefetch = 0 : i64, scratch_operands = 1 : i64, tpu.core_type = #tpu.core_type<tc>, window_params = [{transform_indices = @transform_0, window_bounds = array<i64: 32, 256>}, {transform_indices = @transform_1, window_bounds = array<i64: 256, 128>}, {transform_indices = @transform_2, window_bounds = array<i64: 32, 128>}, {transform_indices = @transform_3, window_bounds = array<i64: 8, 128>}, {transform_indices = @transform_4, window_bounds = array<i64: 8, 128>}]} {
    %c0_i32 = arith.constant 0 : i32
    %0 = arith.cmpi eq, %arg2, %c0_i32 : i32
    %1 = arith.extui %0 : i1 to i32
    %c0_i32_0 = arith.constant 0 : i32
    %2 = arith.cmpi ne, %1, %c0_i32_0 : i32
    scf.if %2 {
      %cst_10 = arith.constant 0.000000e+00 : f32
      %12 = vector.broadcast %cst_10 : f32 to vector<32x128xf32>
      %c0_11 = arith.constant 0 : index
      %c0_12 = arith.constant 0 : index
      %13 = vector.load %arg8[%c0_11, %c0_12] : memref<32x128xf32, #tpu.memory_space<vmem>>, vector<32x128xf32>
      tpu.vector_store %arg8[%c0_11, %c0_12], %12 {strides = array<i32>} : memref<32x128xf32, #tpu.memory_space<vmem>>, vector<32x128xf32>,
    } else {
    }
    %c0 = arith.constant 0 : index
    %c0_1 = arith.constant 0 : index
    %3 = vector.load %arg8[%c0, %c0_1] : memref<32x128xf32, #tpu.memory_space<vmem>>, vector<32x128xf32>
    %c0_2 = arith.constant 0 : index
    %c0_3 = arith.constant 0 : index
    %4 = vector.load %arg3[%c0_2, %c0_3] : memref<32x256xbf16, #tpu.memory_space<vmem>>, vector<32x256xbf16>
    %c0_4 = arith.constant 0 : index
    %c0_5 = arith.constant 0 : index
    %5 = vector.load %arg4[%c0_4, %c0_5] : memref<256x128xbf16, #tpu.memory_space<vmem>>, vector<256x128xbf16>
    %cst = arith.constant dense<0.000000e+00> : vector<32x128xf32>
    %6 = tpu.matmul %4, %5, %cst {dimension_numbers = #tpu.dot_dimension_numbers<[1], [0], [0], [1], [0, 0, 1, 1], [], []>} : vector<32x256xbf16>, vector<256x128xbf16>, vector<32x128xf32> -> vector<32x128xf32>
    %7 = arith.addf %3, %6 : vector<32x128xf32>
    %c0_6 = arith.constant 0 : index
    %c0_7 = arith.constant 0 : index
    %8 = vector.load %arg8[%c0_6, %c0_7] : memref<32x128xf32, #tpu.memory_space<vmem>>, vector<32x128xf32>
    tpu.vector_store %arg8[%c0_6, %c0_7], %7 {strides = array<i32>} : memref<32x128xf32, #tpu.memory_space<vmem>>, vector<32x128xf32>,
    %c0_i32_8 = arith.constant 0 : i32
    %9 = arith.cmpi eq, %arg2, %c0_i32_8 : i32
    %10 = arith.extui %9 : i1 to i32
    %c0_i32_9 = arith.constant 0 : i32
    %11 = arith.cmpi ne, %10, %c0_i32_9 : i32
    scf.if %11 {
      %c0_10 = arith.constant 0 : index
      %c0_11 = arith.constant 0 : index
      %12 = vector.load %arg8[%c0_10, %c0_11] : memref<32x128xf32, #tpu.memory_space<vmem>>, vector<32x128xf32>
      %c0_12 = arith.constant 0 : index
      %c0_13 = arith.constant 0 : index
      %13 = vector.load %arg5[%c0_12, %c0_13] : memref<32x128xf32, #tpu.memory_space<vmem>>, vector<32x128xf32>
      tpu.vector_store %arg5[%c0_12, %c0_13], %12 {strides = array<i32>} : memref<32x128xf32, #tpu.memory_space<vmem>>, vector<32x128xf32>,
      %cst_14 = arith.constant dense<0.000000e+00> : vector<128xf32>
      %14 = vector.multi_reduction <add>, %12, %cst_14 [0] : vector<32x128xf32> to vector<128xf32>
      %15 = vector.shape_cast %14 : vector<128xf32> to vector<1x128xf32>
      %16 = arith.mulf %12, %12 : vector<32x128xf32>
      %cst_15 = arith.constant dense<0.000000e+00> : vector<128xf32>
      %17 = vector.multi_reduction <add>, %16, %cst_15 [0] : vector<32x128xf32> to vector<128xf32>
      %18 = vector.shape_cast %17 : vector<128xf32> to vector<1x128xf32>
      %19 = vector.shape_cast %15 : vector<1x128xf32> to vector<1x128xf32>
      %20 = vector.broadcast %19 : vector<1x128xf32> to vector<8x128xf32>
      %c0_16 = arith.constant 0 : index
      %c0_17 = arith.constant 0 : index
      %21 = vector.load %arg6[%c0_16, %c0_17] : memref<8x128xf32, #tpu.memory_space<vmem>>, vector<8x128xf32>
      tpu.vector_store %arg6[%c0_16, %c0_17], %20 {strides = array<i32>} : memref<8x128xf32, #tpu.memory_space<vmem>>, vector<8x128xf32>,
      %22 = vector.shape_cast %18 : vector<1x128xf32> to vector<1x128xf32>
      %23 = vector.broadcast %22 : vector<1x128xf32> to vector<8x128xf32>
      %c0_18 = arith.constant 0 : index
      %c0_19 = arith.constant 0 : index
      %24 = vector.load %arg7[%c0_18, %c0_19] : memref<8x128xf32, #tpu.memory_space<vmem>>, vector<8x128xf32>
      tpu.vector_store %arg7[%c0_18, %c0_19], %23 {strides = array<i32>} : memref<8x128xf32, #tpu.memory_space<vmem>>, vector<8x128xf32>,
    } else {
    }
    return
  }
  func.func @transform_0(%arg0: i32, %arg1: i32, %arg2: i32) -> (i32, i32) {
    %c0_i32 = arith.constant 0 : i32
    return %arg0, %arg2 : i32, i32
  }
  func.func @transform_1(%arg0: i32, %arg1: i32, %arg2: i32) -> (i32, i32) {
    %c0_i32 = arith.constant 0 : i32
    return %arg2, %arg1 : i32, i32
  }
  func.func @transform_2(%arg0: i32, %arg1: i32, %arg2: i32) -> (i32, i32) {
    %c0_i32 = arith.constant 0 : i32
    return %arg0, %arg1 : i32, i32
  }
  func.func @transform_3(%arg0: i32, %arg1: i32, %arg2: i32) -> (i32, i32) {
    %c0_i32 = arith.constant 0 : i32
    return %arg0, %arg1 : i32, i32
  }
  func.func @transform_4(%arg0: i32, %arg1: i32, %arg2: i32) -> (i32, i32) {
    %c0_i32 = arith.constant 0 : i32
    return %arg0, %arg1 : i32, i32
  }
}

module attributes {stable_mosaic.version = 11 : i64} {
  func.func @_scale_shift_kernel(%arg0: i32, %arg1: i32, %arg2: memref<32x128xf32, #tpu.memory_space<vmem>>, %arg3: memref<1x128xf32, #tpu.memory_space<vmem>>, %arg4: memref<1x128xf32, #tpu.memory_space<vmem>>, %arg5: memref<32x128xf32, #tpu.memory_space<vmem>>) attributes {dimension_semantics = [#tpu.dimension_semantics<parallel>, #tpu.dimension_semantics<parallel>], iteration_bounds = array<i64: 1, 1>, scalar_prefetch = 0 : i64, scratch_operands = 0 : i64, tpu.core_type = #tpu.core_type<tc>, window_params = [{transform_indices = @transform_0, window_bounds = array<i64: 32, 128>}, {transform_indices = @transform_1, window_bounds = array<i64: 1, 128>}, {transform_indices = @transform_2, window_bounds = array<i64: 1, 128>}, {transform_indices = @transform_3, window_bounds = array<i64: 32, 128>}]} {
    %c0 = arith.constant 0 : index
    %c0_0 = arith.constant 0 : index
    %0 = vector.load %arg2[%c0, %c0_0] : memref<32x128xf32, #tpu.memory_space<vmem>>, vector<32x128xf32>
    %c0_1 = arith.constant 0 : index
    %c0_2 = arith.constant 0 : index
    %1 = vector.load %arg3[%c0_1, %c0_2] : memref<1x128xf32, #tpu.memory_space<vmem>>, vector<1x128xf32>
    %2 = vector.broadcast %1 : vector<1x128xf32> to vector<32x128xf32>
    %3 = arith.mulf %0, %2 : vector<32x128xf32>
    %c0_3 = arith.constant 0 : index
    %c0_4 = arith.constant 0 : index
    %4 = vector.load %arg4[%c0_3, %c0_4] : memref<1x128xf32, #tpu.memory_space<vmem>>, vector<1x128xf32>
    %5 = vector.broadcast %4 : vector<1x128xf32> to vector<32x128xf32>
    %6 = arith.addf %3, %5 : vector<32x128xf32>
    %cst = arith.constant 0.000000e+00 : f32
    %7 = vector.broadcast %cst : f32 to vector<32x128xf32>
    %8 = arith.maximumf %6, %7 : vector<32x128xf32>
    %c0_5 = arith.constant 0 : index
    %c0_6 = arith.constant 0 : index
    %9 = vector.load %arg5[%c0_5, %c0_6] : memref<32x128xf32, #tpu.memory_space<vmem>>, vector<32x128xf32>
    tpu.vector_store %arg5[%c0_5, %c0_6], %8 {strides = array<i32>} : memref<32x128xf32, #tpu.memory_space<vmem>>, vector<32x128xf32>,
    return
  }
  func.func @transform_0(%arg0: i32, %arg1: i32) -> (i32, i32) {
    %c0_i32 = arith.constant 0 : i32
    return %arg0, %arg1 : i32, i32
  }
  func.func @transform_1(%arg0: i32, %arg1: i32) -> (i32, i32) {
    %c0_i32 = arith.constant 0 : i32
    %c0_i32_0 = arith.constant 0 : i32
    return %c0_i32, %arg1 : i32, i32
  }
  func.func @transform_2(%arg0: i32, %arg1: i32) -> (i32, i32) {
    %c0_i32 = arith.constant 0 : i32
    %c0_i32_0 = arith.constant 0 : i32
    return %c0_i32, %arg1 : i32, i32
  }
  func.func @transform_3(%arg0: i32, %arg1: i32) -> (i32, i32) {
    %c0_i32 = arith.constant 0 : i32
    return %arg0, %arg1 : i32, i32
  }
}

module attributes {stable_mosaic.version = 11 : i64} {
  func.func @_matmul_stats_kernel(%arg0: i32, %arg1: i32, %arg2: i32, %arg3: memref<32x128xbf16, #tpu.memory_space<vmem>>, %arg4: memref<128x128xbf16, #tpu.memory_space<vmem>>, %arg5: memref<32x128xf32, #tpu.memory_space<vmem>>, %arg6: memref<8x128xf32, #tpu.memory_space<vmem>>, %arg7: memref<8x128xf32, #tpu.memory_space<vmem>>, %arg8: memref<32x128xf32, #tpu.memory_space<vmem>>) attributes {dimension_semantics = [#tpu.dimension_semantics<parallel>, #tpu.dimension_semantics<parallel>, #tpu.dimension_semantics<arbitrary>], iteration_bounds = array<i64: 1, 1, 3>, scalar_prefetch = 0 : i64, scratch_operands = 1 : i64, tpu.core_type = #tpu.core_type<tc>, window_params = [{transform_indices = @transform_0, window_bounds = array<i64: 32, 128>}, {transform_indices = @transform_1, window_bounds = array<i64: 128, 128>}, {transform_indices = @transform_2, window_bounds = array<i64: 32, 128>}, {transform_indices = @transform_3, window_bounds = array<i64: 8, 128>}, {transform_indices = @transform_4, window_bounds = array<i64: 8, 128>}]} {
    %c0_i32 = arith.constant 0 : i32
    %0 = arith.cmpi eq, %arg2, %c0_i32 : i32
    %1 = arith.extui %0 : i1 to i32
    %c0_i32_0 = arith.constant 0 : i32
    %2 = arith.cmpi ne, %1, %c0_i32_0 : i32
    scf.if %2 {
      %cst_9 = arith.constant 0.000000e+00 : f32
      %12 = vector.broadcast %cst_9 : f32 to vector<32x128xf32>
      %c0_10 = arith.constant 0 : index
      %c0_11 = arith.constant 0 : index
      %13 = vector.load %arg8[%c0_10, %c0_11] : memref<32x128xf32, #tpu.memory_space<vmem>>, vector<32x128xf32>
      tpu.vector_store %arg8[%c0_10, %c0_11], %12 {strides = array<i32>} : memref<32x128xf32, #tpu.memory_space<vmem>>, vector<32x128xf32>,
    } else {
    }
    %c0 = arith.constant 0 : index
    %c0_1 = arith.constant 0 : index
    %3 = vector.load %arg8[%c0, %c0_1] : memref<32x128xf32, #tpu.memory_space<vmem>>, vector<32x128xf32>
    %c0_2 = arith.constant 0 : index
    %c0_3 = arith.constant 0 : index
    %4 = vector.load %arg3[%c0_2, %c0_3] : memref<32x128xbf16, #tpu.memory_space<vmem>>, vector<32x128xbf16>
    %c0_4 = arith.constant 0 : index
    %c0_5 = arith.constant 0 : index
    %5 = vector.load %arg4[%c0_4, %c0_5] : memref<128x128xbf16, #tpu.memory_space<vmem>>, vector<128x128xbf16>
    %cst = arith.constant dense<0.000000e+00> : vector<32x128xf32>
    %6 = tpu.matmul %4, %5, %cst {dimension_numbers = #tpu.dot_dimension_numbers<[1], [0], [0], [1], [0, 0, 1, 1], [], []>} : vector<32x128xbf16>, vector<128x128xbf16>, vector<32x128xf32> -> vector<32x128xf32>
    %7 = arith.addf %3, %6 : vector<32x128xf32>
    %c0_6 = arith.constant 0 : index
    %c0_7 = arith.constant 0 : index
    %8 = vector.load %arg8[%c0_6, %c0_7] : memref<32x128xf32, #tpu.memory_space<vmem>>, vector<32x128xf32>
    tpu.vector_store %arg8[%c0_6, %c0_7], %7 {strides = array<i32>} : memref<32x128xf32, #tpu.memory_space<vmem>>, vector<32x128xf32>,
    %c2_i32 = arith.constant 2 : i32
    %9 = arith.cmpi eq, %arg2, %c2_i32 : i32
    %10 = arith.extui %9 : i1 to i32
    %c0_i32_8 = arith.constant 0 : i32
    %11 = arith.cmpi ne, %10, %c0_i32_8 : i32
    scf.if %11 {
      %c0_9 = arith.constant 0 : index
      %c0_10 = arith.constant 0 : index
      %12 = vector.load %arg8[%c0_9, %c0_10] : memref<32x128xf32, #tpu.memory_space<vmem>>, vector<32x128xf32>
      %c0_11 = arith.constant 0 : index
      %c0_12 = arith.constant 0 : index
      %13 = vector.load %arg5[%c0_11, %c0_12] : memref<32x128xf32, #tpu.memory_space<vmem>>, vector<32x128xf32>
      tpu.vector_store %arg5[%c0_11, %c0_12], %12 {strides = array<i32>} : memref<32x128xf32, #tpu.memory_space<vmem>>, vector<32x128xf32>,
      %cst_13 = arith.constant dense<0.000000e+00> : vector<128xf32>
      %14 = vector.multi_reduction <add>, %12, %cst_13 [0] : vector<32x128xf32> to vector<128xf32>
      %15 = vector.shape_cast %14 : vector<128xf32> to vector<1x128xf32>
      %16 = arith.mulf %12, %12 : vector<32x128xf32>
      %cst_14 = arith.constant dense<0.000000e+00> : vector<128xf32>
      %17 = vector.multi_reduction <add>, %16, %cst_14 [0] : vector<32x128xf32> to vector<128xf32>
      %18 = vector.shape_cast %17 : vector<128xf32> to vector<1x128xf32>
      %19 = vector.shape_cast %15 : vector<1x128xf32> to vector<1x128xf32>
      %20 = vector.broadcast %19 : vector<1x128xf32> to vector<8x128xf32>
      %c0_15 = arith.constant 0 : index
      %c0_16 = arith.constant 0 : index
      %21 = vector.load %arg6[%c0_15, %c0_16] : memref<8x128xf32, #tpu.memory_space<vmem>>, vector<8x128xf32>
      tpu.vector_store %arg6[%c0_15, %c0_16], %20 {strides = array<i32>} : memref<8x128xf32, #tpu.memory_space<vmem>>, vector<8x128xf32>,
      %22 = vector.shape_cast %18 : vector<1x128xf32> to vector<1x128xf32>
      %23 = vector.broadcast %22 : vector<1x128xf32> to vector<8x128xf32>
      %c0_17 = arith.constant 0 : index
      %c0_18 = arith.constant 0 : index
      %24 = vector.load %arg7[%c0_17, %c0_18] : memref<8x128xf32, #tpu.memory_space<vmem>>, vector<8x128xf32>
      tpu.vector_store %arg7[%c0_17, %c0_18], %23 {strides = array<i32>} : memref<8x128xf32, #tpu.memory_space<vmem>>, vector<8x128xf32>,
    } else {
    }
    return
  }
  func.func @transform_0(%arg0: i32, %arg1: i32, %arg2: i32) -> (i32, i32) {
    %c0_i32 = arith.constant 0 : i32
    return %arg0, %arg2 : i32, i32
  }
  func.func @transform_1(%arg0: i32, %arg1: i32, %arg2: i32) -> (i32, i32) {
    %c0_i32 = arith.constant 0 : i32
    return %arg2, %arg1 : i32, i32
  }
  func.func @transform_2(%arg0: i32, %arg1: i32, %arg2: i32) -> (i32, i32) {
    %c0_i32 = arith.constant 0 : i32
    return %arg0, %arg1 : i32, i32
  }
  func.func @transform_3(%arg0: i32, %arg1: i32, %arg2: i32) -> (i32, i32) {
    %c0_i32 = arith.constant 0 : i32
    return %arg0, %arg1 : i32, i32
  }
  func.func @transform_4(%arg0: i32, %arg1: i32, %arg2: i32) -> (i32, i32) {
    %c0_i32 = arith.constant 0 : i32
    return %arg0, %arg1 : i32, i32
  }
}

module attributes {stable_mosaic.version = 11 : i64} {
  func.func @_scale_shift_kernel(%arg0: i32, %arg1: i32, %arg2: memref<32x128xf32, #tpu.memory_space<vmem>>, %arg3: memref<1x128xf32, #tpu.memory_space<vmem>>, %arg4: memref<1x128xf32, #tpu.memory_space<vmem>>, %arg5: memref<32x128xf32, #tpu.memory_space<vmem>>) attributes {dimension_semantics = [#tpu.dimension_semantics<parallel>, #tpu.dimension_semantics<parallel>], iteration_bounds = array<i64: 1, 1>, scalar_prefetch = 0 : i64, scratch_operands = 0 : i64, tpu.core_type = #tpu.core_type<tc>, window_params = [{transform_indices = @transform_0, window_bounds = array<i64: 32, 128>}, {transform_indices = @transform_1, window_bounds = array<i64: 1, 128>}, {transform_indices = @transform_2, window_bounds = array<i64: 1, 128>}, {transform_indices = @transform_3, window_bounds = array<i64: 32, 128>}]} {
    %c0 = arith.constant 0 : index
    %c0_0 = arith.constant 0 : index
    %0 = vector.load %arg2[%c0, %c0_0] : memref<32x128xf32, #tpu.memory_space<vmem>>, vector<32x128xf32>
    %c0_1 = arith.constant 0 : index
    %c0_2 = arith.constant 0 : index
    %1 = vector.load %arg3[%c0_1, %c0_2] : memref<1x128xf32, #tpu.memory_space<vmem>>, vector<1x128xf32>
    %2 = vector.broadcast %1 : vector<1x128xf32> to vector<32x128xf32>
    %3 = arith.mulf %0, %2 : vector<32x128xf32>
    %c0_3 = arith.constant 0 : index
    %c0_4 = arith.constant 0 : index
    %4 = vector.load %arg4[%c0_3, %c0_4] : memref<1x128xf32, #tpu.memory_space<vmem>>, vector<1x128xf32>
    %5 = vector.broadcast %4 : vector<1x128xf32> to vector<32x128xf32>
    %6 = arith.addf %3, %5 : vector<32x128xf32>
    %c0_5 = arith.constant 0 : index
    %c0_6 = arith.constant 0 : index
    %7 = vector.load %arg5[%c0_5, %c0_6] : memref<32x128xf32, #tpu.memory_space<vmem>>, vector<32x128xf32>
    tpu.vector_store %arg5[%c0_5, %c0_6], %6 {strides = array<i32>} : memref<32x128xf32, #tpu.memory_space<vmem>>, vector<32x128xf32>,
    return
  }
  func.func @transform_0(%arg0: i32, %arg1: i32) -> (i32, i32) {
    %c0_i32 = arith.constant 0 : i32
    return %arg0, %arg1 : i32, i32
  }
  func.func @transform_1(%arg0: i32, %arg1: i32) -> (i32, i32) {
    %c0_i32 = arith.constant 0 : i32
    %c0_i32_0 = arith.constant 0 : i32
    return %c0_i32, %arg1 : i32, i32
  }
  func.func @transform_2(%arg0: i32, %arg1: i32) -> (i32, i32) {
    %c0_i32 = arith.constant 0 : i32
    %c0_i32_0 = arith.constant 0 : i32
    return %c0_i32, %arg1 : i32, i32
  }
  func.func @transform_3(%arg0: i32, %arg1: i32) -> (i32, i32) {
    %c0_i32 = arith.constant 0 : i32
    return %arg0, %arg1 : i32, i32
  }
}

module attributes {stable_mosaic.version = 11 : i64} {
  func.func @_scale_shift_residual_kernel(%arg0: i32, %arg1: i32, %arg2: memref<32x128xf32, #tpu.memory_space<vmem>>, %arg3: memref<1x128xf32, #tpu.memory_space<vmem>>, %arg4: memref<1x128xf32, #tpu.memory_space<vmem>>, %arg5: memref<32x128xf32, #tpu.memory_space<vmem>>, %arg6: memref<32x128xf32, #tpu.memory_space<vmem>>) attributes {dimension_semantics = [#tpu.dimension_semantics<parallel>, #tpu.dimension_semantics<parallel>], iteration_bounds = array<i64: 1, 1>, scalar_prefetch = 0 : i64, scratch_operands = 0 : i64, tpu.core_type = #tpu.core_type<tc>, window_params = [{transform_indices = @transform_0, window_bounds = array<i64: 32, 128>}, {transform_indices = @transform_1, window_bounds = array<i64: 1, 128>}, {transform_indices = @transform_2, window_bounds = array<i64: 1, 128>}, {transform_indices = @transform_3, window_bounds = array<i64: 32, 128>}, {transform_indices = @transform_4, window_bounds = array<i64: 32, 128>}]} {
    %c0 = arith.constant 0 : index
    %c0_0 = arith.constant 0 : index
    %0 = vector.load %arg2[%c0, %c0_0] : memref<32x128xf32, #tpu.memory_space<vmem>>, vector<32x128xf32>
    %c0_1 = arith.constant 0 : index
    %c0_2 = arith.constant 0 : index
    %1 = vector.load %arg3[%c0_1, %c0_2] : memref<1x128xf32, #tpu.memory_space<vmem>>, vector<1x128xf32>
    %2 = vector.broadcast %1 : vector<1x128xf32> to vector<32x128xf32>
    %3 = arith.mulf %0, %2 : vector<32x128xf32>
    %c0_3 = arith.constant 0 : index
    %c0_4 = arith.constant 0 : index
    %4 = vector.load %arg4[%c0_3, %c0_4] : memref<1x128xf32, #tpu.memory_space<vmem>>, vector<1x128xf32>
    %5 = vector.broadcast %4 : vector<1x128xf32> to vector<32x128xf32>
    %6 = arith.addf %3, %5 : vector<32x128xf32>
    %c0_5 = arith.constant 0 : index
    %c0_6 = arith.constant 0 : index
    %7 = vector.load %arg5[%c0_5, %c0_6] : memref<32x128xf32, #tpu.memory_space<vmem>>, vector<32x128xf32>
    %8 = arith.addf %6, %7 : vector<32x128xf32>
    %c0_7 = arith.constant 0 : index
    %c0_8 = arith.constant 0 : index
    %9 = vector.load %arg6[%c0_7, %c0_8] : memref<32x128xf32, #tpu.memory_space<vmem>>, vector<32x128xf32>
    tpu.vector_store %arg6[%c0_7, %c0_8], %8 {strides = array<i32>} : memref<32x128xf32, #tpu.memory_space<vmem>>, vector<32x128xf32>,
    return
  }
  func.func @transform_0(%arg0: i32, %arg1: i32) -> (i32, i32) {
    %c0_i32 = arith.constant 0 : i32
    return %arg0, %arg1 : i32, i32
  }
  func.func @transform_1(%arg0: i32, %arg1: i32) -> (i32, i32) {
    %c0_i32 = arith.constant 0 : i32
    %c0_i32_0 = arith.constant 0 : i32
    return %c0_i32, %arg1 : i32, i32
  }
  func.func @transform_2(%arg0: i32, %arg1: i32) -> (i32, i32) {
    %c0_i32 = arith.constant 0 : i32
    %c0_i32_0 = arith.constant 0 : i32
    return %c0_i32, %arg1 : i32, i32
  }
  func.func @transform_3(%arg0: i32, %arg1: i32) -> (i32, i32) {
    %c0_i32 = arith.constant 0 : i32
    return %arg0, %arg1 : i32, i32
  }
  func.func @transform_4(%arg0: i32, %arg1: i32) -> (i32, i32) {
    %c0_i32 = arith.constant 0 : i32
    return %arg0, %arg1 : i32, i32
  }
}

module attributes {stable_mosaic.version = 11 : i64} {
  func.func @_matmul_stats_kernel(%arg0: i32, %arg1: i32, %arg2: i32, %arg3: memref<128x128xbf16, #tpu.memory_space<vmem>>, %arg4: memref<128x128xbf16, #tpu.memory_space<vmem>>, %arg5: memref<128x128xf32, #tpu.memory_space<vmem>>, %arg6: memref<8x128xf32, #tpu.memory_space<vmem>>, %arg7: memref<8x128xf32, #tpu.memory_space<vmem>>, %arg8: memref<128x128xf32, #tpu.memory_space<vmem>>) attributes {dimension_semantics = [#tpu.dimension_semantics<parallel>, #tpu.dimension_semantics<parallel>, #tpu.dimension_semantics<arbitrary>], iteration_bounds = array<i64: 1, 1, 3>, scalar_prefetch = 0 : i64, scratch_operands = 1 : i64, tpu.core_type = #tpu.core_type<tc>, window_params = [{transform_indices = @transform_0, window_bounds = array<i64: 128, 128>}, {transform_indices = @transform_1, window_bounds = array<i64: 128, 128>}, {transform_indices = @transform_2, window_bounds = array<i64: 128, 128>}, {transform_indices = @transform_3, window_bounds = array<i64: 8, 128>}, {transform_indices = @transform_4, window_bounds = array<i64: 8, 128>}]} {
    %c0_i32 = arith.constant 0 : i32
    %0 = arith.cmpi eq, %arg2, %c0_i32 : i32
    %1 = arith.extui %0 : i1 to i32
    %c0_i32_0 = arith.constant 0 : i32
    %2 = arith.cmpi ne, %1, %c0_i32_0 : i32
    scf.if %2 {
      %cst_9 = arith.constant 0.000000e+00 : f32
      %12 = vector.broadcast %cst_9 : f32 to vector<128x128xf32>
      %c0_10 = arith.constant 0 : index
      %c0_11 = arith.constant 0 : index
      %13 = vector.load %arg8[%c0_10, %c0_11] : memref<128x128xf32, #tpu.memory_space<vmem>>, vector<128x128xf32>
      tpu.vector_store %arg8[%c0_10, %c0_11], %12 {strides = array<i32>} : memref<128x128xf32, #tpu.memory_space<vmem>>, vector<128x128xf32>,
    } else {
    }
    %c0 = arith.constant 0 : index
    %c0_1 = arith.constant 0 : index
    %3 = vector.load %arg8[%c0, %c0_1] : memref<128x128xf32, #tpu.memory_space<vmem>>, vector<128x128xf32>
    %c0_2 = arith.constant 0 : index
    %c0_3 = arith.constant 0 : index
    %4 = vector.load %arg3[%c0_2, %c0_3] : memref<128x128xbf16, #tpu.memory_space<vmem>>, vector<128x128xbf16>
    %c0_4 = arith.constant 0 : index
    %c0_5 = arith.constant 0 : index
    %5 = vector.load %arg4[%c0_4, %c0_5] : memref<128x128xbf16, #tpu.memory_space<vmem>>, vector<128x128xbf16>
    %cst = arith.constant dense<0.000000e+00> : vector<128x128xf32>
    %6 = tpu.matmul %4, %5, %cst {dimension_numbers = #tpu.dot_dimension_numbers<[1], [0], [0], [1], [0, 0, 1, 1], [], []>} : vector<128x128xbf16>, vector<128x128xbf16>, vector<128x128xf32> -> vector<128x128xf32>
    %7 = arith.addf %3, %6 : vector<128x128xf32>
    %c0_6 = arith.constant 0 : index
    %c0_7 = arith.constant 0 : index
    %8 = vector.load %arg8[%c0_6, %c0_7] : memref<128x128xf32, #tpu.memory_space<vmem>>, vector<128x128xf32>
    tpu.vector_store %arg8[%c0_6, %c0_7], %7 {strides = array<i32>} : memref<128x128xf32, #tpu.memory_space<vmem>>, vector<128x128xf32>,
    %c2_i32 = arith.constant 2 : i32
    %9 = arith.cmpi eq, %arg2, %c2_i32 : i32
    %10 = arith.extui %9 : i1 to i32
    %c0_i32_8 = arith.constant 0 : i32
    %11 = arith.cmpi ne, %10, %c0_i32_8 : i32
    scf.if %11 {
      %c0_9 = arith.constant 0 : index
      %c0_10 = arith.constant 0 : index
      %12 = vector.load %arg8[%c0_9, %c0_10] : memref<128x128xf32, #tpu.memory_space<vmem>>, vector<128x128xf32>
      %c0_11 = arith.constant 0 : index
      %c0_12 = arith.constant 0 : index
      %13 = vector.load %arg5[%c0_11, %c0_12] : memref<128x128xf32, #tpu.memory_space<vmem>>, vector<128x128xf32>
      tpu.vector_store %arg5[%c0_11, %c0_12], %12 {strides = array<i32>} : memref<128x128xf32, #tpu.memory_space<vmem>>, vector<128x128xf32>,
      %cst_13 = arith.constant dense<0.000000e+00> : vector<128xf32>
      %14 = vector.multi_reduction <add>, %12, %cst_13 [0] : vector<128x128xf32> to vector<128xf32>
      %15 = vector.shape_cast %14 : vector<128xf32> to vector<1x128xf32>
      %16 = arith.mulf %12, %12 : vector<128x128xf32>
      %cst_14 = arith.constant dense<0.000000e+00> : vector<128xf32>
      %17 = vector.multi_reduction <add>, %16, %cst_14 [0] : vector<128x128xf32> to vector<128xf32>
      %18 = vector.shape_cast %17 : vector<128xf32> to vector<1x128xf32>
      %19 = vector.shape_cast %15 : vector<1x128xf32> to vector<1x128xf32>
      %20 = vector.broadcast %19 : vector<1x128xf32> to vector<8x128xf32>
      %c0_15 = arith.constant 0 : index
      %c0_16 = arith.constant 0 : index
      %21 = vector.load %arg6[%c0_15, %c0_16] : memref<8x128xf32, #tpu.memory_space<vmem>>, vector<8x128xf32>
      tpu.vector_store %arg6[%c0_15, %c0_16], %20 {strides = array<i32>} : memref<8x128xf32, #tpu.memory_space<vmem>>, vector<8x128xf32>,
      %22 = vector.shape_cast %18 : vector<1x128xf32> to vector<1x128xf32>
      %23 = vector.broadcast %22 : vector<1x128xf32> to vector<8x128xf32>
      %c0_17 = arith.constant 0 : index
      %c0_18 = arith.constant 0 : index
      %24 = vector.load %arg7[%c0_17, %c0_18] : memref<8x128xf32, #tpu.memory_space<vmem>>, vector<8x128xf32>
      tpu.vector_store %arg7[%c0_17, %c0_18], %23 {strides = array<i32>} : memref<8x128xf32, #tpu.memory_space<vmem>>, vector<8x128xf32>,
    } else {
    }
    return
  }
  func.func @transform_0(%arg0: i32, %arg1: i32, %arg2: i32) -> (i32, i32) {
    %c0_i32 = arith.constant 0 : i32
    return %arg0, %arg2 : i32, i32
  }
  func.func @transform_1(%arg0: i32, %arg1: i32, %arg2: i32) -> (i32, i32) {
    %c0_i32 = arith.constant 0 : i32
    return %arg2, %arg1 : i32, i32
  }
  func.func @transform_2(%arg0: i32, %arg1: i32, %arg2: i32) -> (i32, i32) {
    %c0_i32 = arith.constant 0 : i32
    return %arg0, %arg1 : i32, i32
  }
  func.func @transform_3(%arg0: i32, %arg1: i32, %arg2: i32) -> (i32, i32) {
    %c0_i32 = arith.constant 0 : i32
    return %arg0, %arg1 : i32, i32
  }
  func.func @transform_4(%arg0: i32, %arg1: i32, %arg2: i32) -> (i32, i32) {
    %c0_i32 = arith.constant 0 : i32
    return %arg0, %arg1 : i32, i32
  }
}

module attributes {stable_mosaic.version = 11 : i64} {
  func.func @_matmul_bias_tanh_kernel(%arg0: i32, %arg1: i32, %arg2: i32, %arg3: memref<512x256xbf16, #tpu.memory_space<vmem>>, %arg4: memref<256x128xbf16, #tpu.memory_space<vmem>>, %arg5: memref<1x128xf32, #tpu.memory_space<vmem>>, %arg6: memref<512x128xf32, #tpu.memory_space<vmem>>, %arg7: memref<512x128xf32, #tpu.memory_space<vmem>>) attributes {dimension_semantics = [#tpu.dimension_semantics<parallel>, #tpu.dimension_semantics<parallel>, #tpu.dimension_semantics<arbitrary>], iteration_bounds = array<i64: 1, 1, 2>, scalar_prefetch = 0 : i64, scratch_operands = 1 : i64, tpu.core_type = #tpu.core_type<tc>, window_params = [{transform_indices = @transform_0, window_bounds = array<i64: 512, 256>}, {transform_indices = @transform_1, window_bounds = array<i64: 256, 128>}, {transform_indices = @transform_2, window_bounds = array<i64: 1, 128>}, {transform_indices = @transform_3, window_bounds = array<i64: 512, 128>}]} {
    %c0_i32 = arith.constant 0 : i32
    %0 = arith.cmpi eq, %arg2, %c0_i32 : i32
    %1 = arith.extui %0 : i1 to i32
    %c0_i32_0 = arith.constant 0 : i32
    %2 = arith.cmpi ne, %1, %c0_i32_0 : i32
    scf.if %2 {
      %cst_9 = arith.constant 0.000000e+00 : f32
      %12 = vector.broadcast %cst_9 : f32 to vector<512x128xf32>
      %c0_10 = arith.constant 0 : index
      %c0_11 = arith.constant 0 : index
      %13 = vector.load %arg7[%c0_10, %c0_11] : memref<512x128xf32, #tpu.memory_space<vmem>>, vector<512x128xf32>
      tpu.vector_store %arg7[%c0_10, %c0_11], %12 {strides = array<i32>} : memref<512x128xf32, #tpu.memory_space<vmem>>, vector<512x128xf32>,
    } else {
    }
    %c0 = arith.constant 0 : index
    %c0_1 = arith.constant 0 : index
    %3 = vector.load %arg7[%c0, %c0_1] : memref<512x128xf32, #tpu.memory_space<vmem>>, vector<512x128xf32>
    %c0_2 = arith.constant 0 : index
    %c0_3 = arith.constant 0 : index
    %4 = vector.load %arg3[%c0_2, %c0_3] : memref<512x256xbf16, #tpu.memory_space<vmem>>, vector<512x256xbf16>
    %c0_4 = arith.constant 0 : index
    %c0_5 = arith.constant 0 : index
    %5 = vector.load %arg4[%c0_4, %c0_5] : memref<256x128xbf16, #tpu.memory_space<vmem>>, vector<256x128xbf16>
    %cst = arith.constant dense<0.000000e+00> : vector<512x128xf32>
    %6 = tpu.matmul %4, %5, %cst {dimension_numbers = #tpu.dot_dimension_numbers<[1], [0], [0], [1], [0, 0, 1, 1], [], []>} : vector<512x256xbf16>, vector<256x128xbf16>, vector<512x128xf32> -> vector<512x128xf32>
    %7 = arith.addf %3, %6 : vector<512x128xf32>
    %c0_6 = arith.constant 0 : index
    %c0_7 = arith.constant 0 : index
    %8 = vector.load %arg7[%c0_6, %c0_7] : memref<512x128xf32, #tpu.memory_space<vmem>>, vector<512x128xf32>
    tpu.vector_store %arg7[%c0_6, %c0_7], %7 {strides = array<i32>} : memref<512x128xf32, #tpu.memory_space<vmem>>, vector<512x128xf32>,
    %c1_i32 = arith.constant 1 : i32
    %9 = arith.cmpi eq, %arg2, %c1_i32 : i32
    %10 = arith.extui %9 : i1 to i32
    %c0_i32_8 = arith.constant 0 : i32
    %11 = arith.cmpi ne, %10, %c0_i32_8 : i32
    scf.if %11 {
      %c0_9 = arith.constant 0 : index
      %c0_10 = arith.constant 0 : index
      %12 = vector.load %arg7[%c0_9, %c0_10] : memref<512x128xf32, #tpu.memory_space<vmem>>, vector<512x128xf32>
      %c0_11 = arith.constant 0 : index
      %c0_12 = arith.constant 0 : index
      %13 = vector.load %arg5[%c0_11, %c0_12] : memref<1x128xf32, #tpu.memory_space<vmem>>, vector<1x128xf32>
      %14 = vector.broadcast %13 : vector<1x128xf32> to vector<512x128xf32>
      %15 = arith.addf %12, %14 : vector<512x128xf32>
      %16 = math.tanh %15 : vector<512x128xf32>
      %c0_13 = arith.constant 0 : index
      %c0_14 = arith.constant 0 : index
      %17 = vector.load %arg6[%c0_13, %c0_14] : memref<512x128xf32, #tpu.memory_space<vmem>>, vector<512x128xf32>
      tpu.vector_store %arg6[%c0_13, %c0_14], %16 {strides = array<i32>} : memref<512x128xf32, #tpu.memory_space<vmem>>, vector<512x128xf32>,
    } else {
    }
    return
  }
  func.func @transform_0(%arg0: i32, %arg1: i32, %arg2: i32) -> (i32, i32) {
    %c0_i32 = arith.constant 0 : i32
    return %arg0, %arg2 : i32, i32
  }
  func.func @transform_1(%arg0: i32, %arg1: i32, %arg2: i32) -> (i32, i32) {
    %c0_i32 = arith.constant 0 : i32
    return %arg2, %arg1 : i32, i32
  }
  func.func @transform_2(%arg0: i32, %arg1: i32, %arg2: i32) -> (i32, i32) {
    %c0_i32 = arith.constant 0 : i32
    %c0_i32_0 = arith.constant 0 : i32
    return %c0_i32, %arg1 : i32, i32
  }
  func.func @transform_3(%arg0: i32, %arg1: i32, %arg2: i32) -> (i32, i32) {
    %c0_i32 = arith.constant 0 : i32
    return %arg0, %arg1 : i32, i32
  }
}

</mosaic_0001>

<bundles_post_ra>
// kernel: resnet_generator_forward.20
= control target key start
LH: loop header
LB: loop body
LE: loop exit
PB: predicated region body
PF: predicated region fallthrough
CT: control target
= control target key end

     0   :  { %s896_s0 = inlined_call_operand.vmem [shape: f32[512,128], index: 0, kind: input, shape index: {}]   ;;  %s897_s1 = inlined_call_operand.vmem [shape: f32[1,128], index: 1, kind: input, shape index: {}]   ;;  %s898_s2 = inlined_call_operand.vmem [shape: f32[1,128], index: 2, kind: input, shape index: {}]   ;;  %s899_s3 = inlined_call_operand.vmem [shape: f32[512,128], index: 3, kind: output, shape index: {}]  }
   0x1   :  { %v14_v0 = vld [vmem:[%s896_s0] sm:$0xff]  ;;  %v15_v4 = vld [vmem:[%s896_s0 + $0x8] sm:$0xff]  ;;  %v16_v5 = vld [vmem:[%s896_s0 + $0x10] sm:$0xff] }
   0x2   :  { %v380_v1 = vld [vmem:[%s897_s1] ss:$0 sm:$0xff]  ;;  %v17_v6 = vld [vmem:[%s896_s0 + $0x18] sm:$0xff]  ;;  %v19_v11 = vld [vmem:[%s896_s0 + $0x28] sm:$0xff] }
   0x3   :  { %v385_v2 = vld [vmem:[%s898_s2] ss:$0 sm:$0xff]  ;;  %v85_v3 = vmul.f32 %v380_v1, %v14_v0  ;;  %v86_v7 = vmul.f32 %v380_v1, %v15_v4  ;;  %v87_v8 = vmul.f32 %v380_v1, %v16_v5  ;;  %v88_v9 = vmul.f32 %v380_v1, %v17_v6  ;;  %v20_v12 = vld [vmem:[%s896_s0 + $0x30] sm:$0xff]  ;;  %v21_v17 = vld [vmem:[%s896_s0 + $0x38] sm:$0xff] }
   0x4   :  { %v18_v10 = vld [vmem:[%s896_s0 + $0x20] sm:$0xff]  ;;  %v90_v15 = vmul.f32 %v380_v1, %v19_v11  ;;  %v91_v16 = vmul.f32 %v380_v1, %v20_v12  ;;  %v92_v21 = vmul.f32 %v380_v1, %v21_v17  ;;  %v23_v27 = vld [vmem:[%s896_s0 + $0x48] sm:$0xff]  ;;  %v24_v28 = vld [vmem:[%s896_s0 + $0x50] sm:$0xff] }
   0x5   :  { %v156_v13 = vadd.f32 %v385_v2, %v85_v3  ;;  %v89_v14 = vmul.f32 %v380_v1, %v18_v10  ;;  %v157_v18 = vadd.f32 %v385_v2, %v86_v7  ;;  %v158_v19 = vadd.f32 %v385_v2, %v87_v8  ;;  %v22_v22 = vld [vmem:[%s896_s0 + $0x40] sm:$0xff]  ;;  %v25_v29 = vld [vmem:[%s896_s0 + $0x58] sm:$0xff]  ;;  %v27_v35 = vld [vmem:[%s896_s0 + $0x68] sm:$0xff] }
   0x6   :  { %v159_v20 = vadd.f32 %v385_v2, %v88_v9  ;;  %v161_v25 = vadd.f32 %v385_v2, %v90_v15  ;;  %v162_v26 = vadd.f32 %v385_v2, %v91_v16  ;;  %v163_v33 = vadd.f32 %v385_v2, %v92_v21  ;;  %v26_v34 = vld [vmem:[%s896_s0 + $0x60] sm:$0xff]  ;;  %v28_v36 = vld [vmem:[%s896_s0 + $0x70] sm:$0xff]  ;;  %v29_v41 = vld [vmem:[%s896_s0 + $0x78] sm:$0xff] }
   0x7   :  { %v220_v23 = vmax.f32 %v156_v13, 0.0  ;;  %v160_v24 = vadd.f32 %v385_v2, %v89_v14  ;;  %v221_v30 = vmax.f32 %v157_v18, 0.0  ;;  %v222_v31 = vmax.f32 %v158_v19, 0.0  ;;  %v30_v54 = vld [vmem:[%s896_s0 + $0x80] sm:$0xff]  ;;  %v31_v59 = vld [vmem:[%s896_s0 + $0x88] sm:$0xff]  ;;  %v32_v60 = vld [vmem:[%s896_s0 + $0x90] sm:$0xff] }
   0x8   :  { %v223_v32 = vmax.f32 %v159_v20, 0.0  ;;  %v225_v38 = vmax.f32 %v161_v25, 0.0  ;;  %v226_v39 = vmax.f32 %v162_v26, 0.0  ;;  %v93_v40 = vmul.f32 %v380_v1, %v22_v22  ;;  %v33_v61 = vld [vmem:[%s896_s0 + $0x98] sm:$0xff]  ;;  %v34_v4 = vld [vmem:[%s896_s0 + $0xa0] sm:$0xff]  ;;  %v35_v5 = vld [vmem:[%s896_s0 + $0xa8] sm:$0xff] }
   0x9   :  { %284 = vst [vmem:[%s899_s3] sm:$0xff] %v220_v23  ;;  %v224_v37 = vmax.f32 %v160_v24, 0.0  ;;  %285 = vst [vmem:[%s899_s3 + $0x8] sm:$0xff] %v221_v30  ;;  %v227_v42 = vmax.f32 %v163_v33, 0.0  ;;  %v94_v43 = vmul.f32 %v380_v1, %v23_v27  ;;  %v95_v44 = vmul.f32 %v380_v1, %v24_v28  ;;  %v36_v6 = vld [vmem:[%s896_s0 + $0xb0] sm:$0xff]  ;;  %v37_v11 = vld [vmem:[%s896_s0 + $0xb8] sm:$0xff] }
   0xa   :  { %286 = vst [vmem:[%s899_s3 + $0x10] sm:$0xff] %v222_v31  ;;  %287 = vst [vmem:[%s899_s3 + $0x18] sm:$0xff] %v223_v32  ;;  %v96_v45 = vmul.f32 %v380_v1, %v25_v29  ;;  %v164_v46 = vadd.f32 %v385_v2, %v93_v40  ;;  %v97_v47 = vmul.f32 %v380_v1, %v26_v34  ;;  %v38_v24 = vld [vmem:[%s896_s0 + $0xc0] sm:$0xff]  ;;  %v39_v29 = vld [vmem:[%s896_s0 + $0xc8] sm:$0xff] }
   0xb   :  { %288 = vst [vmem:[%s899_s3 + $0x20] sm:$0xff] %v224_v37  ;;  %289 = vst [vmem:[%s899_s3 + $0x28] sm:$0xff] %v225_v38  ;;  %v98_v48 = vmul.f32 %v380_v1, %v27_v35  ;;  %v99_v49 = vmul.f32 %v380_v1, %v28_v36  ;;  %v165_v50 = vadd.f32 %v385_v2, %v94_v43  ;;  %v40_v30 = vld [vmem:[%s896_s0 + $0xd0] sm:$0xff]  ;;  %v41_v31 = vld [vmem:[%s896_s0 + $0xd8] sm:$0xff] }
   0xc   :  { %290 = vst [vmem:[%s899_s3 + $0x30] sm:$0xff] %v226_v39  ;;  %291 = vst [vmem:[%s899_s3 + $0x38] sm:$0xff] %v227_v42  ;;  %v166_v51 = vadd.f32 %v385_v2, %v95_v44  ;;  %v167_v52 = vadd.f32 %v385_v2, %v96_v45  ;;  %v100_v53 = vmul.f32 %v380_v1, %v29_v41  ;;  %v228_v55 = vmax.f32 %v164_v46, 0.0  ;;  %v42_v36 = vld [vmem:[%s896_s0 + $0xe0] sm:$0xff]  ;;  %v43_v37 = vld [vmem:[%s896_s0 + $0xe8] sm:$0xff] }
   0xd   :  { %v168_v56 = vadd.f32 %v385_v2, %v97_v47  ;;  %v169_v57 = vadd.f32 %v385_v2, %v98_v48  ;;  %v170_v58 = vadd.f32 %v385_v2, %v99_v49  ;;  %v229_v62 = vmax.f32 %v165_v50, 0.0  ;;  %v44_v38 = vld [vmem:[%s896_s0 + $0xf0] sm:$0xff]  ;;  %v45_v43 = vld [vmem:[%s896_s0 + $0xf8] sm:$0xff] }
   0xe   :  { %v230_v63 = vmax.f32 %v166_v51, 0.0  ;;  %v231_v0 = vmax.f32 %v167_v52, 0.0  ;;  %v171_v3 = vadd.f32 %v385_v2, %v100_v53  ;;  %292 = vst [vmem:[%s899_s3 + $0x40] sm:$0xff] %v228_v55  ;;  %v101_v10 = vmul.f32 %v380_v1, %v30_v54 }
   0xf   :  { %v232_v7 = vmax.f32 %v168_v56, 0.0  ;;  %v233_v8 = vmax.f32 %v169_v57, 0.0  ;;  %v234_v9 = vmax.f32 %v170_v58, 0.0  ;;  %293 = vst [vmem:[%s899_s3 + $0x48] sm:$0xff] %v229_v62  ;;  %v102_v13 = vmul.f32 %v380_v1, %v31_v59  ;;  %v46_v56 = vld [vmem:[%s896_s0 + $0x100] sm:$0xff]  ;;  %v48_v62 = vld [vmem:[%s896_s0 + $0x110] sm:$0xff] }
  0x10   :  { %294 = vst [vmem:[%s899_s3 + $0x50] sm:$0xff] %v230_v63  ;;  %295 = vst [vmem:[%s899_s3 + $0x58] sm:$0xff] %v231_v0  ;;  %v235_v12 = vmax.f32 %v171_v3, 0.0  ;;  %v103_v14 = vmul.f32 %v380_v1, %v32_v60  ;;  %v104_v15 = vmul.f32 %v380_v1, %v33_v61  ;;  %v172_v16 = vadd.f32 %v385_v2, %v101_v10  ;;  %v47_v61 = vld [vmem:[%s896_s0 + $0x108] sm:$0xff]  ;;  %v49_v63 = vld [vmem:[%s896_s0 + $0x118] sm:$0xff] }
  0x11   :  { %296 = vst [vmem:[%s899_s3 + $0x60] sm:$0xff] %v232_v7  ;;  %297 = vst [vmem:[%s899_s3 + $0x68] sm:$0xff] %v233_v8  ;;  %v105_v17 = vmul.f32 %v380_v1, %v34_v4  ;;  %v106_v18 = vmul.f32 %v380_v1, %v35_v5  ;;  %v107_v19 = vmul.f32 %v380_v1, %v36_v6  ;;  %v50_v6 = vld [vmem:[%s896_s0 + $0x120] sm:$0xff]  ;;  %v51_v7 = vld [vmem:[%s896_s0 + $0x128] sm:$0xff] }
  0x12   :  { %298 = vst [vmem:[%s899_s3 + $0x70] sm:$0xff] %v234_v9  ;;  %299 = vst [vmem:[%s899_s3 + $0x78] sm:$0xff] %v235_v12  ;;  %v173_v20 = vadd.f32 %v385_v2, %v102_v13  ;;  %v174_v21 = vadd.f32 %v385_v2, %v103_v14  ;;  %v175_v22 = vadd.f32 %v385_v2, %v104_v15  ;;  %v236_v25 = vmax.f32 %v172_v16, 0.0  ;;  %v52_v8 = vld [vmem:[%s896_s0 + $0x130] sm:$0xff]  ;;  %v53_v13 = vld [vmem:[%s896_s0 + $0x138] sm:$0xff] }
  0x13   :  { %v108_v23 = vmul.f32 %v380_v1, %v37_v11  ;;  %v176_v26 = vadd.f32 %v385_v2, %v105_v17  ;;  %v177_v27 = vadd.f32 %v385_v2, %v106_v18  ;;  %v178_v28 = vadd.f32 %v385_v2, %v107_v19 }
  0x14   :  { %v237_v32 = vmax.f32 %v173_v20, 0.0  ;;  %v238_v33 = vmax.f32 %v174_v21, 0.0  ;;  %v239_v34 = vmax.f32 %v175_v22, 0.0  ;;  %300 = vst [vmem:[%s899_s3 + $0x80] sm:$0xff] %v236_v25  ;;  %v109_v42 = vmul.f32 %v380_v1, %v38_v24 }
  0x15   :  { %v179_v35 = vadd.f32 %v385_v2, %v108_v23  ;;  %v240_v39 = vmax.f32 %v176_v26, 0.0  ;;  %v241_v40 = vmax.f32 %v177_v27, 0.0  ;;  %v242_v41 = vmax.f32 %v178_v28, 0.0  ;;  %v54_v26 = vld [vmem:[%s896_s0 + $0x140] sm:$0xff] }
  0x16   :  { %301 = vst [vmem:[%s899_s3 + $0x88] sm:$0xff] %v237_v32  ;;  %302 = vst [vmem:[%s899_s3 + $0x90] sm:$0xff] %v238_v33  ;;  %v110_v45 = vmul.f32 %v380_v1, %v39_v29  ;;  %v111_v46 = vmul.f32 %v380_v1, %v40_v30  ;;  %v112_v47 = vmul.f32 %v380_v1, %v41_v31  ;;  %v55_v31 = vld [vmem:[%s896_s0 + $0x148] sm:$0xff]  ;;  %v56_v32 = vld [vmem:[%s896_s0 + $0x150] sm:$0xff] }
  0x17   :  { %303 = vst [vmem:[%s899_s3 + $0x98] sm:$0xff] %v239_v34  ;;  %v243_v44 = vmax.f32 %v179_v35, 0.0  ;;  %304 = vst [vmem:[%s899_s3 + $0xa0] sm:$0xff] %v240_v39  ;;  %v180_v48 = vadd.f32 %v385_v2, %v109_v42  ;;  %v113_v49 = vmul.f32 %v380_v1, %v42_v36  ;;  %v114_v50 = vmul.f32 %v380_v1, %v43_v37  ;;  %v57_v33 = vld [vmem:[%s896_s0 + $0x158] sm:$0xff]  ;;  %v59_v39 = vld [vmem:[%s896_s0 + $0x168] sm:$0xff] }
  0x18   :  { %305 = vst [vmem:[%s899_s3 + $0xa8] sm:$0xff] %v241_v40  ;;  %306 = vst [vmem:[%s899_s3 + $0xb0] sm:$0xff] %v242_v41  ;;  %v115_v51 = vmul.f32 %v380_v1, %v44_v38  ;;  %v181_v52 = vadd.f32 %v385_v2, %v110_v45  ;;  %v182_v53 = vadd.f32 %v385_v2, %v111_v46  ;;  %v58_v38 = vld [vmem:[%s896_s0 + $0x160] sm:$0xff]  ;;  %v60_v40 = vld [vmem:[%s896_s0 + $0x170] sm:$0xff] }
  0x19   :  { %307 = vst [vmem:[%s899_s3 + $0xb8] sm:$0xff] %v243_v44  ;;  %v183_v54 = vadd.f32 %v385_v2, %v112_v47  ;;  %v116_v55 = vmul.f32 %v380_v1, %v45_v43  ;;  %v244_v57 = vmax.f32 %v180_v48, 0.0  ;;  %v184_v58 = vadd.f32 %v385_v2, %v113_v49  ;;  %v61_v45 = vld [vmem:[%s896_s0 + $0x178] sm:$0xff] }
  0x1a   :  { %v185_v59 = vadd.f32 %v385_v2, %v114_v50  ;;  %v186_v60 = vadd.f32 %v385_v2, %v115_v51  ;;  %v245_v0 = vmax.f32 %v181_v52, 0.0  ;;  %v246_v3 = vmax.f32 %v182_v53, 0.0 }
  0x1b   :  { %v247_v4 = vmax.f32 %v183_v54, 0.0  ;;  %v187_v5 = vadd.f32 %v385_v2, %v116_v55  ;;  %308 = vst [vmem:[%s899_s3 + $0xc0] sm:$0xff] %v244_v57  ;;  %v248_v9 = vmax.f32 %v184_v58, 0.0  ;;  %v117_v12 = vmul.f32 %v380_v1, %v46_v56  ;;  %v62_v58 = vld [vmem:[%s896_s0 + $0x180] sm:$0xff] }
  0x1c   :  { %v249_v10 = vmax.f32 %v185_v59, 0.0  ;;  %v250_v11 = vmax.f32 %v186_v60, 0.0  ;;  %309 = vst [vmem:[%s899_s3 + $0xc8] sm:$0xff] %v245_v0  ;;  %310 = vst [vmem:[%s899_s3 + $0xd0] sm:$0xff] %v246_v3  ;;  %v118_v15 = vmul.f32 %v380_v1, %v47_v61  ;;  %v119_v16 = vmul.f32 %v380_v1, %v48_v62  ;;  %v64_v0 = vld [vmem:[%s896_s0 + $0x190] sm:$0xff]  ;;  %v65_v3 = vld [vmem:[%s896_s0 + $0x198] sm:$0xff] }
  0x1d   :  { %311 = vst [vmem:[%s899_s3 + $0xd8] sm:$0xff] %v247_v4  ;;  %v251_v14 = vmax.f32 %v187_v5, 0.0  ;;  %v120_v17 = vmul.f32 %v380_v1, %v49_v63  ;;  %312 = vst [vmem:[%s899_s3 + $0xe0] sm:$0xff] %v248_v9  ;;  %v188_v18 = vadd.f32 %v385_v2, %v117_v12  ;;  %v121_v19 = vmul.f32 %v380_v1, %v50_v6  ;;  %v63_v63 = vld [vmem:[%s896_s0 + $0x188] sm:$0xff] }
  0x1e   :  { %313 = vst [vmem:[%s899_s3 + $0xe8] sm:$0xff] %v249_v10  ;;  %314 = vst [vmem:[%s899_s3 + $0xf0] sm:$0xff] %v250_v11  ;;  %v122_v20 = vmul.f32 %v380_v1, %v51_v7  ;;  %v123_v21 = vmul.f32 %v380_v1, %v52_v8  ;;  %v189_v22 = vadd.f32 %v385_v2, %v118_v15  ;;  %v66_v8 = vld [vmem:[%s896_s0 + $0x1a0] sm:$0xff]  ;;  %v67_v9 = vld [vmem:[%s896_s0 + $0x1a8] sm:$0xff] }
  0x1f   :  { %315 = vst [vmem:[%s899_s3 + $0xf8] sm:$0xff] %v251_v14  ;;  %v190_v23 = vadd.f32 %v385_v2, %v119_v16  ;;  %v191_v24 = vadd.f32 %v385_v2, %v120_v17  ;;  %v124_v25 = vmul.f32 %v380_v1, %v53_v13  ;;  %v252_v27 = vmax.f32 %v188_v18, 0.0  ;;  %v68_v10 = vld [vmem:[%s896_s0 + $0x1b0] sm:$0xff]  ;;  %v69_v15 = vld [vmem:[%s896_s0 + $0x1b8] sm:$0xff] }
  0x20   :  { %v192_v28 = vadd.f32 %v385_v2, %v121_v19  ;;  %v193_v29 = vadd.f32 %v385_v2, %v122_v20  ;;  %v194_v30 = vadd.f32 %v385_v2, %v123_v21  ;;  %v253_v34 = vmax.f32 %v189_v22, 0.0 }
  0x21   :  { %v254_v35 = vmax.f32 %v190_v23, 0.0  ;;  %v255_v36 = vmax.f32 %v191_v24, 0.0  ;;  %v195_v37 = vadd.f32 %v385_v2, %v124_v25  ;;  %316 = vst [vmem:[%s899_s3 + $0x100] sm:$0xff] %v252_v27  ;;  %v125_v44 = vmul.f32 %v380_v1, %v54_v26 }
  0x22   :  { %v256_v41 = vmax.f32 %v192_v28, 0.0  ;;  %v257_v42 = vmax.f32 %v193_v29, 0.0  ;;  %v258_v43 = vmax.f32 %v194_v30, 0.0  ;;  %317 = vst [vmem:[%s899_s3 + $0x108] sm:$0xff] %v253_v34  ;;  %v126_v47 = vmul.f32 %v380_v1, %v55_v31  ;;  %v70_v28 = vld [vmem:[%s896_s0 + $0x1c0] sm:$0xff]  ;;  %v72_v34 = vld [vmem:[%s896_s0 + $0x1d0] sm:$0xff] }
  0x23   :  { %318 = vst [vmem:[%s899_s3 + $0x110] sm:$0xff] %v254_v35  ;;  %319 = vst [vmem:[%s899_s3 + $0x118] sm:$0xff] %v255_v36  ;;  %v259_v46 = vmax.f32 %v195_v37, 0.0  ;;  %v127_v48 = vmul.f32 %v380_v1, %v56_v32  ;;  %v128_v49 = vmul.f32 %v380_v1, %v57_v33  ;;  %v196_v50 = vadd.f32 %v385_v2, %v125_v44  ;;  %v71_v33 = vld [vmem:[%s896_s0 + $0x1c8] sm:$0xff]  ;;  %v73_v35 = vld [vmem:[%s896_s0 + $0x1d8] sm:$0xff] }
  0x24   :  { %320 = vst [vmem:[%s899_s3 + $0x120] sm:$0xff] %v256_v41  ;;  %321 = vst [vmem:[%s899_s3 + $0x128] sm:$0xff] %v257_v42  ;;  %v129_v51 = vmul.f32 %v380_v1, %v58_v38  ;;  %v130_v52 = vmul.f32 %v380_v1, %v59_v39  ;;  %v131_v53 = vmul.f32 %v380_v1, %v60_v40  ;;  %v74_v40 = vld [vmem:[%s896_s0 + $0x1e0] sm:$0xff]  ;;  %v75_v41 = vld [vmem:[%s896_s0 + $0x1e8] sm:$0xff] }
  0x25   :  { %322 = vst [vmem:[%s899_s3 + $0x130] sm:$0xff] %v258_v43  ;;  %323 = vst [vmem:[%s899_s3 + $0x138] sm:$0xff] %v259_v46  ;;  %v197_v54 = vadd.f32 %v385_v2, %v126_v47  ;;  %v198_v55 = vadd.f32 %v385_v2, %v127_v48  ;;  %v199_v56 = vadd.f32 %v385_v2, %v128_v49  ;;  %v260_v59 = vmax.f32 %v196_v50, 0.0  ;;  %v76_v42 = vld [vmem:[%s896_s0 + $0x1f0] sm:$0xff]  ;;  %v77_v47 = vld [vmem:[%s896_s0 + $0x1f8] sm:$0xff] }
  0x26   :  { %v132_v57 = vmul.f32 %v380_v1, %v61_v45  ;;  %v200_v60 = vadd.f32 %v385_v2, %v129_v51  ;;  %v201_v61 = vadd.f32 %v385_v2, %v130_v52  ;;  %v202_v62 = vadd.f32 %v385_v2, %v131_v53 }
  0x27   :  { %v261_v4 = vmax.f32 %v197_v54, 0.0  ;;  %v262_v5 = vmax.f32 %v198_v55, 0.0  ;;  %v263_v6 = vmax.f32 %v199_v56, 0.0  ;;  %324 = vst [vmem:[%s899_s3 + $0x140] sm:$0xff] %v260_v59  ;;  %v133_v14 = vmul.f32 %v380_v1, %v62_v58 }
  0x28   :  { %v203_v7 = vadd.f32 %v385_v2, %v132_v57  ;;  %v264_v11 = vmax.f32 %v200_v60, 0.0  ;;  %v265_v12 = vmax.f32 %v201_v61, 0.0  ;;  %v266_v13 = vmax.f32 %v202_v62, 0.0 }
  0x29   :  { %325 = vst [vmem:[%s899_s3 + $0x148] sm:$0xff] %v261_v4  ;;  %326 = vst [vmem:[%s899_s3 + $0x150] sm:$0xff] %v262_v5  ;;  %v134_v17 = vmul.f32 %v380_v1, %v63_v63  ;;  %v135_v18 = vmul.f32 %v380_v1, %v64_v0  ;;  %v136_v19 = vmul.f32 %v380_v1, %v65_v3 }
  0x2a   :  { %327 = vst [vmem:[%s899_s3 + $0x158] sm:$0xff] %v263_v6  ;;  %v267_v16 = vmax.f32 %v203_v7, 0.0  ;;  %328 = vst [vmem:[%s899_s3 + $0x160] sm:$0xff] %v264_v11  ;;  %v204_v20 = vadd.f32 %v385_v2, %v133_v14  ;;  %v137_v21 = vmul.f32 %v380_v1, %v66_v8  ;;  %v138_v22 = vmul.f32 %v380_v1, %v67_v9 }
  0x2b   :  { %329 = vst [vmem:[%s899_s3 + $0x168] sm:$0xff] %v265_v12  ;;  %330 = vst [vmem:[%s899_s3 + $0x170] sm:$0xff] %v266_v13  ;;  %v139_v23 = vmul.f32 %v380_v1, %v68_v10  ;;  %v205_v24 = vadd.f32 %v385_v2, %v134_v17  ;;  %v206_v25 = vadd.f32 %v385_v2, %v135_v18 }
  0x2c   :  { %331 = vst [vmem:[%s899_s3 + $0x178] sm:$0xff] %v267_v16  ;;  %v207_v26 = vadd.f32 %v385_v2, %v136_v19  ;;  %v140_v27 = vmul.f32 %v380_v1, %v69_v15  ;;  %v268_v29 = vmax.f32 %v204_v20, 0.0  ;;  %v208_v30 = vadd.f32 %v385_v2, %v137_v21 }
  0x2d   :  { %v209_v31 = vadd.f32 %v385_v2, %v138_v22  ;;  %v210_v32 = vadd.f32 %v385_v2, %v139_v23  ;;  %v269_v36 = vmax.f32 %v205_v24, 0.0  ;;  %v270_v37 = vmax.f32 %v206_v25, 0.0 }
  0x2e   :  { %v271_v38 = vmax.f32 %v207_v26, 0.0  ;;  %v211_v39 = vadd.f32 %v385_v2, %v140_v27  ;;  %332 = vst [vmem:[%s899_s3 + $0x180] sm:$0xff] %v268_v29  ;;  %v272_v43 = vmax.f32 %v208_v30, 0.0  ;;  %v141_v46 = vmul.f32 %v380_v1, %v70_v28 }
  0x2f   :  { %v273_v44 = vmax.f32 %v209_v31, 0.0  ;;  %v274_v45 = vmax.f32 %v210_v32, 0.0  ;;  %333 = vst [vmem:[%s899_s3 + $0x188] sm:$0xff] %v269_v36  ;;  %334 = vst [vmem:[%s899_s3 + $0x190] sm:$0xff] %v270_v37  ;;  %v142_v49 = vmul.f32 %v380_v1, %v71_v33  ;;  %v143_v50 = vmul.f32 %v380_v1, %v72_v34 }
  0x30   :  { %335 = vst [vmem:[%s899_s3 + $0x198] sm:$0xff] %v271_v38  ;;  %v275_v48 = vmax.f32 %v211_v39, 0.0  ;;  %v144_v51 = vmul.f32 %v380_v1, %v73_v35  ;;  %336 = vst [vmem:[%s899_s3 + $0x1a0] sm:$0xff] %v272_v43  ;;  %v212_v52 = vadd.f32 %v385_v2, %v141_v46  ;;  %v145_v53 = vmul.f32 %v380_v1, %v74_v40 }
  0x31   :  { %337 = vst [vmem:[%s899_s3 + $0x1a8] sm:$0xff] %v273_v44  ;;  %338 = vst [vmem:[%s899_s3 + $0x1b0] sm:$0xff] %v274_v45  ;;  %v146_v54 = vmul.f32 %v380_v1, %v75_v41  ;;  %v147_v55 = vmul.f32 %v380_v1, %v76_v42  ;;  %v213_v56 = vadd.f32 %v385_v2, %v142_v49 }
  0x32   :  { %339 = vst [vmem:[%s899_s3 + $0x1b8] sm:$0xff] %v275_v48  ;;  %v214_v57 = vadd.f32 %v385_v2, %v143_v50  ;;  %v215_v58 = vadd.f32 %v385_v2, %v144_v51  ;;  %v148_v59 = vmul.f32 %v380_v1, %v77_v47  ;;  %v276_v60 = vmax.f32 %v212_v52, 0.0 }
  0x33   :  { %v216_v61 = vadd.f32 %v385_v2, %v145_v53  ;;  %v217_v62 = vadd.f32 %v385_v2, %v146_v54  ;;  %v218_v63 = vadd.f32 %v385_v2, %v147_v55  ;;  %v277_v0 = vmax.f32 %v213_v56, 0.0 }
  0x34   :  { %v278_v3 = vmax.f32 %v214_v57, 0.0  ;;  %v279_v4 = vmax.f32 %v215_v58, 0.0  ;;  %v219_v5 = vadd.f32 %v385_v2, %v148_v59  ;;  %340 = vst [vmem:[%s899_s3 + $0x1c0] sm:$0xff] %v276_v60 }
  0x35   :  { %v280_v6 = vmax.f32 %v216_v61, 0.0  ;;  %v281_v7 = vmax.f32 %v217_v62, 0.0  ;;  %v282_v8 = vmax.f32 %v218_v63, 0.0  ;;  %341 = vst [vmem:[%s899_s3 + $0x1c8] sm:$0xff] %v277_v0 }
  0x36   :  { %342 = vst [vmem:[%s899_s3 + $0x1d0] sm:$0xff] %v278_v3  ;;  %343 = vst [vmem:[%s899_s3 + $0x1d8] sm:$0xff] %v279_v4  ;;  %v283_v1 = vmax.f32 %v219_v5, 0.0 }
  0x37   :  { %344 = vst [vmem:[%s899_s3 + $0x1e0] sm:$0xff] %v280_v6  ;;  %345 = vst [vmem:[%s899_s3 + $0x1e8] sm:$0xff] %v281_v7 }
  0x38   :  { %346 = vst [vmem:[%s899_s3 + $0x1f0] sm:$0xff] %v282_v8  ;;  %347 = vst [vmem:[%s899_s3 + $0x1f8] sm:$0xff] %v283_v1 }

// kernel: resnet_generator_forward.19
= control target key start
LH: loop header
LB: loop body
LE: loop exit
PB: predicated region body
PF: predicated region fallthrough
CT: control target
= control target key end

     0   :  { %v1648_v0 = vmov 0   ;;  %s2468_s1 = inlined_call_operand.vmem [shape: bf16[256,128], index: 1, kind: input, shape index: {}]   ;;  %s2469_s0 = inlined_call_operand.vmem [shape: bf16[512,256], index: 0, kind: input, shape index: {}]   ;;  %s2470_s2 = inlined_call_operand.vmem [shape: f32[512,128], index: 2, kind: output, shape index: {0}]   ;;  %s2471_s3 = inlined_call_operand.vmem [shape: f32[8,128], index: 3, kind: output, shape index: {1}]   ;;  %s2472_s4 = inlined_call_operand.vmem [shape: f32[8,128], index: 4, kind: output, shape index: {2}]  }
   0x1   :  { %659 = vmatprep.subr.bf16.mxu0 %v1648_v0  ;;  %v1536_v1 = vld [vmem:[%s2468_s1 + $0x38] sm:$0xff]   ;;  %1503 = vmatprep.subr.bf16.mxu1 %v1648_v0  ;;  %v1537_v2 = vld [vmem:[%s2468_s1 + $0x30] sm:$0xff]   ;;  %v1538_v3 = vld [vmem:[%s2468_s1 + $0x28] sm:$0xff]  }
   0x2   :  { %660 = vmatpush1.bf16.msra.mxu0 %v1536_v1  ;;  %1519 = vmatpush1.bf16.msra.mxu1 %v1536_v1  ;;  %v1539_v4 = vld [vmem:[%s2468_s1 + $0x20] sm:$0xff]   ;;  %v1540_v5 = vld [vmem:[%s2468_s1 + $0x18] sm:$0xff]   ;;  %v1541_v7 = vld [vmem:[%s2468_s1 + $0x10] sm:$0xff]  }
   0x3   :  { %661 = vmatprep.subr.bf16.mxu0 %v1648_v0  ;;  %1504 = vmatprep.subr.bf16.mxu1 %v1648_v0  ;;  %v1554_v6 = vld [vmem:[%s2469_s0 + $0x4] ss:$8 sps:$4 sm:$0xff]   ;;  %v1544_v11 = vld [vmem:[%s2468_s1 + $0x78] sm:$0xff]   ;;  %v1545_v12 = vld [vmem:[%s2468_s1 + $0x70] sm:$0xff]  }
   0x4   :  { %691 = vmatprep.mubr.bf16.mxu0 %v1554_v6  ;;  %v1542_v8 = vld [vmem:[%s2468_s1 + $0x8] sm:$0xff]   ;;  %v1543_v9 = vld [vmem:[%s2468_s1] sm:$0xff]   ;;  %v1548_v15 = vld [vmem:[%s2468_s1 + $0x58] sm:$0xff]  }
   0x5   :  { %v1578_v10 = vld [vmem:[%s2469_s0 + $0x104] ss:$8 sps:$4 sm:$0xff]   ;;  %v1549_v16 = vld [vmem:[%s2468_s1 + $0x50] sm:$0xff]   ;;  %v1552_v19 = vld [vmem:[%s2469_s0] ss:$8 sps:$4 sm:$0xff]  }
   0x6   :  { %662 = vmatpush1.bf16.msra.mxu0 %v1537_v2  ;;  %1520 = vmatpush1.bf16.msra.mxu1 %v1537_v2  ;;  %v1546_v13 = vld [vmem:[%s2468_s1 + $0x68] sm:$0xff]   ;;  %v1547_v14 = vld [vmem:[%s2468_s1 + $0x60] sm:$0xff]   ;;  %v1555_v21 = vld [vmem:[%s2469_s0 + $0x14] ss:$8 sps:$4 sm:$0xff]  }
   0x7   :  { %663 = vmatprep.subr.bf16.mxu0 %v1648_v0  ;;  %1505 = vmatprep.subr.bf16.mxu1 %v1648_v0  ;;  %v1550_v17 = vld [vmem:[%s2468_s1 + $0x48] sm:$0xff]   ;;  %v1551_v18 = vld [vmem:[%s2468_s1 + $0x40] sm:$0xff]   ;;  %v1582_v22 = vld [vmem:[%s2469_s0 + $0x114] ss:$8 sps:$4 sm:$0xff]  }
   0x8   :  { %819 = vmatprep.mubr.bf16.mxu1 %v1578_v10  ;;  %v1576_v20 = vld [vmem:[%s2469_s0 + $0x100] ss:$8 sps:$4 sm:$0xff]   ;;  %v1557_v23 = vld [vmem:[%s2469_s0 + $0x10] ss:$8 sps:$4 sm:$0xff]   ;;  %v1558_v25 = vld [vmem:[%s2469_s0 + $0x24] ss:$8 sps:$4 sm:$0xff]  }
   0x9   :  { %v1584_v24 = vld [vmem:[%s2469_s0 + $0x110] ss:$8 sps:$4 sm:$0xff]   ;;  %v1588_v26 = vld [vmem:[%s2469_s0 + $0x124] ss:$8 sps:$4 sm:$0xff]   ;;  %v1560_v27 = vld [vmem:[%s2469_s0 + $0x20] ss:$8 sps:$4 sm:$0xff]  }
   0xa   :  { %664 = vmatpush1.bf16.msra.mxu0 %v1538_v3  ;;  %1521 = vmatpush1.bf16.msra.mxu1 %v1538_v3  ;;  %v1590_v28 = vld [vmem:[%s2469_s0 + $0x120] ss:$8 sps:$4 sm:$0xff]   ;;  %v1561_v29 = vld [vmem:[%s2469_s0 + $0x34] ss:$8 sps:$4 sm:$0xff]   ;;  %v1563_v31 = vld [vmem:[%s2469_s0 + $0x30] ss:$8 sps:$4 sm:$0xff]  }
   0xb   :  { %665 = vmatprep.subr.bf16.mxu0 %v1648_v0  ;;  %1506 = vmatprep.subr.bf16.mxu1 %v1648_v0  ;;  %v1594_v30 = vld [vmem:[%s2469_s0 + $0x134] ss:$8 sps:$4 sm:$0xff]   ;;  %v1596_v32 = vld [vmem:[%s2469_s0 + $0x130] ss:$8 sps:$4 sm:$0xff]   ;;  %v1564_v33 = vld [vmem:[%s2469_s0 + $0x44] ss:$8 sps:$4 sm:$0xff]  }
   0xc   :  { %v1600_v34 = vld [vmem:[%s2469_s0 + $0x144] ss:$8 sps:$4 sm:$0xff]   ;;  %v1566_v35 = vld [vmem:[%s2469_s0 + $0x40] ss:$8 sps:$4 sm:$0xff]   ;;  %v1567_v37 = vld [vmem:[%s2469_s0 + $0x54] ss:$8 sps:$4 sm:$0xff]  }
   0xd   :  { %v1602_v36 = vld [vmem:[%s2469_s0 + $0x140] ss:$8 sps:$4 sm:$0xff]   ;;  %v1606_v38 = vld [vmem:[%s2469_s0 + $0x154] ss:$8 sps:$4 sm:$0xff]   ;;  %v1569_v39 = vld [vmem:[%s2469_s0 + $0x50] ss:$8 sps:$4 sm:$0xff]  }
   0xe   :  { %666 = vmatpush1.bf16.msra.mxu0 %v1539_v4  ;;  %1522 = vmatpush1.bf16.msra.mxu1 %v1539_v4  ;;  %v1608_v40 = vld [vmem:[%s2469_s0 + $0x150] ss:$8 sps:$4 sm:$0xff]   ;;  %v1570_v41 = vld [vmem:[%s2469_s0 + $0x64] ss:$8 sps:$4 sm:$0xff]   ;;  %v1572_v43 = vld [vmem:[%s2469_s0 + $0x60] ss:$8 sps:$4 sm:$0xff]  }
   0xf   :  { %667 = vmatprep.subr.bf16.mxu0 %v1648_v0  ;;  %1507 = vmatprep.subr.bf16.mxu1 %v1648_v0  ;;  %v1612_v42 = vld [vmem:[%s2469_s0 + $0x164] ss:$8 sps:$4 sm:$0xff]   ;;  %v1614_v44 = vld [vmem:[%s2469_s0 + $0x160] ss:$8 sps:$4 sm:$0xff]   ;;  %v1573_v45 = vld [vmem:[%s2469_s0 + $0x74] ss:$8 sps:$4 sm:$0xff]  }
  0x10   :  { %v1618_v46 = vld [vmem:[%s2469_s0 + $0x174] ss:$8 sps:$4 sm:$0xff]   ;;  %v1575_v47 = vld [vmem:[%s2469_s0 + $0x70] ss:$8 sps:$4 sm:$0xff]   ;;  %v1579_v49 = vld [vmem:[%s2469_s0 + $0x84] ss:$8 sps:$4 sm:$0xff]  }
  0x11   :  { %v1620_v48 = vld [vmem:[%s2469_s0 + $0x170] ss:$8 sps:$4 sm:$0xff]   ;;  %v1624_v50 = vld [vmem:[%s2469_s0 + $0x184] ss:$8 sps:$4 sm:$0xff]   ;;  %v1581_v51 = vld [vmem:[%s2469_s0 + $0x80] ss:$8 sps:$4 sm:$0xff]  }
  0x12   :  { %668 = vmatpush1.bf16.msra.mxu0 %v1540_v5  ;;  %1523 = vmatpush1.bf16.msra.mxu1 %v1540_v5  ;;  %v1626_v52 = vld [vmem:[%s2469_s0 + $0x180] ss:$8 sps:$4 sm:$0xff]   ;;  %v1585_v53 = vld [vmem:[%s2469_s0 + $0x94] ss:$8 sps:$4 sm:$0xff]   ;;  %v1587_v55 = vld [vmem:[%s2469_s0 + $0x90] ss:$8 sps:$4 sm:$0xff]  }
  0x13   :  { %669 = vmatprep.subr.bf16.mxu0 %v1648_v0  ;;  %1508 = vmatprep.subr.bf16.mxu1 %v1648_v0  ;;  %v1627_v54 = vld [vmem:[%s2469_s0 + $0x194] ss:$8 sps:$4 sm:$0xff]   ;;  %v1629_v56 = vld [vmem:[%s2469_s0 + $0x190] ss:$8 sps:$4 sm:$0xff]   ;;  %v1591_v57 = vld [vmem:[%s2469_s0 + $0xa4] ss:$8 sps:$4 sm:$0xff]  }
  0x14   :  { %v1630_v58 = vld [vmem:[%s2469_s0 + $0x1a4] ss:$8 sps:$4 sm:$0xff]   ;;  %v1593_v59 = vld [vmem:[%s2469_s0 + $0xa0] ss:$8 sps:$4 sm:$0xff]   ;;  %v1597_v61 = vld [vmem:[%s2469_s0 + $0xb4] ss:$8 sps:$4 sm:$0xff]  }
  0x15   :  { %v1632_v60 = vld [vmem:[%s2469_s0 + $0x1a0] ss:$8 sps:$4 sm:$0xff]   ;;  %v1633_v62 = vld [vmem:[%s2469_s0 + $0x1b4] ss:$8 sps:$4 sm:$0xff]   ;;  %v1599_v63 = vld [vmem:[%s2469_s0 + $0xb0] ss:$8 sps:$4 sm:$0xff]  }
  0x16   :  { %670 = vmatpush1.bf16.msra.mxu0 %v1541_v7  ;;  %1524 = vmatpush1.bf16.msra.mxu1 %v1541_v7  ;;  %v1603_v1 = vld [vmem:[%s2469_s0 + $0xc4] ss:$8 sps:$4 sm:$0xff]   ;;  %v1605_v3 = vld [vmem:[%s2469_s0 + $0xc0] ss:$8 sps:$4 sm:$0xff]   ;;  %v1609_v5 = vld [vmem:[%s2469_s0 + $0xd4] ss:$8 sps:$4 sm:$0xff]  }
  0x17   :  { %671 = vmatprep.subr.bf16.mxu0 %v1648_v0  ;;  %1509 = vmatprep.subr.bf16.mxu1 %v1648_v0  ;;  %v1636_v2 = vld [vmem:[%s2469_s0 + $0x1c4] ss:$8 sps:$4 sm:$0xff]   ;;  %v1638_v4 = vld [vmem:[%s2469_s0 + $0x1c0] ss:$8 sps:$4 sm:$0xff]   ;;  %v1639_v6 = vld [vmem:[%s2469_s0 + $0x1d4] ss:$8 sps:$4 sm:$0xff]  }
  0x18   :  { %v1611_v7 = vld [vmem:[%s2469_s0 + $0xd0] ss:$8 sps:$4 sm:$0xff]   ;;  %v1642_v10 = vld [vmem:[%s2469_s0 + $0x1e4] ss:$8 sps:$4 sm:$0xff]  }
  0x1a   :  { %672 = vmatpush1.bf16.msra.mxu0 %v1542_v8  ;;  %1525 = vmatpush1.bf16.msra.mxu1 %v1542_v8  ;;  %v1641_v8 = vld [vmem:[%s2469_s0 + $0x1d0] ss:$8 sps:$4 sm:$0xff]  }
  0x1b   :  { %673 = vmatprep.subr.bf16.mxu0 %v1648_v0  ;;  %1510 = vmatprep.subr.bf16.mxu1 %v1648_v0 }
  0x1e   :  { %674 = vmatpush1.bf16.msra.mxu0 %v1543_v9  ;;  %1526 = vmatpush1.bf16.msra.mxu1 %v1543_v9  ;;  %v1615_v9 = vld [vmem:[%s2469_s0 + $0xe4] ss:$8 sps:$4 sm:$0xff]  }
  0x1f   :  { %675 = vmatprep.subr.bf16.mxu0 %v1648_v0  ;;  %1511 = vmatprep.subr.bf16.mxu1 %v1648_v0 }
  0x22   :  { %676 = vmatpush2.bf16.msra.mxu0 %v1544_v11  ;;  %1527 = vmatpush2.bf16.msra.mxu1 %v1544_v11  ;;  %v1617_v11 = vld [vmem:[%s2469_s0 + $0xe0] ss:$8 sps:$4 sm:$0xff]  }
  0x23   :  { %677 = vmatprep.subr.bf16.mxu0 %v1648_v0  ;;  %1512 = vmatprep.subr.bf16.mxu1 %v1648_v0 }
  0x26   :  { %678 = vmatpush2.bf16.msra.mxu0 %v1545_v12  ;;  %1528 = vmatpush2.bf16.msra.mxu1 %v1545_v12  ;;  %v1644_v12 = vld [vmem:[%s2469_s0 + $0x1e0] ss:$8 sps:$4 sm:$0xff]  }
  0x27   :  { %679 = vmatprep.subr.bf16.mxu0 %v1648_v0  ;;  %1513 = vmatprep.subr.bf16.mxu1 %v1648_v0 }
  0x2a   :  { %680 = vmatpush2.bf16.msra.mxu0 %v1546_v13  ;;  %1529 = vmatpush2.bf16.msra.mxu1 %v1546_v13  ;;  %v1621_v13 = vld [vmem:[%s2469_s0 + $0xf4] ss:$8 sps:$4 sm:$0xff]  }
  0x2b   :  { %681 = vmatprep.subr.bf16.mxu0 %v1648_v0  ;;  %1514 = vmatprep.subr.bf16.mxu1 %v1648_v0 }
  0x2e   :  { %682 = vmatpush2.bf16.msra.mxu0 %v1547_v14  ;;  %1530 = vmatpush2.bf16.msra.mxu1 %v1547_v14  ;;  %v1645_v14 = vld [vmem:[%s2469_s0 + $0x1f4] ss:$8 sps:$4 sm:$0xff]  }
  0x2f   :  { %683 = vmatprep.subr.bf16.mxu0 %v1648_v0  ;;  %1515 = vmatprep.subr.bf16.mxu1 %v1648_v0 }
  0x32   :  { %684 = vmatpush2.bf16.msra.mxu0 %v1548_v15  ;;  %1531 = vmatpush2.bf16.msra.mxu1 %v1548_v15  ;;  %v1623_v15 = vld [vmem:[%s2469_s0 + $0xf0] ss:$8 sps:$4 sm:$0xff]  }
  0x33   :  { %685 = vmatprep.subr.bf16.mxu0 %v1648_v0  ;;  %1516 = vmatprep.subr.bf16.mxu1 %v1648_v0 }
  0x36   :  { %686 = vmatpush2.bf16.msra.mxu0 %v1549_v16  ;;  %1532 = vmatpush2.bf16.msra.mxu1 %v1549_v16  ;;  %v1647_v16 = vld [vmem:[%s2469_s0 + $0x1f0] ss:$8 sps:$4 sm:$0xff]  }
  0x37   :  { %687 = vmatprep.subr.bf16.mxu0 %v1648_v0  ;;  %1517 = vmatprep.subr.bf16.mxu1 %v1648_v0 }
  0x3a   :  { %688 = vmatpush2.bf16.msra.mxu0 %v1550_v17  ;;  %1533 = vmatpush2.bf16.msra.mxu1 %v1550_v17 }
  0x3b   :  { %689 = vmatprep.subr.bf16.mxu0 %v1648_v0  ;;  %1518 = vmatprep.subr.bf16.mxu1 %v1648_v0  ;;  %v1635_v0 = vld [vmem:[%s2469_s0 + $0x1b0] ss:$8 sps:$4 sm:$0xff]  }
  0x3e   :  { %690 = vmatpush2.bf16.msra.mxu0 %v1551_v18  ;;  %1534 = vmatpush2.bf16.msra.mxu1 %v1551_v18 }
  0x41   :  { %692 = vmatmul.mubr.bf16.vlgmr.msra.gmra.mxu0 %v1552_v19  ;;  %820 = vmatmul.mubr.bf16.vlgmr.msra.gmra.mxu1 %v1576_v20 }
  0x42   :  { %699 = vmatprep.mubr.bf16.mxu0 %v1555_v21  ;;  %827 = vmatprep.mubr.bf16.mxu1 %v1582_v22 }
  0x49   :  { %700 = vmatmul.mubr.bf16.gmra.mxu0 %v1557_v23  ;;  %828 = vmatmul.mubr.bf16.gmra.mxu1 %v1584_v24 }
  0x4a   :  { %707 = vmatprep.mubr.bf16.mxu0 %v1558_v25  ;;  %835 = vmatprep.mubr.bf16.mxu1 %v1588_v26 }
  0x51   :  { %708 = vmatmul.mubr.bf16.gmra.mxu0 %v1560_v27  ;;  %836 = vmatmul.mubr.bf16.gmra.mxu1 %v1590_v28 }
  0x52   :  { %715 = vmatprep.mubr.bf16.mxu0 %v1561_v29  ;;  %843 = vmatprep.mubr.bf16.mxu1 %v1594_v30 }
  0x59   :  { %716 = vmatmul.mubr.bf16.gmra.mxu0 %v1563_v31  ;;  %844 = vmatmul.mubr.bf16.gmra.mxu1 %v1596_v32 }
  0x5a   :  { %723 = vmatprep.mubr.bf16.mxu0 %v1564_v33  ;;  %851 = vmatprep.mubr.bf16.mxu1 %v1600_v34 }
  0x61   :  { %724 = vmatmul.mubr.bf16.gmra.mxu0 %v1566_v35  ;;  %852 = vmatmul.mubr.bf16.gmra.mxu1 %v1602_v36 }
  0x62   :  { %731 = vmatprep.mubr.bf16.mxu0 %v1567_v37  ;;  %859 = vmatprep.mubr.bf16.mxu1 %v1606_v38 }
  0x69   :  { %732 = vmatmul.mubr.bf16.gmra.mxu0 %v1569_v39  ;;  %860 = vmatmul.mubr.bf16.gmra.mxu1 %v1608_v40 }
  0x6a   :  { %739 = vmatprep.mubr.bf16.mxu0 %v1570_v41  ;;  %867 = vmatprep.mubr.bf16.mxu1 %v1612_v42 }
  0x71   :  { %740 = vmatmul.mubr.bf16.gmra.mxu0 %v1572_v43  ;;  %868 = vmatmul.mubr.bf16.gmra.mxu1 %v1614_v44 }
  0x72   :  { %747 = vmatprep.mubr.bf16.mxu0 %v1573_v45  ;;  %875 = vmatprep.mubr.bf16.mxu1 %v1618_v46 }
  0x79   :  { %748 = vmatmul.mubr.bf16.gmra.mxu0 %v1575_v47  ;;  %876 = vmatmul.mubr.bf16.gmra.mxu1 %v1620_v48 }
  0x7a   :  { %755 = vmatprep.mubr.bf16.mxu0 %v1579_v49  ;;  %883 = vmatprep.mubr.bf16.mxu1 %v1624_v50 }
  0x81   :  { %756 = vmatmul.mubr.bf16.gmra.mxu0 %v1581_v51  ;;  %884 = vmatmul.mubr.bf16.gmra.mxu1 %v1626_v52 }
  0x82   :  { %763 = vmatprep.mubr.bf16.mxu0 %v1585_v53  ;;  %891 = vmatprep.mubr.bf16.mxu1 %v1627_v54 }
  0x89   :  { %764 = vmatmul.mubr.bf16.gmra.mxu0 %v1587_v55  ;;  %892 = vmatmul.mubr.bf16.gmra.mxu1 %v1629_v56 }
  0x8a   :  { %771 = vmatprep.mubr.bf16.mxu0 %v1591_v57  ;;  %899 = vmatprep.mubr.bf16.mxu1 %v1630_v58 }
  0x91   :  { %772 = vmatmul.mubr.bf16.gmra.mxu0 %v1593_v59  ;;  %900 = vmatmul.mubr.bf16.gmra.mxu1 %v1632_v60 }
  0x92   :  { %779 = vmatprep.mubr.bf16.mxu0 %v1597_v61  ;;  %907 = vmatprep.mubr.bf16.mxu1 %v1633_v62 }
  0x99   :  { %780 = vmatmul.mubr.bf16.gmra.mxu0 %v1599_v63  ;;  %908 = vmatmul.mubr.bf16.gmra.mxu1 %v1635_v0 }
  0x9a   :  { %787 = vmatprep.mubr.bf16.mxu0 %v1603_v1  ;;  %915 = vmatprep.mubr.bf16.mxu1 %v1636_v2 }
  0xa1   :  { %788 = vmatmul.mubr.bf16.gmra.mxu0 %v1605_v3  ;;  %916 = vmatmul.mubr.bf16.gmra.mxu1 %v1638_v4 }
  0xa2   :  { %795 = vmatprep.mubr.bf16.mxu0 %v1609_v5  ;;  %923 = vmatprep.mubr.bf16.mxu1 %v1639_v6 }
  0xa9   :  { %796 = vmatmul.mubr.bf16.gmra.mxu0 %v1611_v7  ;;  %924 = vmatmul.mubr.bf16.gmra.mxu1 %v1641_v8 }
  0xaa   :  { %803 = vmatprep.mubr.bf16.mxu0 %v1615_v9  ;;  %931 = vmatprep.mubr.bf16.mxu1 %v1642_v10 }
  0xb1   :  { %804 = vmatmul.mubr.bf16.gmra.mxu0 %v1617_v11  ;;  %932 = vmatmul.mubr.bf16.gmra.mxu1 %v1644_v12 }
  0xb2   :  { %811 = vmatprep.mubr.bf16.mxu0 %v1621_v13  ;;  %939 = vmatprep.mubr.bf16.mxu1 %v1645_v14 }
  0xb9   :  { %812 = vmatmul.mubr.bf16.gmra.mxu0 %v1623_v15  ;;  %940 = vmatmul.mubr.bf16.gmra.mxu1 %v1647_v16 }
 0x101   :  { %v1946_v17 = vpop.f32.mrf.mxu0  ;;  %v1948_v18 = vpop.f32.mrf.mxu1 }
 0x102   :  { %1143 = vst [vmem:[%s2470_s2] sm:$0xff] %v1946_v17  ;;  %1175 = vst [vmem:[%s2470_s2 + $0x100] sm:$0xff] %v1948_v18 }
 0x103   :  { %v695_v19 = vpop.f32.mrf.mxu0  ;;  %v823_v20 = vpop.f32.mrf.mxu1 }
 0x105   :  { %v1958_v21 = vpop.f32.mrf.mxu0  ;;  %v1960_v22 = vpop.f32.mrf.mxu1 }
 0x106   :  { %1144 = vst [vmem:[%s2470_s2 + $0x8] sm:$0xff] %v1958_v21  ;;  %1176 = vst [vmem:[%s2470_s2 + $0x108] sm:$0xff] %v1960_v22  ;;  %v1277_v19 = vmul.f32 %v1958_v21, %v1958_v21 }
 0x107   :  { %v698_v23 = vpop.f32.mrf.mxu0  ;;  %v826_v24 = vpop.f32.mrf.mxu1 }
 0x108   :  { %v1276_v24 = vmul.f32 %v1946_v17, %v1946_v17 }
 0x109   :  { %v1970_v25 = vpop.f32.mrf.mxu0  ;;  %v1972_v26 = vpop.f32.mrf.mxu1 }
 0x10a   :  { %1145 = vst [vmem:[%s2470_s2 + $0x10] sm:$0xff] %v1970_v25  ;;  %1177 = vst [vmem:[%s2470_s2 + $0x110] sm:$0xff] %v1972_v26 }
 0x10b   :  { %v703_v27 = vpop.f32.mrf.mxu0  ;;  %v831_v28 = vpop.f32.mrf.mxu1 }
 0x10c   :  { %v1207_v27 = vadd.f32 %v1958_v21, %v1946_v17  ;;  %v1278_v28 = vmul.f32 %v1970_v25, %v1970_v25 }
 0x10d   :  { %v1982_v29 = vpop.f32.mrf.mxu0  ;;  %v1984_v30 = vpop.f32.mrf.mxu1 }
 0x10e   :  { %1146 = vst [vmem:[%s2470_s2 + $0x18] sm:$0xff] %v1982_v29  ;;  %1178 = vst [vmem:[%s2470_s2 + $0x118] sm:$0xff] %v1984_v30  ;;  %v1279_v17 = vmul.f32 %v1982_v29, %v1982_v29 }
 0x10f   :  { %v706_v31 = vpop.f32.mrf.mxu0  ;;  %v834_v32 = vpop.f32.mrf.mxu1 }
 0x111   :  { %v1994_v33 = vpop.f32.mrf.mxu0  ;;  %v1996_v34 = vpop.f32.mrf.mxu1 }
 0x112   :  { %1147 = vst [vmem:[%s2470_s2 + $0x20] sm:$0xff] %v1994_v33  ;;  %1179 = vst [vmem:[%s2470_s2 + $0x120] sm:$0xff] %v1996_v34 }
 0x113   :  { %v711_v35 = vpop.f32.mrf.mxu0  ;;  %v839_v36 = vpop.f32.mrf.mxu1 }
 0x114   :  { %v1340_v35 = vadd.f32 %v1277_v19, %v1276_v24  ;;  %v1208_v36 = vadd.f32 %v1207_v27, %v1970_v25 }
 0x115   :  { %v2006_v37 = vpop.f32.mrf.mxu0  ;;  %v2008_v38 = vpop.f32.mrf.mxu1 }
 0x116   :  { %1148 = vst [vmem:[%s2470_s2 + $0x28] sm:$0xff] %v2006_v37  ;;  %1180 = vst [vmem:[%s2470_s2 + $0x128] sm:$0xff] %v2008_v38 }
 0x117   :  { %v714_v39 = vpop.f32.mrf.mxu0  ;;  %v842_v40 = vpop.f32.mrf.mxu1 }
 0x118   :  { %v1341_v40 = vadd.f32 %v1340_v35, %v1278_v28 }
 0x119   :  { %v2018_v41 = vpop.f32.mrf.mxu0  ;;  %v2020_v42 = vpop.f32.mrf.mxu1 }
 0x11a   :  { %1149 = vst [vmem:[%s2470_s2 + $0x30] sm:$0xff] %v2018_v41  ;;  %1181 = vst [vmem:[%s2470_s2 + $0x130] sm:$0xff] %v2020_v42 }
 0x11b   :  { %v719_v43 = vpop.f32.mrf.mxu0  ;;  %v847_v44 = vpop.f32.mrf.mxu1 }
 0x11c   :  { %v1209_v43 = vadd.f32 %v1208_v36, %v1982_v29  ;;  %v1280_v44 = vmul.f32 %v1994_v33, %v1994_v33  ;;  %v1281_v29 = vmul.f32 %v2006_v37, %v2006_v37 }
 0x11d   :  { %v2030_v45 = vpop.f32.mrf.mxu0  ;;  %v2032_v46 = vpop.f32.mrf.mxu1 }
 0x11e   :  { %1150 = vst [vmem:[%s2470_s2 + $0x38] sm:$0xff] %v2030_v45  ;;  %1182 = vst [vmem:[%s2470_s2 + $0x138] sm:$0xff] %v2032_v46 }
 0x11f   :  { %v722_v47 = vpop.f32.mrf.mxu0  ;;  %v850_v48 = vpop.f32.mrf.mxu1 }
 0x120   :  { %v1342_v48 = vadd.f32 %v1341_v40, %v1279_v17 }
 0x121   :  { %v2042_v49 = vpop.f32.mrf.mxu0  ;;  %v2044_v50 = vpop.f32.mrf.mxu1 }
 0x122   :  { %1151 = vst [vmem:[%s2470_s2 + $0x40] sm:$0xff] %v2042_v49  ;;  %1183 = vst [vmem:[%s2470_s2 + $0x140] sm:$0xff] %v2044_v50 }
 0x123   :  { %v727_v51 = vpop.f32.mrf.mxu0  ;;  %v855_v52 = vpop.f32.mrf.mxu1 }
 0x124   :  { %v1210_v51 = vadd.f32 %v1209_v43, %v1994_v33 }
 0x125   :  { %v2054_v53 = vpop.f32.mrf.mxu0  ;;  %v2056_v54 = vpop.f32.mrf.mxu1 }
 0x126   :  { %1152 = vst [vmem:[%s2470_s2 + $0x48] sm:$0xff] %v2054_v53  ;;  %1184 = vst [vmem:[%s2470_s2 + $0x148] sm:$0xff] %v2056_v54 }
 0x127   :  { %v730_v55 = vpop.f32.mrf.mxu0  ;;  %v858_v56 = vpop.f32.mrf.mxu1 }
 0x128   :  { %v1343_v56 = vadd.f32 %v1342_v48, %v1280_v44 }
 0x129   :  { %v2066_v57 = vpop.f32.mrf.mxu0  ;;  %v2068_v58 = vpop.f32.mrf.mxu1 }
 0x12a   :  { %1153 = vst [vmem:[%s2470_s2 + $0x50] sm:$0xff] %v2066_v57  ;;  %1185 = vst [vmem:[%s2470_s2 + $0x150] sm:$0xff] %v2068_v58 }
 0x12b   :  { %v735_v59 = vpop.f32.mrf.mxu0  ;;  %v863_v60 = vpop.f32.mrf.mxu1 }
 0x12c   :  { %v1211_v59 = vadd.f32 %v1210_v51, %v2006_v37  ;;  %v1282_v60 = vmul.f32 %v2018_v41, %v2018_v41  ;;  %v1283_v37 = vmul.f32 %v2030_v45, %v2030_v45 }
 0x12d   :  { %v2078_v61 = vpop.f32.mrf.mxu0  ;;  %v2080_v62 = vpop.f32.mrf.mxu1 }
 0x12e   :  { %1154 = vst [vmem:[%s2470_s2 + $0x58] sm:$0xff] %v2078_v61  ;;  %1186 = vst [vmem:[%s2470_s2 + $0x158] sm:$0xff] %v2080_v62 }
 0x12f   :  { %v738_v63 = vpop.f32.mrf.mxu0  ;;  %v866_v0 = vpop.f32.mrf.mxu1 }
 0x130   :  { %v1344_v0 = vadd.f32 %v1343_v56, %v1281_v29 }
 0x131   :  { %v2090_v1 = vpop.f32.mrf.mxu0  ;;  %v2092_v2 = vpop.f32.mrf.mxu1 }
 0x132   :  { %1155 = vst [vmem:[%s2470_s2 + $0x60] sm:$0xff] %v2090_v1  ;;  %1187 = vst [vmem:[%s2470_s2 + $0x160] sm:$0xff] %v2092_v2 }
 0x133   :  { %v743_v3 = vpop.f32.mrf.mxu0  ;;  %v871_v4 = vpop.f32.mrf.mxu1 }
 0x134   :  { %v1212_v3 = vadd.f32 %v1211_v59, %v2018_v41 }
 0x135   :  { %v2102_v5 = vpop.f32.mrf.mxu0  ;;  %v2104_v6 = vpop.f32.mrf.mxu1 }
 0x136   :  { %1156 = vst [vmem:[%s2470_s2 + $0x68] sm:$0xff] %v2102_v5  ;;  %1188 = vst [vmem:[%s2470_s2 + $0x168] sm:$0xff] %v2104_v6 }
 0x137   :  { %v746_v7 = vpop.f32.mrf.mxu0  ;;  %v874_v8 = vpop.f32.mrf.mxu1 }
 0x138   :  { %v1345_v8 = vadd.f32 %v1344_v0, %v1282_v60 }
 0x139   :  { %v2114_v9 = vpop.f32.mrf.mxu0  ;;  %v2116_v10 = vpop.f32.mrf.mxu1 }
 0x13a   :  { %1157 = vst [vmem:[%s2470_s2 + $0x70] sm:$0xff] %v2114_v9  ;;  %1189 = vst [vmem:[%s2470_s2 + $0x170] sm:$0xff] %v2116_v10 }
 0x13b   :  { %v751_v11 = vpop.f32.mrf.mxu0  ;;  %v879_v12 = vpop.f32.mrf.mxu1 }
 0x13c   :  { %v1213_v11 = vadd.f32 %v1212_v3, %v2030_v45  ;;  %v1284_v12 = vmul.f32 %v2042_v49, %v2042_v49  ;;  %v1285_v45 = vmul.f32 %v2054_v53, %v2054_v53 }
 0x13d   :  { %v2126_v13 = vpop.f32.mrf.mxu0  ;;  %v2128_v14 = vpop.f32.mrf.mxu1 }
 0x13e   :  { %1158 = vst [vmem:[%s2470_s2 + $0x78] sm:$0xff] %v2126_v13  ;;  %1190 = vst [vmem:[%s2470_s2 + $0x178] sm:$0xff] %v2128_v14  ;;  %v1214_v19 = vadd.f32 %v1213_v11, %v2042_v49 }
 0x13f   :  { %v754_v15 = vpop.f32.mrf.mxu0  ;;  %v882_v16 = vpop.f32.mrf.mxu1 }
 0x140   :  { %v1346_v16 = vadd.f32 %v1345_v8, %v1283_v37 }
 0x141   :  { %v2140_v20 = vpop.f32.mrf.mxu0  ;;  %v2142_v23 = vpop.f32.mrf.mxu1 }
 0x142   :  { %1159 = vst [vmem:[%s2470_s2 + $0x80] sm:$0xff] %v2140_v20  ;;  %1191 = vst [vmem:[%s2470_s2 + $0x180] sm:$0xff] %v2142_v23  ;;  %v1347_v28 = vadd.f32 %v1346_v16, %v1284_v12 }
 0x143   :  { %v759_v31 = vpop.f32.mrf.mxu0  ;;  %v887_v32 = vpop.f32.mrf.mxu1 }
 0x144   :  { %v1215_v31 = vadd.f32 %v1214_v19, %v2054_v53  ;;  %v1286_v32 = vmul.f32 %v2066_v57, %v2066_v57  ;;  %v1348_v36 = vadd.f32 %v1347_v28, %v1285_v45  ;;  %v1287_v53 = vmul.f32 %v2078_v61, %v2078_v61 }
 0x145   :  { %v2161_v21 = vpop.f32.mrf.mxu0  ;;  %v2163_v39 = vpop.f32.mrf.mxu1 }
 0x146   :  { %1160 = vst [vmem:[%s2470_s2 + $0x88] sm:$0xff] %v2161_v21  ;;  %1192 = vst [vmem:[%s2470_s2 + $0x188] sm:$0xff] %v2163_v39  ;;  %v1216_v17 = vadd.f32 %v1215_v31, %v2066_v57  ;;  %v1349_v44 = vadd.f32 %v1348_v36, %v1286_v32 }
 0x147   :  { %v762_v25 = vpop.f32.mrf.mxu0  ;;  %v890_v47 = vpop.f32.mrf.mxu1 }
 0x148   :  { %v1217_v25 = vadd.f32 %v1216_v17, %v2078_v61  ;;  %v1288_v47 = vmul.f32 %v2090_v1, %v2090_v1  ;;  %v1350_v51 = vadd.f32 %v1349_v44, %v1287_v53  ;;  %v1289_v61 = vmul.f32 %v2102_v5, %v2102_v5 }
 0x149   :  { %v2179_v52 = vpop.f32.mrf.mxu0  ;;  %v2181_v55 = vpop.f32.mrf.mxu1 }
 0x14a   :  { %1161 = vst [vmem:[%s2470_s2 + $0x90] sm:$0xff] %v2179_v52  ;;  %1193 = vst [vmem:[%s2470_s2 + $0x190] sm:$0xff] %v2181_v55  ;;  %v1218_v29 = vadd.f32 %v1217_v25, %v2090_v1  ;;  %v1351_v60 = vadd.f32 %v1350_v51, %v1288_v47 }
 0x14b   :  { %v767_v33 = vpop.f32.mrf.mxu0  ;;  %v895_v63 = vpop.f32.mrf.mxu1 }
 0x14c   :  { %v1219_v33 = vadd.f32 %v1218_v29, %v2102_v5  ;;  %v1290_v63 = vmul.f32 %v2114_v9, %v2114_v9  ;;  %v1352_v3 = vadd.f32 %v1351_v60, %v1289_v61  ;;  %v1291_v5 = vmul.f32 %v2126_v13, %v2126_v13 }
 0x14d   :  { %v2197_v4 = vpop.f32.mrf.mxu0  ;;  %v2199_v7 = vpop.f32.mrf.mxu1 }
 0x14e   :  { %1162 = vst [vmem:[%s2470_s2 + $0x98] sm:$0xff] %v2197_v4  ;;  %1194 = vst [vmem:[%s2470_s2 + $0x198] sm:$0xff] %v2199_v7  ;;  %v1220_v37 = vadd.f32 %v1219_v33, %v2114_v9  ;;  %v1353_v12 = vadd.f32 %v1352_v3, %v1290_v63 }
 0x14f   :  { %v770_v41 = vpop.f32.mrf.mxu0  ;;  %v898_v15 = vpop.f32.mrf.mxu1 }
 0x150   :  { %v1221_v41 = vadd.f32 %v1220_v37, %v2126_v13  ;;  %v1292_v15 = vmul.f32 %v2140_v20, %v2140_v20  ;;  %v1354_v19 = vadd.f32 %v1353_v12, %v1291_v5  ;;  %v1293_v13 = vmul.f32 %v2161_v21, %v2161_v21 }
 0x151   :  { %v2215_v24 = vpop.f32.mrf.mxu0  ;;  %v2217_v27 = vpop.f32.mrf.mxu1 }
 0x152   :  { %1163 = vst [vmem:[%s2470_s2 + $0xa0] sm:$0xff] %v2215_v24  ;;  %1195 = vst [vmem:[%s2470_s2 + $0x1a0] sm:$0xff] %v2217_v27  ;;  %v1222_v45 = vadd.f32 %v1221_v41, %v2140_v20  ;;  %v1355_v32 = vadd.f32 %v1354_v19, %v1292_v15 }
 0x153   :  { %v775_v49 = vpop.f32.mrf.mxu0  ;;  %v903_v35 = vpop.f32.mrf.mxu1 }
 0x154   :  { %v1223_v49 = vadd.f32 %v1222_v45, %v2161_v21  ;;  %v1294_v35 = vmul.f32 %v2179_v52, %v2179_v52  ;;  %v1356_v17 = vadd.f32 %v1355_v32, %v1293_v13  ;;  %v1295_v21 = vmul.f32 %v2197_v4, %v2197_v4 }
 0x155   :  { %v2233_v40 = vpop.f32.mrf.mxu0  ;;  %v2235_v43 = vpop.f32.mrf.mxu1 }
 0x156   :  { %1164 = vst [vmem:[%s2470_s2 + $0xa8] sm:$0xff] %v2233_v40  ;;  %1196 = vst [vmem:[%s2470_s2 + $0x1a8] sm:$0xff] %v2235_v43  ;;  %v1224_v53 = vadd.f32 %v1223_v49, %v2179_v52  ;;  %v1357_v47 = vadd.f32 %v1356_v17, %v1294_v35 }
 0x157   :  { %v778_v57 = vpop.f32.mrf.mxu0  ;;  %v906_v48 = vpop.f32.mrf.mxu1 }
 0x158   :  { %v1225_v57 = vadd.f32 %v1224_v53, %v2197_v4  ;;  %v1296_v48 = vmul.f32 %v2215_v24, %v2215_v24  ;;  %v1358_v29 = vadd.f32 %v1357_v47, %v1295_v21  ;;  %v1297_v4 = vmul.f32 %v2233_v40, %v2233_v40 }
 0x159   :  { %v781_v56 = vpop.f32.mrf.mxu0  ;;  %v2251_v59 = vpop.f32.mrf.mxu1 }
 0x15a   :  { %1165 = vst [vmem:[%s2470_s2 + $0xb0] sm:$0xff] %v781_v56  ;;  %1197 = vst [vmem:[%s2470_s2 + $0x1b0] sm:$0xff] %v2251_v59  ;;  %v1226_v61 = vadd.f32 %v1225_v57, %v2215_v24  ;;  %v1359_v63 = vadd.f32 %v1358_v29, %v1296_v48 }
 0x15b   :  { %v783_v1 = vpop.f32.mrf.mxu0  ;;  %v911_v0 = vpop.f32.mrf.mxu1 }
 0x15c   :  { %v1227_v1 = vadd.f32 %v1226_v61, %v2233_v40  ;;  %v1298_v0 = vmul.f32 %v781_v56, %v781_v56  ;;  %v1360_v37 = vadd.f32 %v1359_v63, %v1297_v4 }
 0x15d   :  { %v784_v8 = vpop.f32.mrf.mxu0  ;;  %v2266_v11 = vpop.f32.mrf.mxu1 }
 0x15e   :  { %1166 = vst [vmem:[%s2470_s2 + $0xb8] sm:$0xff] %v784_v8  ;;  %1198 = vst [vmem:[%s2470_s2 + $0x1b8] sm:$0xff] %v2266_v11  ;;  %v1228_v5 = vadd.f32 %v1227_v1, %v781_v56  ;;  %v1299_v12 = vmul.f32 %v784_v8, %v784_v8 }
 0x15f   :  { %v786_v9 = vpop.f32.mrf.mxu0  ;;  %v914_v16 = vpop.f32.mrf.mxu1 }
 0x160   :  { %v1361_v9 = vadd.f32 %v1360_v37, %v1298_v0  ;;  %v1229_v40 = vadd.f32 %v1228_v5, %v784_v8 }
 0x161   :  { %v789_v28 = vpop.f32.mrf.mxu0  ;;  %v2281_v31 = vpop.f32.mrf.mxu1 }
 0x162   :  { %1167 = vst [vmem:[%s2470_s2 + $0xc0] sm:$0xff] %v789_v28  ;;  %1199 = vst [vmem:[%s2470_s2 + $0x1c0] sm:$0xff] %v2281_v31  ;;  %v1300_v16 = vmul.f32 %v789_v28, %v789_v28  ;;  %v1362_v13 = vadd.f32 %v1361_v9, %v1299_v12  ;;  %v1230_v56 = vadd.f32 %v1229_v40, %v789_v28 }
 0x163   :  { %v791_v20 = vpop.f32.mrf.mxu0  ;;  %v919_v36 = vpop.f32.mrf.mxu1 }
 0x164   :  { %v1363_v20 = vadd.f32 %v1362_v13, %v1300_v16 }
 0x165   :  { %v792_v44 = vpop.f32.mrf.mxu0  ;;  %v2296_v25 = vpop.f32.mrf.mxu1 }
 0x166   :  { %1168 = vst [vmem:[%s2470_s2 + $0xc8] sm:$0xff] %v792_v44  ;;  %1200 = vst [vmem:[%s2470_s2 + $0x1c8] sm:$0xff] %v2296_v25  ;;  %v1301_v32 = vmul.f32 %v792_v44, %v792_v44  ;;  %v1231_v8 = vadd.f32 %v1230_v56, %v792_v44 }
 0x167   :  { %v794_v52 = vpop.f32.mrf.mxu0  ;;  %v922_v51 = vpop.f32.mrf.mxu1 }
 0x168   :  { %v1364_v21 = vadd.f32 %v1363_v20, %v1301_v32 }
 0x169   :  { %v797_v60 = vpop.f32.mrf.mxu0  ;;  %v2311_v33 = vpop.f32.mrf.mxu1 }
 0x16a   :  { %1169 = vst [vmem:[%s2470_s2 + $0xd0] sm:$0xff] %v797_v60  ;;  %1201 = vst [vmem:[%s2470_s2 + $0x1d0] sm:$0xff] %v2311_v33  ;;  %v1302_v36 = vmul.f32 %v797_v60, %v797_v60  ;;  %v1232_v28 = vadd.f32 %v1231_v8, %v797_v60 }
 0x16b   :  { %v799_v24 = vpop.f32.mrf.mxu0  ;;  %v927_v3 = vpop.f32.mrf.mxu1 }
 0x16c   :  { %v1365_v52 = vadd.f32 %v1364_v21, %v1302_v36  ;;  %v1309_v36 = vmul.f32 %v1960_v22, %v1960_v22  ;;  %v1310_v21 = vmul.f32 %v1972_v26, %v1972_v26 }
 0x16d   :  { %v800_v41 = vpop.f32.mrf.mxu0  ;;  %v2321_v15 = vpop.f32.mrf.mxu1 }
 0x16e   :  { %1170 = vst [vmem:[%s2470_s2 + $0xd8] sm:$0xff] %v800_v41  ;;  %1202 = vst [vmem:[%s2470_s2 + $0x1d8] sm:$0xff] %v2321_v15  ;;  %v1303_v47 = vmul.f32 %v800_v41, %v800_v41  ;;  %v1233_v44 = vadd.f32 %v1232_v28, %v800_v41 }
 0x16f   :  { %v802_v19 = vpop.f32.mrf.mxu0  ;;  %v930_v45 = vpop.f32.mrf.mxu1 }
 0x170   :  { %v1366_v4 = vadd.f32 %v1365_v52, %v1303_v47 }
 0x171   :  { %v805_v49 = vpop.f32.mrf.mxu0  ;;  %v2330_v35 = vpop.f32.mrf.mxu1 }
 0x172   :  { %1171 = vst [vmem:[%s2470_s2 + $0xe0] sm:$0xff] %v805_v49  ;;  %1203 = vst [vmem:[%s2470_s2 + $0x1e0] sm:$0xff] %v2330_v35  ;;  %v1304_v51 = vmul.f32 %v805_v49, %v805_v49  ;;  %v1234_v60 = vadd.f32 %v1233_v44, %v805_v49  ;;  %v1308_v49 = vmul.f32 %v1948_v18, %v1948_v18 }
 0x173   :  { %v807_v17 = vpop.f32.mrf.mxu0  ;;  %v935_v53 = vpop.f32.mrf.mxu1 }
 0x174   :  { %v1367_v24 = vadd.f32 %v1366_v4, %v1304_v51 }
 0x175   :  { %v808_v57 = vpop.f32.mrf.mxu0  ;;  %v2339_v48 = vpop.f32.mrf.mxu1 }
 0x176   :  { %1172 = vst [vmem:[%s2470_s2 + $0xe8] sm:$0xff] %v808_v57  ;;  %1204 = vst [vmem:[%s2470_s2 + $0x1e8] sm:$0xff] %v2339_v48  ;;  %v1305_v63 = vmul.f32 %v808_v57, %v808_v57  ;;  %v1235_v3 = vadd.f32 %v1234_v60, %v808_v57  ;;  %v1311_v57 = vmul.f32 %v1984_v30, %v1984_v30 }
 0x177   :  { %v810_v29 = vpop.f32.mrf.mxu0  ;;  %v938_v61 = vpop.f32.mrf.mxu1 }
 0x178   :  { %v1368_v41 = vadd.f32 %v1367_v24, %v1305_v63 }
 0x179   :  { %v813_v1 = vpop.f32.mrf.mxu0  ;;  %v2348_v0 = vpop.f32.mrf.mxu1 }
 0x17a   :  { %1173 = vst [vmem:[%s2470_s2 + $0xf0] sm:$0xff] %v813_v1  ;;  %v1306_v37 = vmul.f32 %v813_v1, %v813_v1  ;;  %1205 = vst [vmem:[%s2470_s2 + $0x1f0] sm:$0xff] %v2348_v0  ;;  %v1236_v9 = vadd.f32 %v1235_v3, %v813_v1 }
 0x17b   :  { %v815_v5 = vpop.f32.mrf.mxu0  ;;  %v943_v12 = vpop.f32.mrf.mxu1 }
 0x17c   :  { %v1369_v19 = vadd.f32 %v1368_v41, %v1306_v37 }
 0x17d   :  { %v816_v40 = vpop.f32.mrf.mxu0  ;;  %v2357_v16 = vpop.f32.mrf.mxu1 }
 0x17e   :  { %1174 = vst [vmem:[%s2470_s2 + $0xf8] sm:$0xff] %v816_v40  ;;  %v1237_v45 = vadd.f32 %v1236_v9, %v816_v40  ;;  %v1307_v13 = vmul.f32 %v816_v40, %v816_v40  ;;  %1206 = vst [vmem:[%s2470_s2 + $0x1f8] sm:$0xff] %v2357_v16 }
 0x17f   :  { %v818_v56 = vpop.f32.mrf.mxu0  ;;  %v946_v32 = vpop.f32.mrf.mxu1 }
 0x180   :  { %v1238_v20 = vadd.f32 %v1237_v45, %v1948_v18  ;;  %v1370_v8 = vadd.f32 %v1369_v19, %v1307_v13  ;;  %v1312_v18 = vmul.f32 %v1996_v34, %v1996_v34 }
 0x182   :  { %v1239_v17 = vadd.f32 %v1238_v20, %v1960_v22  ;;  %v1371_v53 = vadd.f32 %v1370_v8, %v1308_v49  ;;  %v1313_v22 = vmul.f32 %v2008_v38, %v2008_v38 }
 0x184   :  { %v1240_v28 = vadd.f32 %v1239_v17, %v1972_v26  ;;  %v1372_v47 = vadd.f32 %v1371_v53, %v1309_v36  ;;  %v1314_v26 = vmul.f32 %v2020_v42, %v2020_v42 }
 0x186   :  { %v1241_v52 = vadd.f32 %v1240_v28, %v1984_v30  ;;  %v1373_v44 = vadd.f32 %v1372_v47, %v1310_v21  ;;  %v1315_v30 = vmul.f32 %v2032_v46, %v2032_v46  ;;  %v1325_v21 = vmul.f32 %v2163_v39, %v2163_v39 }
 0x188   :  { %v1242_v51 = vadd.f32 %v1241_v52, %v1996_v34  ;;  %v1374_v29 = vadd.f32 %v1373_v44, %v1311_v57  ;;  %v1316_v34 = vmul.f32 %v2044_v50, %v2044_v50  ;;  %v1326_v57 = vmul.f32 %v2181_v55, %v2181_v55 }
 0x189   :  { %v1327_v44 = vmul.f32 %v2199_v7, %v2199_v7 }
 0x18a   :  { %v1243_v61 = vadd.f32 %v1242_v51, %v2008_v38  ;;  %v1375_v4 = vadd.f32 %v1374_v29, %v1312_v18  ;;  %v1317_v38 = vmul.f32 %v2056_v54, %v2056_v54  ;;  %v1328_v51 = vmul.f32 %v2217_v27, %v2217_v27 }
 0x18c   :  { %v1244_v60 = vadd.f32 %v1243_v61, %v2020_v42  ;;  %v1376_v63 = vadd.f32 %v1375_v4, %v1313_v22  ;;  %v1318_v42 = vmul.f32 %v2068_v58, %v2068_v58  ;;  %v1329_v22 = vmul.f32 %v2235_v43, %v2235_v43 }
 0x18d   :  { %v1330_v4 = vmul.f32 %v2251_v59, %v2251_v59 }
 0x18e   :  { %v1245_v1 = vadd.f32 %v1244_v60, %v2032_v46  ;;  %v1377_v24 = vadd.f32 %v1376_v63, %v1314_v26  ;;  %v1319_v46 = vmul.f32 %v2080_v62, %v2080_v62  ;;  %v1331_v60 = vmul.f32 %v2266_v11, %v2266_v11 }
 0x190   :  { %v1378_v3 = vadd.f32 %v1377_v24, %v1315_v30  ;;  %v1246_v37 = vadd.f32 %v1245_v1, %v2044_v50  ;;  %v1320_v50 = vmul.f32 %v2092_v2, %v2092_v2  ;;  %v1332_v30 = vmul.f32 %v2281_v31, %v2281_v31 }
 0x191   :  { %v1333_v24 = vmul.f32 %v2296_v25, %v2296_v25 }
 0x192   :  { %v1247_v5 = vadd.f32 %v1246_v37, %v2056_v54  ;;  %v1379_v12 = vadd.f32 %v1378_v3, %v1316_v34  ;;  %v1321_v54 = vmul.f32 %v2104_v6, %v2104_v6  ;;  %v1334_v3 = vmul.f32 %v2311_v33, %v2311_v33 }
 0x194   :  { %v1248_v41 = vadd.f32 %v1247_v5, %v2068_v58  ;;  %v1380_v9 = vadd.f32 %v1379_v12, %v1317_v38  ;;  %v1322_v58 = vmul.f32 %v2116_v10, %v2116_v10  ;;  %v1335_v38 = vmul.f32 %v2321_v15, %v2321_v15 }
 0x195   :  { %v1336_v12 = vmul.f32 %v2330_v35, %v2330_v35 }
 0x196   :  { %v1249_v40 = vadd.f32 %v1248_v41, %v2080_v62  ;;  %v1381_v19 = vadd.f32 %v1380_v9, %v1318_v42  ;;  %v1323_v62 = vmul.f32 %v2128_v14, %v2128_v14  ;;  %v1337_v41 = vmul.f32 %v2339_v48, %v2339_v48 }
 0x198   :  { %v1250_v45 = vadd.f32 %v1249_v40, %v2092_v2  ;;  %v1382_v13 = vadd.f32 %v1381_v19, %v1319_v46  ;;  %v1324_v2 = vmul.f32 %v2142_v23, %v2142_v23  ;;  %v1338_v46 = vmul.f32 %v2348_v0, %v2348_v0 }
 0x199   :  { %v1339_v19 = vmul.f32 %v2357_v16, %v2357_v16 }
 0x19a   :  { %v1251_v56 = vadd.f32 %v1250_v45, %v2104_v6  ;;  %v1383_v32 = vadd.f32 %v1382_v13, %v1320_v50 }
 0x19c   :  { %v1252_v49 = vadd.f32 %v1251_v56, %v2116_v10  ;;  %v1384_v20 = vadd.f32 %v1383_v32, %v1321_v54 }
 0x19e   :  { %v1253_v8 = vadd.f32 %v1252_v49, %v2128_v14  ;;  %v1385_v36 = vadd.f32 %v1384_v20, %v1322_v58 }
 0x1a0   :  { %v1254_v17 = vadd.f32 %v1253_v8, %v2142_v23  ;;  %v1386_v53 = vadd.f32 %v1385_v36, %v1323_v62 }
 0x1a2   :  { %v1255_v6 = vadd.f32 %v1254_v17, %v2163_v39  ;;  %v1387_v28 = vadd.f32 %v1386_v53, %v1324_v2 }
 0x1a4   :  { %v1388_v10 = vadd.f32 %v1387_v28, %v1325_v21  ;;  %v1256_v47 = vadd.f32 %v1255_v6, %v2181_v55 }
 0x1a6   :  { %v1389_v14 = vadd.f32 %v1388_v10, %v1326_v57  ;;  %v1257_v52 = vadd.f32 %v1256_v47, %v2199_v7 }
 0x1a8   :  { %v1390_v23 = vadd.f32 %v1389_v14, %v1327_v44  ;;  %v1258_v18 = vadd.f32 %v1257_v52, %v2217_v27 }
 0x1aa   :  { %v1391_v39 = vadd.f32 %v1390_v23, %v1328_v51  ;;  %v1259_v29 = vadd.f32 %v1258_v18, %v2235_v43 }
 0x1ac   :  { %v1392_v61 = vadd.f32 %v1391_v39, %v1329_v22  ;;  %v1260_v55 = vadd.f32 %v1259_v29, %v2251_v59 }
 0x1ae   :  { %v1393_v26 = vadd.f32 %v1392_v61, %v1330_v4  ;;  %v1261_v7 = vadd.f32 %v1260_v55, %v2266_v11 }
 0x1b0   :  { %v1394_v63 = vadd.f32 %v1393_v26, %v1331_v60  ;;  %v1262_v27 = vadd.f32 %v1261_v7, %v2281_v31 }
 0x1b2   :  { %v1395_v1 = vadd.f32 %v1394_v63, %v1332_v30  ;;  %v1263_v43 = vadd.f32 %v1262_v27, %v2296_v25 }
 0x1b4   :  { %v1396_v34 = vadd.f32 %v1395_v1, %v1333_v24  ;;  %v1264_v59 = vadd.f32 %v1263_v43, %v2311_v33 }
 0x1b6   :  { %v1397_v37 = vadd.f32 %v1396_v34, %v1334_v3  ;;  %v1265_v11 = vadd.f32 %v1264_v59, %v2321_v15 }
 0x1b8   :  { %v1398_v5 = vadd.f32 %v1397_v37, %v1335_v38  ;;  %v1266_v31 = vadd.f32 %v1265_v11, %v2330_v35 }
 0x1ba   :  { %v1399_v42 = vadd.f32 %v1398_v5, %v1336_v12  ;;  %v1267_v25 = vadd.f32 %v1266_v31, %v2339_v48 }
 0x1bc   :  { %v1400_v9 = vadd.f32 %v1399_v42, %v1337_v41  ;;  %v1268_v33 = vadd.f32 %v1267_v25, %v2348_v0 }
 0x1be   :  { %v1401_v40 = vadd.f32 %v1400_v9, %v1338_v46  ;;  %v1269_v15 = vadd.f32 %v1268_v33, %v2357_v16 }
 0x1c0   :  { %v1270_v50 = vrot.slane %v1269_v15, 4  ;;  %v1402_v35 = vadd.f32 %v1401_v40, %v1339_v19 }
 0x1c2   :  { %v1271_v45 = vadd.f32 %v1270_v50, %v1269_v15  ;;  %v1403_v13 = vrot.slane %v1402_v35, 4 }
 0x1c4   :  { %v1272_v54 = vrot.slane %v1271_v45, 2  ;;  %v1404_v56 = vadd.f32 %v1403_v13, %v1402_v35 }
 0x1c6   :  { %v1273_v32 = vadd.f32 %v1272_v54, %v1271_v45  ;;  %v1405_v48 = vrot.slane %v1404_v56, 2 }
 0x1c8   :  { %v1274_v58 = vrot.slane %v1273_v32, 1  ;;  %v1406_v49 = vadd.f32 %v1405_v48, %v1404_v56 }
 0x1ca   :  { %v1275_v20 = vadd.f32 %v1274_v58, %v1273_v32  ;;  %v1407_v62 = vrot.slane %v1406_v49, 1 }
 0x1cc   :  { %v1408_v8 = vadd.f32 %v1407_v62, %v1406_v49  ;;  %1409 = vst [vmem:[%s2471_s3] sm:$0xff] %v1275_v20 }
 0x1ce   :  { %1410 = vst [vmem:[%s2472_s4] sm:$0xff] %v1408_v8 }

// kernel: resnet_generator_forward.21
= control target key start
LH: loop header
LB: loop body
LE: loop exit
PB: predicated region body
PF: predicated region fallthrough
CT: control target
= control target key end

     0   :  { %s638_s1 = inlined_call_operand.vmem [shape: bf16[128,128], index: 1, kind: input, shape index: {}]   ;;  %s639_s0 = inlined_call_operand.vmem [shape: bf16[128,128], index: 0, kind: input, shape index: {}]   ;;  %s640_s2 = inlined_call_operand.vmem [shape: f32[128,128], index: 2, kind: output, shape index: {0}]   ;;  %s641_s3 = inlined_call_operand.vmem [shape: f32[8,128], index: 3, kind: output, shape index: {1}]   ;;  %s642_s4 = inlined_call_operand.vmem [shape: f32[8,128], index: 4, kind: output, shape index: {2}]  }
   0x1   :  { %v495_v0 = vld [vmem:[%s638_s1 + $0x38] sm:$0xff]   ;;  %v496_v1 = vld [vmem:[%s638_s1 + $0x30] sm:$0xff]   ;;  %v497_v2 = vld [vmem:[%s638_s1 + $0x28] sm:$0xff]  }
   0x2   :  { %447 = vmatprep.subr.bf16.mxu0 %v495_v0  ;;  %479 = vmatprep.subr.bf16.mxu1 %v495_v0  ;;  %v498_v3 = vld [vmem:[%s638_s1 + $0x20] sm:$0xff]   ;;  %v499_v5 = vld [vmem:[%s638_s1 + $0x18] sm:$0xff]   ;;  %v500_v7 = vld [vmem:[%s638_s1 + $0x10] sm:$0xff]  }
   0x3   :  { %448 = vmatpush3.bf16.msra.mxu0 %v495_v0  ;;  %487 = vmatpush3.bf16.msra.mxu1 %v495_v0  ;;  %v503_v4 = vld [vmem:[%s639_s0] sm:$0xff]   ;;  %v501_v8 = vld [vmem:[%s638_s1 + $0x8] sm:$0xff]   ;;  %v505_v12 = vld [vmem:[%s639_s0 + $0x10] sm:$0xff]  }
   0x4   :  { %449 = vmatprep.subr.bf16.mxu0 %v496_v1  ;;  %480 = vmatprep.subr.bf16.mxu1 %v496_v1  ;;  %v507_v6 = vld [vmem:[%s639_s0 + $0x20] sm:$0xff]   ;;  %v504_v10 = vld [vmem:[%s639_s0 + $0x8] sm:$0xff]   ;;  %v509_v13 = vld [vmem:[%s639_s0 + $0x30] sm:$0xff]  }
   0x5   :  { %463 = vmatprep.mubr.bf16.mxu0 %v503_v4  ;;  %471 = vmatprep.mubr.bf16.mxu1 %v507_v6  ;;  %v502_v9 = vld [vmem:[%s638_s1] sm:$0xff]   ;;  %v508_v11 = vld [vmem:[%s639_s0 + $0x28] sm:$0xff]   ;;  %v506_v14 = vld [vmem:[%s639_s0 + $0x18] sm:$0xff]  }
   0x6   :  { %v510_v15 = vld [vmem:[%s639_s0 + $0x38] sm:$0xff]  }
   0x7   :  { %450 = vmatpush3.bf16.msra.mxu0 %v496_v1  ;;  %488 = vmatpush3.bf16.msra.mxu1 %v496_v1 }
   0x8   :  { %451 = vmatprep.subr.bf16.mxu0 %v497_v2  ;;  %481 = vmatprep.subr.bf16.mxu1 %v497_v2 }
   0xb   :  { %452 = vmatpush3.bf16.msra.mxu0 %v497_v2  ;;  %489 = vmatpush3.bf16.msra.mxu1 %v497_v2 }
   0xc   :  { %453 = vmatprep.subr.bf16.mxu0 %v498_v3  ;;  %482 = vmatprep.subr.bf16.mxu1 %v498_v3 }
   0xf   :  { %454 = vmatpush3.bf16.msra.mxu0 %v498_v3  ;;  %490 = vmatpush3.bf16.msra.mxu1 %v498_v3 }
  0x10   :  { %455 = vmatprep.subr.bf16.mxu0 %v499_v5  ;;  %483 = vmatprep.subr.bf16.mxu1 %v499_v5 }
  0x13   :  { %456 = vmatpush3.bf16.msra.mxu0 %v499_v5  ;;  %491 = vmatpush3.bf16.msra.mxu1 %v499_v5 }
  0x14   :  { %457 = vmatprep.subr.bf16.mxu0 %v500_v7  ;;  %484 = vmatprep.subr.bf16.mxu1 %v500_v7 }
  0x17   :  { %458 = vmatpush3.bf16.msra.mxu0 %v500_v7  ;;  %492 = vmatpush3.bf16.msra.mxu1 %v500_v7 }
  0x18   :  { %459 = vmatprep.subr.bf16.mxu0 %v501_v8  ;;  %485 = vmatprep.subr.bf16.mxu1 %v501_v8 }
  0x1b   :  { %460 = vmatpush3.bf16.msra.mxu0 %v501_v8  ;;  %493 = vmatpush3.bf16.msra.mxu1 %v501_v8 }
  0x1c   :  { %461 = vmatprep.subr.bf16.mxu0 %v502_v9  ;;  %486 = vmatprep.subr.bf16.mxu1 %v502_v9 }
  0x1f   :  { %462 = vmatpush3.bf16.msra.mxu0 %v502_v9  ;;  %494 = vmatpush3.bf16.msra.mxu1 %v502_v9 }
  0x22   :  { %464 = vmatmul.mubr.bf16.vlgmr.msra.gmra.mxu0 %v504_v10  ;;  %472 = vmatmul.mubr.bf16.vlgmr.msra.gmra.mxu1 %v508_v11 }
  0x23   :  { %467 = vmatprep.mubr.bf16.mxu0 %v505_v12  ;;  %475 = vmatprep.mubr.bf16.mxu1 %v509_v13 }
  0x2a   :  { %468 = vmatmul.mubr.bf16.gmra.mxu0 %v506_v14  ;;  %476 = vmatmul.mubr.bf16.gmra.mxu1 %v510_v15 }
  0xe2   :  { %v465_v16 = vpop.f32.mrf.mxu0  ;;  %v473_v17 = vpop.f32.mrf.mxu1 }
  0xe3   :  { %329 = vst [vmem:[%s640_s2 + $0x10] sm:$0xff] %v465_v16  ;;  %337 = vst [vmem:[%s640_s2 + $0x50] sm:$0xff] %v473_v17  ;;  %v366_v29 = vmul.f32 %v465_v16, %v465_v16  ;;  %v374_v59 = vmul.f32 %v473_v17, %v473_v17 }
  0xe4   :  { %v213_v18 = vpop.f32.mrf.mxu0  ;;  %v245_v19 = vpop.f32.mrf.mxu1 }
  0xe5   :  { %327 = vst [vmem:[%s640_s2] sm:$0xff] %v213_v18  ;;  %335 = vst [vmem:[%s640_s2 + $0x40] sm:$0xff] %v245_v19  ;;  %v364_v24 = vmul.f32 %v213_v18, %v213_v18  ;;  %v372_v53 = vmul.f32 %v245_v19, %v245_v19 }
  0xe6   :  { %v466_v20 = vpop.f32.mrf.mxu0  ;;  %v474_v21 = vpop.f32.mrf.mxu1 }
  0xe7   :  { %330 = vst [vmem:[%s640_s2 + $0x18] sm:$0xff] %v466_v20  ;;  %338 = vst [vmem:[%s640_s2 + $0x58] sm:$0xff] %v474_v21  ;;  %v367_v34 = vmul.f32 %v466_v20, %v466_v20  ;;  %v375_v62 = vmul.f32 %v474_v21, %v474_v21 }
  0xe8   :  { %v216_v22 = vpop.f32.mrf.mxu0  ;;  %v248_v23 = vpop.f32.mrf.mxu1 }
  0xe9   :  { %328 = vst [vmem:[%s640_s2 + $0x8] sm:$0xff] %v216_v22  ;;  %v343_v25 = vadd.f32 %v216_v22, %v213_v18  ;;  %v365_v26 = vmul.f32 %v216_v22, %v216_v22  ;;  %336 = vst [vmem:[%s640_s2 + $0x48] sm:$0xff] %v248_v23  ;;  %v373_v57 = vmul.f32 %v248_v23, %v248_v23 }
  0xea   :  { %v469_v27 = vpop.f32.mrf.mxu0  ;;  %v477_v28 = vpop.f32.mrf.mxu1 }
  0xeb   :  { %v344_v30 = vadd.f32 %v465_v16, %v343_v25  ;;  %v380_v31 = vadd.f32 %v365_v26, %v364_v24  ;;  %333 = vst [vmem:[%s640_s2 + $0x30] sm:$0xff] %v469_v27  ;;  %341 = vst [vmem:[%s640_s2 + $0x70] sm:$0xff] %v477_v28  ;;  %v370_v47 = vmul.f32 %v469_v27, %v469_v27 }
  0xec   :  { %v229_v32 = vpop.f32.mrf.mxu0  ;;  %v261_v33 = vpop.f32.mrf.mxu1  ;;  %v378_v7 = vmul.f32 %v477_v28, %v477_v28 }
  0xed   :  { %v381_v35 = vadd.f32 %v380_v31, %v366_v29  ;;  %331 = vst [vmem:[%s640_s2 + $0x20] sm:$0xff] %v229_v32  ;;  %v345_v36 = vadd.f32 %v466_v20, %v344_v30  ;;  %339 = vst [vmem:[%s640_s2 + $0x60] sm:$0xff] %v261_v33  ;;  %v368_v40 = vmul.f32 %v229_v32, %v229_v32 }
  0xee   :  { %v470_v37 = vpop.f32.mrf.mxu0  ;;  %v478_v38 = vpop.f32.mrf.mxu1  ;;  %v376_v2 = vmul.f32 %v261_v33, %v261_v33 }
  0xef   :  { %v346_v39 = vadd.f32 %v345_v36, %v229_v32  ;;  %v382_v41 = vadd.f32 %v381_v35, %v367_v34  ;;  %334 = vst [vmem:[%s640_s2 + $0x38] sm:$0xff] %v470_v37  ;;  %342 = vst [vmem:[%s640_s2 + $0x78] sm:$0xff] %v478_v38  ;;  %v371_v50 = vmul.f32 %v470_v37, %v470_v37 }
  0xf0   :  { %v232_v42 = vpop.f32.mrf.mxu0  ;;  %v264_v43 = vpop.f32.mrf.mxu1  ;;  %v379_v10 = vmul.f32 %v478_v38, %v478_v38 }
  0xf1   :  { %v383_v44 = vadd.f32 %v382_v41, %v368_v40  ;;  %332 = vst [vmem:[%s640_s2 + $0x28] sm:$0xff] %v232_v42  ;;  %v347_v45 = vadd.f32 %v346_v39, %v232_v42  ;;  %v369_v46 = vmul.f32 %v232_v42, %v232_v42  ;;  %340 = vst [vmem:[%s640_s2 + $0x68] sm:$0xff] %v264_v43 }
  0xf2   :  { %v377_v6 = vmul.f32 %v264_v43, %v264_v43 }
  0xf3   :  { %v348_v48 = vadd.f32 %v469_v27, %v347_v45  ;;  %v384_v49 = vadd.f32 %v383_v44, %v369_v46 }
  0xf5   :  { %v349_v51 = vadd.f32 %v470_v37, %v348_v48  ;;  %v385_v52 = vadd.f32 %v384_v49, %v370_v47 }
  0xf7   :  { %v386_v54 = vadd.f32 %v385_v52, %v371_v50  ;;  %v350_v55 = vadd.f32 %v349_v51, %v245_v19 }
  0xf9   :  { %v351_v56 = vadd.f32 %v350_v55, %v248_v23  ;;  %v387_v58 = vadd.f32 %v386_v54, %v372_v53 }
  0xfb   :  { %v352_v60 = vadd.f32 %v473_v17, %v351_v56  ;;  %v388_v61 = vadd.f32 %v387_v58, %v373_v57 }
  0xfd   :  { %v389_v63 = vadd.f32 %v388_v61, %v374_v59  ;;  %v353_v0 = vadd.f32 %v474_v21, %v352_v60 }
  0xff   :  { %v354_v1 = vadd.f32 %v353_v0, %v261_v33  ;;  %v390_v3 = vadd.f32 %v389_v63, %v375_v62 }
 0x101   :  { %v391_v4 = vadd.f32 %v390_v3, %v376_v2  ;;  %v355_v5 = vadd.f32 %v354_v1, %v264_v43 }
 0x103   :  { %v356_v8 = vadd.f32 %v477_v28, %v355_v5  ;;  %v392_v9 = vadd.f32 %v391_v4, %v377_v6 }
 0x105   :  { %v357_v11 = vadd.f32 %v478_v38, %v356_v8  ;;  %v393_v12 = vadd.f32 %v392_v9, %v378_v7 }
 0x107   :  { %v358_v13 = vrot.slane %v357_v11, 4  ;;  %v394_v14 = vadd.f32 %v393_v12, %v379_v10 }
 0x109   :  { %v359_v15 = vadd.f32 %v358_v13, %v357_v11  ;;  %v395_v16 = vrot.slane %v394_v14, 4 }
 0x10b   :  { %v360_v17 = vrot.slane %v359_v15, 2  ;;  %v396_v18 = vadd.f32 %v395_v16, %v394_v14 }
 0x10d   :  { %v361_v19 = vadd.f32 %v360_v17, %v359_v15  ;;  %v397_v20 = vrot.slane %v396_v18, 2 }
 0x10f   :  { %v362_v21 = vrot.slane %v361_v19, 1  ;;  %v398_v22 = vadd.f32 %v397_v20, %v396_v18 }
 0x111   :  { %v363_v23 = vadd.f32 %v362_v21, %v361_v19  ;;  %v399_v24 = vrot.slane %v398_v22, 1 }
 0x113   :  { %v400_v25 = vadd.f32 %v399_v24, %v398_v22  ;;  %401 = vst [vmem:[%s641_s3] sm:$0xff] %v363_v23 }
 0x115   :  { %402 = vst [vmem:[%s642_s4] sm:$0xff] %v400_v25 }

// kernel: resnet_generator_forward.22
= control target key start
LH: loop header
LB: loop body
LE: loop exit
PB: predicated region body
PF: predicated region fallthrough
CT: control target
= control target key end

     0   :  { %s254_s0 = inlined_call_operand.vmem [shape: f32[128,128], index: 0, kind: input, shape index: {}]   ;;  %s255_s1 = inlined_call_operand.vmem [shape: f32[1,128], index: 1, kind: input, shape index: {}]   ;;  %s256_s2 = inlined_call_operand.vmem [shape: f32[1,128], index: 2, kind: input, shape index: {}]   ;;  %s257_s3 = inlined_call_operand.vmem [shape: f32[128,128], index: 3, kind: output, shape index: {}]  }
   0x1   :  { %v14_v0 = vld [vmem:[%s254_s0] sm:$0xff]  ;;  %v15_v4 = vld [vmem:[%s254_s0 + $0x8] sm:$0xff]  ;;  %v16_v5 = vld [vmem:[%s254_s0 + $0x10] sm:$0xff] }
   0x2   :  { %v112_v1 = vld [vmem:[%s255_s1] ss:$0 sm:$0xff]  ;;  %v17_v6 = vld [vmem:[%s254_s0 + $0x18] sm:$0xff]  ;;  %v19_v11 = vld [vmem:[%s254_s0 + $0x28] sm:$0xff] }
   0x3   :  { %v143_v2 = vld [vmem:[%s256_s2] ss:$0 sm:$0xff]  ;;  %v37_v3 = vmul.f32 %v112_v1, %v14_v0  ;;  %v38_v7 = vmul.f32 %v112_v1, %v15_v4  ;;  %v39_v8 = vmul.f32 %v112_v1, %v16_v5  ;;  %v40_v9 = vmul.f32 %v112_v1, %v17_v6  ;;  %v20_v12 = vld [vmem:[%s254_s0 + $0x30] sm:$0xff]  ;;  %v21_v17 = vld [vmem:[%s254_s0 + $0x38] sm:$0xff] }
   0x4   :  { %v18_v10 = vld [vmem:[%s254_s0 + $0x20] sm:$0xff]  ;;  %v42_v15 = vmul.f32 %v112_v1, %v19_v11  ;;  %v43_v16 = vmul.f32 %v112_v1, %v20_v12  ;;  %v44_v21 = vmul.f32 %v112_v1, %v21_v17  ;;  %v23_v27 = vld [vmem:[%s254_s0 + $0x48] sm:$0xff]  ;;  %v24_v28 = vld [vmem:[%s254_s0 + $0x50] sm:$0xff] }
   0x5   :  { %v60_v13 = vadd.f32 %v143_v2, %v37_v3  ;;  %v41_v14 = vmul.f32 %v112_v1, %v18_v10  ;;  %v61_v18 = vadd.f32 %v143_v2, %v38_v7  ;;  %v62_v19 = vadd.f32 %v143_v2, %v39_v8  ;;  %v22_v22 = vld [vmem:[%s254_s0 + $0x40] sm:$0xff]  ;;  %v25_v29 = vld [vmem:[%s254_s0 + $0x58] sm:$0xff]  ;;  %v27_v35 = vld [vmem:[%s254_s0 + $0x68] sm:$0xff] }
   0x6   :  { %v63_v20 = vadd.f32 %v143_v2, %v40_v9  ;;  %v65_v25 = vadd.f32 %v143_v2, %v42_v15  ;;  %v66_v26 = vadd.f32 %v143_v2, %v43_v16  ;;  %v67_v33 = vadd.f32 %v143_v2, %v44_v21  ;;  %v26_v34 = vld [vmem:[%s254_s0 + $0x60] sm:$0xff]  ;;  %v28_v36 = vld [vmem:[%s254_s0 + $0x70] sm:$0xff]  ;;  %v29_v41 = vld [vmem:[%s254_s0 + $0x78] sm:$0xff] }
   0x7   :  { %v76_v23 = vmax.f32 %v60_v13, 0.0  ;;  %v64_v24 = vadd.f32 %v143_v2, %v41_v14  ;;  %v77_v30 = vmax.f32 %v61_v18, 0.0  ;;  %v78_v31 = vmax.f32 %v62_v19, 0.0 }
   0x8   :  { %v79_v32 = vmax.f32 %v63_v20, 0.0  ;;  %v81_v38 = vmax.f32 %v65_v25, 0.0  ;;  %v82_v39 = vmax.f32 %v66_v26, 0.0  ;;  %v45_v40 = vmul.f32 %v112_v1, %v22_v22 }
   0x9   :  { %92 = vst [vmem:[%s257_s3] sm:$0xff] %v76_v23  ;;  %v80_v37 = vmax.f32 %v64_v24, 0.0  ;;  %93 = vst [vmem:[%s257_s3 + $0x8] sm:$0xff] %v77_v30  ;;  %v83_v42 = vmax.f32 %v67_v33, 0.0  ;;  %v46_v43 = vmul.f32 %v112_v1, %v23_v27  ;;  %v47_v44 = vmul.f32 %v112_v1, %v24_v28 }
   0xa   :  { %94 = vst [vmem:[%s257_s3 + $0x10] sm:$0xff] %v78_v31  ;;  %95 = vst [vmem:[%s257_s3 + $0x18] sm:$0xff] %v79_v32  ;;  %v48_v45 = vmul.f32 %v112_v1, %v25_v29  ;;  %v68_v46 = vadd.f32 %v143_v2, %v45_v40  ;;  %v49_v47 = vmul.f32 %v112_v1, %v26_v34 }
   0xb   :  { %96 = vst [vmem:[%s257_s3 + $0x20] sm:$0xff] %v80_v37  ;;  %97 = vst [vmem:[%s257_s3 + $0x28] sm:$0xff] %v81_v38  ;;  %v50_v48 = vmul.f32 %v112_v1, %v27_v35  ;;  %v51_v49 = vmul.f32 %v112_v1, %v28_v36  ;;  %v69_v50 = vadd.f32 %v143_v2, %v46_v43 }
   0xc   :  { %98 = vst [vmem:[%s257_s3 + $0x30] sm:$0xff] %v82_v39  ;;  %99 = vst [vmem:[%s257_s3 + $0x38] sm:$0xff] %v83_v42  ;;  %v70_v51 = vadd.f32 %v143_v2, %v47_v44  ;;  %v71_v52 = vadd.f32 %v143_v2, %v48_v45  ;;  %v52_v53 = vmul.f32 %v112_v1, %v29_v41  ;;  %v84_v54 = vmax.f32 %v68_v46, 0.0 }
   0xd   :  { %v72_v55 = vadd.f32 %v143_v2, %v49_v47  ;;  %v73_v56 = vadd.f32 %v143_v2, %v50_v48  ;;  %v74_v57 = vadd.f32 %v143_v2, %v51_v49  ;;  %v85_v58 = vmax.f32 %v69_v50, 0.0 }
   0xe   :  { %v86_v59 = vmax.f32 %v70_v51, 0.0  ;;  %v87_v60 = vmax.f32 %v71_v52, 0.0  ;;  %v75_v61 = vadd.f32 %v143_v2, %v52_v53  ;;  %100 = vst [vmem:[%s257_s3 + $0x40] sm:$0xff] %v84_v54 }
   0xf   :  { %v88_v62 = vmax.f32 %v72_v55, 0.0  ;;  %v89_v63 = vmax.f32 %v73_v56, 0.0  ;;  %v90_v0 = vmax.f32 %v74_v57, 0.0  ;;  %101 = vst [vmem:[%s257_s3 + $0x48] sm:$0xff] %v85_v58 }
  0x10   :  { %102 = vst [vmem:[%s257_s3 + $0x50] sm:$0xff] %v86_v59  ;;  %103 = vst [vmem:[%s257_s3 + $0x58] sm:$0xff] %v87_v60  ;;  %v91_v1 = vmax.f32 %v75_v61, 0.0 }
  0x11   :  { %104 = vst [vmem:[%s257_s3 + $0x60] sm:$0xff] %v88_v62  ;;  %105 = vst [vmem:[%s257_s3 + $0x68] sm:$0xff] %v89_v63 }
  0x12   :  { %106 = vst [vmem:[%s257_s3 + $0x70] sm:$0xff] %v90_v0  ;;  %107 = vst [vmem:[%s257_s3 + $0x78] sm:$0xff] %v91_v1 }

// kernel: resnet_generator_forward.24
= control target key start
LH: loop header
LB: loop body
LE: loop exit
PB: predicated region body
PF: predicated region fallthrough
CT: control target
= control target key end

     0   :  { %s104_s0 = inlined_call_operand.vmem [shape: f32[32,128], index: 0, kind: input, shape index: {}]   ;;  %s105_s1 = inlined_call_operand.vmem [shape: f32[1,128], index: 1, kind: input, shape index: {}]   ;;  %s106_s2 = inlined_call_operand.vmem [shape: f32[1,128], index: 2, kind: input, shape index: {}]   ;;  %s107_s3 = inlined_call_operand.vmem [shape: f32[32,128], index: 3, kind: output, shape index: {}]  }
   0x1   :  { %v14_v0 = vld [vmem:[%s104_s0] sm:$0xff]  ;;  %v15_v4 = vld [vmem:[%s104_s0 + $0x8] sm:$0xff]  ;;  %v16_v5 = vld [vmem:[%s104_s0 + $0x10] sm:$0xff] }
   0x2   :  { %v52_v1 = vld [vmem:[%s105_s1] ss:$0 sm:$0xff]  ;;  %v17_v6 = vld [vmem:[%s104_s0 + $0x18] sm:$0xff] }
   0x3   :  { %v53_v2 = vld [vmem:[%s106_s2] ss:$0 sm:$0xff]  ;;  %v25_v3 = vmul.f32 %v52_v1, %v14_v0  ;;  %v26_v7 = vmul.f32 %v52_v1, %v15_v4  ;;  %v27_v8 = vmul.f32 %v52_v1, %v16_v5  ;;  %v28_v9 = vmul.f32 %v52_v1, %v17_v6 }
   0x5   :  { %v36_v10 = vadd.f32 %v53_v2, %v25_v3  ;;  %v37_v11 = vadd.f32 %v53_v2, %v26_v7  ;;  %v38_v12 = vadd.f32 %v53_v2, %v27_v8  ;;  %v39_v13 = vadd.f32 %v53_v2, %v28_v9 }
   0x7   :  { %v40_v14 = vmax.f32 %v36_v10, 0.0  ;;  %v41_v15 = vmax.f32 %v37_v11, 0.0  ;;  %v42_v16 = vmax.f32 %v38_v12, 0.0  ;;  %v43_v17 = vmax.f32 %v39_v13, 0.0 }
   0x9   :  { %44 = vst [vmem:[%s107_s3] sm:$0xff] %v40_v14  ;;  %45 = vst [vmem:[%s107_s3 + $0x8] sm:$0xff] %v41_v15 }
   0xa   :  { %46 = vst [vmem:[%s107_s3 + $0x10] sm:$0xff] %v42_v16  ;;  %47 = vst [vmem:[%s107_s3 + $0x18] sm:$0xff] %v43_v17 }

// kernel: resnet_generator_forward.23
= control target key start
LH: loop header
LB: loop body
LE: loop exit
PB: predicated region body
PF: predicated region fallthrough
CT: control target
= control target key end

     0   :  { %s472_s1 = inlined_call_operand.vmem [shape: bf16[256,128], index: 1, kind: input, shape index: {}]   ;;  %s473_s0 = inlined_call_operand.vmem [shape: bf16[32,256], index: 0, kind: input, shape index: {}]   ;;  %s474_s2 = inlined_call_operand.vmem [shape: f32[32,128], index: 2, kind: output, shape index: {0}]   ;;  %s475_s3 = inlined_call_operand.vmem [shape: f32[8,128], index: 3, kind: output, shape index: {1}]   ;;  %s476_s4 = inlined_call_operand.vmem [shape: f32[8,128], index: 4, kind: output, shape index: {2}]  }
   0x1   :  { %v347_v0 = vld [vmem:[%s472_s1 + $0x78] sm:$0xff]   ;;  %v349_v2 = vld [vmem:[%s472_s1 + $0x70] sm:$0xff]   ;;  %v351_v4 = vld [vmem:[%s472_s1 + $0x68] sm:$0xff]  }
   0x2   :  { %v348_v1 = vld [vmem:[%s472_s1 + $0x38] sm:$0xff]   ;;  %303 = vmatprep.subr.bf16.mxu0 %v347_v0  ;;  %331 = vmatprep.subr.bf16.mxu1 %v347_v0  ;;  %v350_v3 = vld [vmem:[%s472_s1 + $0x30] sm:$0xff]   ;;  %v352_v5 = vld [vmem:[%s472_s1 + $0x28] sm:$0xff]  }
   0x3   :  { %304 = vmatpush3.bf16.msra.mxu0 %v348_v1  ;;  %339 = vmatpush3.bf16.msra.mxu1 %v348_v1  ;;  %v353_v6 = vld [vmem:[%s472_s1 + $0x60] sm:$0xff]   ;;  %v355_v8 = vld [vmem:[%s472_s1 + $0x58] sm:$0xff]   ;;  %v357_v10 = vld [vmem:[%s472_s1 + $0x50] sm:$0xff]  }
   0x4   :  { %305 = vmatprep.subr.bf16.mxu0 %v349_v2  ;;  %332 = vmatprep.subr.bf16.mxu1 %v349_v2  ;;  %v354_v7 = vld [vmem:[%s472_s1 + $0x20] sm:$0xff]   ;;  %v356_v9 = vld [vmem:[%s472_s1 + $0x18] sm:$0xff]   ;;  %v358_v13 = vld [vmem:[%s472_s1 + $0x10] sm:$0xff]  }
   0x5   :  { %v365_v11 = vld [vmem:[%s473_s0 + $0x4] ss:$8 sps:$4 sm:$0xff]   ;;  %v368_v12 = vld [vmem:[%s473_s0 + $0x14] ss:$8 sps:$4 sm:$0xff]   ;;  %v363_v18 = vld [vmem:[%s473_s0] ss:$8 sps:$4 sm:$0xff]  }
   0x6   :  { %v359_v14 = vld [vmem:[%s472_s1 + $0x48] sm:$0xff]   ;;  %211 = vmatprep.mubr.bf16.mxu0 %v365_v11  ;;  %219 = vmatprep.mubr.bf16.mxu1 %v368_v12  ;;  %v361_v16 = vld [vmem:[%s472_s1 + $0x40] sm:$0xff]   ;;  %v366_v19 = vld [vmem:[%s473_s0 + $0x10] ss:$8 sps:$4 sm:$0xff]  }
   0x7   :  { %306 = vmatpush3.bf16.msra.mxu0 %v350_v3  ;;  %340 = vmatpush3.bf16.msra.mxu1 %v350_v3  ;;  %v360_v15 = vld [vmem:[%s472_s1 + $0x8] sm:$0xff]   ;;  %v362_v17 = vld [vmem:[%s472_s1] sm:$0xff]  }
   0x8   :  { %307 = vmatprep.subr.bf16.mxu0 %v351_v4  ;;  %333 = vmatprep.subr.bf16.mxu1 %v351_v4 }
   0xb   :  { %308 = vmatpush3.bf16.msra.mxu0 %v352_v5  ;;  %341 = vmatpush3.bf16.msra.mxu1 %v352_v5 }
   0xc   :  { %309 = vmatprep.subr.bf16.mxu0 %v353_v6  ;;  %334 = vmatprep.subr.bf16.mxu1 %v353_v6 }
   0xf   :  { %310 = vmatpush3.bf16.msra.mxu0 %v354_v7  ;;  %342 = vmatpush3.bf16.msra.mxu1 %v354_v7 }
  0x10   :  { %311 = vmatprep.subr.bf16.mxu0 %v355_v8  ;;  %335 = vmatprep.subr.bf16.mxu1 %v355_v8 }
  0x13   :  { %312 = vmatpush3.bf16.msra.mxu0 %v356_v9  ;;  %343 = vmatpush3.bf16.msra.mxu1 %v356_v9 }
  0x14   :  { %313 = vmatprep.subr.bf16.mxu0 %v357_v10  ;;  %336 = vmatprep.subr.bf16.mxu1 %v357_v10 }
  0x17   :  { %314 = vmatpush3.bf16.msra.mxu0 %v358_v13  ;;  %344 = vmatpush3.bf16.msra.mxu1 %v358_v13 }
  0x18   :  { %315 = vmatprep.subr.bf16.mxu0 %v359_v14  ;;  %337 = vmatprep.subr.bf16.mxu1 %v359_v14 }
  0x1b   :  { %316 = vmatpush3.bf16.msra.mxu0 %v360_v15  ;;  %345 = vmatpush3.bf16.msra.mxu1 %v360_v15 }
  0x1c   :  { %317 = vmatprep.subr.bf16.mxu0 %v361_v16  ;;  %338 = vmatprep.subr.bf16.mxu1 %v361_v16 }
  0x1f   :  { %318 = vmatpush3.bf16.msra.mxu0 %v362_v17  ;;  %346 = vmatpush3.bf16.msra.mxu1 %v362_v17 }
  0x22   :  { %212 = vmatmul.mubr.bf16.vlgmr.msra.gmra.mxu0 %v363_v18  ;;  %220 = vmatmul.mubr.bf16.vlgmr.msra.gmra.mxu1 %v366_v19 }
  0xe2   :  { %v319_v20 = vpop.f32.mrf.mxu0  ;;  %v325_v21 = vpop.f32.mrf.mxu1 }
  0xe4   :  { %v320_v22 = vpop.f32.mrf.mxu0  ;;  %v326_v23 = vpop.f32.mrf.mxu1 }
  0xe5   :  { %v321_v24 = vadd.f32 %v320_v22, %v319_v20  ;;  %v327_v25 = vadd.f32 %v326_v23, %v325_v21 }
  0xe6   :  { %v322_v26 = vpop.f32.mrf.mxu0  ;;  %v328_v27 = vpop.f32.mrf.mxu1 }
  0xe7   :  { %243 = vst [vmem:[%s474_s2] sm:$0xff] %v321_v24  ;;  %245 = vst [vmem:[%s474_s2 + $0x10] sm:$0xff] %v327_v25  ;;  %v256_v32 = vmul.f32 %v321_v24, %v321_v24  ;;  %v258_v35 = vmul.f32 %v327_v25, %v327_v25 }
  0xe8   :  { %v323_v28 = vpop.f32.mrf.mxu0  ;;  %v329_v29 = vpop.f32.mrf.mxu1 }
  0xe9   :  { %v324_v30 = vadd.f32 %v323_v28, %v322_v26  ;;  %v330_v31 = vadd.f32 %v329_v29, %v328_v27 }
  0xeb   :  { %244 = vst [vmem:[%s474_s2 + $0x8] sm:$0xff] %v324_v30  ;;  %v247_v33 = vadd.f32 %v324_v30, %v321_v24  ;;  %v257_v34 = vmul.f32 %v324_v30, %v324_v30  ;;  %246 = vst [vmem:[%s474_s2 + $0x18] sm:$0xff] %v330_v31  ;;  %v259_v39 = vmul.f32 %v330_v31, %v330_v31 }
  0xed   :  { %v260_v36 = vadd.f32 %v257_v34, %v256_v32  ;;  %v248_v37 = vadd.f32 %v327_v25, %v247_v33 }
  0xef   :  { %v249_v38 = vadd.f32 %v330_v31, %v248_v37  ;;  %v261_v40 = vadd.f32 %v260_v36, %v258_v35 }
  0xf1   :  { %v250_v41 = vrot.slane %v249_v38, 4  ;;  %v262_v42 = vadd.f32 %v261_v40, %v259_v39 }
  0xf3   :  { %v251_v43 = vadd.f32 %v250_v41, %v249_v38  ;;  %v263_v44 = vrot.slane %v262_v42, 4 }
  0xf5   :  { %v252_v45 = vrot.slane %v251_v43, 2  ;;  %v264_v46 = vadd.f32 %v263_v44, %v262_v42 }
  0xf7   :  { %v253_v47 = vadd.f32 %v252_v45, %v251_v43  ;;  %v265_v48 = vrot.slane %v264_v46, 2 }
  0xf9   :  { %v254_v49 = vrot.slane %v253_v47, 1  ;;  %v266_v50 = vadd.f32 %v265_v48, %v264_v46 }
  0xfb   :  { %v255_v51 = vadd.f32 %v254_v49, %v253_v47  ;;  %v267_v52 = vrot.slane %v266_v50, 1 }
  0xfd   :  { %v268_v53 = vadd.f32 %v267_v52, %v266_v50  ;;  %269 = vst [vmem:[%s475_s3] sm:$0xff] %v255_v51 }
  0xff   :  { %270 = vst [vmem:[%s476_s4] sm:$0xff] %v268_v53 }

// kernel: resnet_generator_forward.25
= control target key start
LH: loop header
LB: loop body
LE: loop exit
PB: predicated region body
PF: predicated region fallthrough
CT: control target
= control target key end

     0   :  { %s891_s15 = smov 0   ;;  %s893_s16 = smov 0   ;;  %s993_s0 = inlined_call_operand.vmem [shape: bf16[32,384], index: 0, kind: input, shape index: {}]   ;;  %s994_s1 = inlined_call_operand.vmem [shape: bf16[384,128], index: 1, kind: input, shape index: {}]   ;;  %s995_s2 = inlined_call_operand.vmem [shape: f32[32,128], index: 2, kind: output, shape index: {0}]   ;;  %s996_s3 = inlined_call_operand.vmem [shape: f32[8,128], index: 3, kind: output, shape index: {1}]   ;;  %s997_s4 = inlined_call_operand.vmem [shape: f32[8,128], index: 4, kind: output, shape index: {2}]  }
   0x1   :  { %s895_s17 = smov 0   ;;  %s897_s18 = smov 0  }
   0x2   :  { %s899_s19 = smov 0  }
   0x3 LB: > { %s27_s20 = sadd.s32 1, %s859_s18  ;;  %p50_p1 = scmp.ne.s32.totalorder %s851_s16, %s847_s15  ;;  %s863_s19 = sphi %s899_s19, %s15_s19   ;;  %s859_s18 = sphi %s897_s18, %s1001_s18   ;;  %s855_s17 = sphi %s895_s17, %s1000_s17   ;;  %s851_s16 = sphi %s893_s16, %s999_s16   ;;  %s847_s15 = sphi %s891_s15, %s998_s15  }
   0x4   : > { %p28_p0 = scmp.ge.s32.totalorder %s27_s20, 3  ;;  %p51_p2 = scmp.eq.s32.totalorder %s863_s19, 0 }
   0x5   : > { %s43_s22 = sadd.s32 1, %s851_s16  ;;  %p719_p5 = scmp.ge.s32.totalorder %s863_s19, 3 }
   0x6   : > { %s1003_s20 = smov (%p28_p0, %s27_s20), 0  ;;  %p52_p3 = por %p51_p2, %p50_p1 }
   0x7   : > { %s39_s21 = ssub.s32 %s859_s18, %s1003_s20  ;;  %188 = sbr.rel (%p719_p5) target bundleno = 18 (0x12), region = 16 }
   0x8   : > { %p41_p4 = scmp.eq.s32.totalorder %s39_s21, 0 }
   0xa   : > { %s926_s23 = scalar_select %p41_p4, %s851_s16, %s43_s22  }
   0xc   : > { %191 = sbr.rel (!%p52_p3) target bundleno = 18 (0x12), region = 20  ;;  %s193_s24 = sand.u32 (%p52_p3), 1, %s851_s16  }
   0xd   : > { %s721_s25 = sshll.u32 (%p52_p3), %s859_s18, 2  ;;  %s720_s26 = sshll.u32 (%p52_p3), %s193_s24, 4 }
   0xe   : > { %s200_s29 = scalar_lea.vmem (%p52_p3), %s993_s0, %s721_s25  ;;  %s195_s30 = scalar_lea.vmem (%p52_p3), [#allocation3], %s720_s26 }
   0xf   : > { %v217_v0 = vld [vmem:[%s200_s29] sm:$0xf] (%p52_p3)  ;;  %v219_v1 = vld [vmem:[%s200_s29 + $0xc] sm:$0xf] (%p52_p3)  ;;  %v221_v2 = vld [vmem:[%s200_s29 + $0x18] sm:$0xf] (%p52_p3) }
  0x10   : > { %218 = vst [vmem:[%s195_s30] sm:$0xf] (%p52_p3), %v217_v0  ;;  %220 = vst [vmem:[%s195_s30 + $0x4] sm:$0xf] (%p52_p3), %v219_v1  ;;  %v223_v3 = vld [vmem:[%s200_s29 + $0x24] sm:$0xf] (%p52_p3) }
  0x11   : > { %222 = vst [vmem:[%s195_s30 + $0x8] sm:$0xf] %v221_v2  ;;  %224 = vst [vmem:[%s195_s30 + $0xc] sm:$0xf] %v223_v3 }
  0x12 PF: > { %p722_p6 = scmp.ge.s32.totalorder %s863_s19, 1  ;;  %p267_p7 = scmp.lt.s32.totalorder %s863_s19, 4 }
  0x14   : > { %p268_p8 = pnand %p722_p6, %p267_p7 }
  0x15   : > { %s274_s5 = sand.u32 (!%p268_p8), 1, %s847_s15   ;;  %s724_s6 = sshll.u32 (!%p268_p8), %s855_s17, 4 }
  0x16   : > { %271 = sbr.rel (%p268_p8) target bundleno = 298 (0x12a), region = 65  ;;  %s938_s7 = sshll.u32 (!%p268_p8), %s274_s5, 4 }
  0x17   : > { %p326_p9 = scmp.lt.s32.totalorder (!%p268_p8), %s724_s6, 47  ;;  %s276_s12 = scalar_lea.vmem (!%p268_p8), [#allocation3], %s938_s7 }
  0x18   : > { %p726_p10 = scmp.ne.s32.totalorder (!%p268_p8), %s855_s17, 0 }
  0x1b   : > { %s1005_s6 = smov (!%p326_p9, %s724_s6), 47  ;;  %361 = sbr.rel (%p726_p10) target bundleno = 35 (0x23), region = 73 }
  0x1c   : > { %s725_s8 = sshll.u32 %s1005_s6, 2 }
  0x1d   : > { %s943_s11 = scalar_lea.vmem %s994_s1, %s725_s8 }
  0x20   : > { %v865_v4 = vmov 0.0  }
  0x21   : > { %362 = vst [vmem:[#allocation2 + $0x10] sm:$0xff] %v865_v4  ;;  %363 = vst [vmem:[#allocation2] sm:$0xff] %v865_v4 }
  0x22   : > { %364 = vst [vmem:[#allocation2 + $0x18] sm:$0xff] %v865_v4  ;;  %365 = vst [vmem:[#allocation2 + $0x8] sm:$0xff] %v865_v4 }
  0x23 PF: > { %v815_v5 = vld [vmem:[%s943_s11 + $0x38] sm:$0xff]   ;;  %v816_v6 = vld [vmem:[%s943_s11 + $0x30] sm:$0xff]   ;;  %v817_v7 = vld [vmem:[%s943_s11 + $0x28] sm:$0xff]   ;;  %p737_p11 = scmp.ne.s32.totalorder %s855_s17, 2 }
  0x24   : > { %754 = vmatprep.subr.bf16.mxu0 %v815_v5  ;;  %v818_v8 = vld [vmem:[%s943_s11 + $0x20] sm:$0xff]   ;;  %v819_v10 = vld [vmem:[%s943_s11 + $0x18] sm:$0xff]   ;;  %v820_v11 = vld [vmem:[%s943_s11 + $0x10] sm:$0xff]  }
  0x25   : > { %755 = vmatpush3.bf16.msra.mxu0 %v815_v5  ;;  %v823_v9 = vld [vmem:[%s276_s12] sm:$0xff]   ;;  %v821_v12 = vld [vmem:[%s943_s11 + $0x8] sm:$0xff]  }
  0x26   : > { %756 = vmatprep.subr.bf16.mxu0 %v816_v6  ;;  %770 = vmatprep.mubr.bf16.mxu0 %v823_v9  ;;  %v822_v13 = vld [vmem:[%s943_s11] sm:$0xff]   ;;  %v824_v14 = vld [vmem:[%s276_s12 + $0x8] sm:$0xff]  }
  0x28   : > { %v366_v17 = vld [vmem:[#allocation2 + $0x10] sm:$0xff]  ;;  %v367_v23 = vld [vmem:[#allocation2] sm:$0xff] }
  0x29   : > { %757 = vmatpush3.bf16.msra.mxu0 %v816_v6  ;;  %v368_v15 = vld [vmem:[#allocation2 + $0x18] sm:$0xff]  ;;  %v369_v20 = vld [vmem:[#allocation2 + $0x8] sm:$0xff] }
  0x2a   : > { %758 = vmatprep.subr.bf16.mxu0 %v817_v7 }
  0x2d   : > { %759 = vmatpush3.bf16.msra.mxu0 %v817_v7 }
  0x2e   : > { %760 = vmatprep.subr.bf16.mxu0 %v818_v8 }
  0x31   : > { %761 = vmatpush3.bf16.msra.mxu0 %v818_v8 }
  0x32   : > { %762 = vmatprep.subr.bf16.mxu0 %v819_v10 }
  0x35   : > { %763 = vmatpush3.bf16.msra.mxu0 %v819_v10 }
  0x36   : > { %764 = vmatprep.subr.bf16.mxu0 %v820_v11 }
  0x39   : > { %765 = vmatpush3.bf16.msra.mxu0 %v820_v11 }
  0x3a   : > { %766 = vmatprep.subr.bf16.mxu0 %v821_v12 }
  0x3d   : > { %767 = vmatpush3.bf16.msra.mxu0 %v821_v12 }
  0x3e   : > { %768 = vmatprep.subr.bf16.mxu0 %v822_v13 }
  0x41   : > { %769 = vmatpush3.bf16.msra.mxu0 %v822_v13 }
  0x44   : > { %771 = vmatmul.mubr.bf16.vlgmr.msra.gmra.mxu0 %v824_v14 }
 0x104   : > { %v772_v16 = vpop.f32.mrf.mxu0 }
 0x105   : > { %v501_v18 = vadd.f32 %v772_v16, %v368_v15 }
 0x106   : > { %v484_v19 = vpop.f32.mrf.mxu0 }
 0x107   : > { %505 = vst [vmem:[#allocation2 + $0x18] sm:$0xff] %v501_v18  ;;  %v499_v21 = vadd.f32 %v484_v19, %v366_v17 }
 0x108   : > { %v773_v22 = vpop.f32.mrf.mxu0 }
 0x109   : > { %503 = vst [vmem:[#allocation2 + $0x10] sm:$0xff] %v499_v21  ;;  %v502_v24 = vadd.f32 %v773_v22, %v369_v20  ;;  %510 = sbr.rel (%p737_p11) target bundleno = 298 (0x12a), region = 77 }
 0x10a   : > { %v487_v25 = vpop.f32.mrf.mxu0 }
 0x10b   : > { %506 = vst [vmem:[#allocation2 + $0x8] sm:$0xff] %v502_v24  ;;  %v500_v26 = vadd.f32 %v487_v25, %v367_v23 }
 0x10d   : > { %504 = vst [vmem:[#allocation2] sm:$0xff] %v500_v26 }
 0x10e   : > { %v513_v29 = vld [vmem:[#allocation2 + $0x18] sm:$0xff] }
 0x10f   : > { %517 = vst [vmem:[%s995_s2 + $0x10] sm:$0xff] %v513_v29  ;;  %v530_v33 = vmul.f32 %v513_v29, %v513_v29 }
 0x110   : > { %v511_v27 = vld [vmem:[#allocation2 + $0x10] sm:$0xff] }
 0x111   : > { %515 = vst [vmem:[%s995_s2] sm:$0xff] %v511_v27  ;;  %v528_v30 = vmul.f32 %v511_v27, %v511_v27 }
 0x112   : > { %v514_v34 = vld [vmem:[#allocation2 + $0x8] sm:$0xff] }
 0x113   : > { %518 = vst [vmem:[%s995_s2 + $0x18] sm:$0xff] %v514_v34  ;;  %v531_v37 = vmul.f32 %v514_v34, %v514_v34 }
 0x114   : > { %v512_v28 = vld [vmem:[#allocation2] sm:$0xff] }
 0x115   : > { %516 = vst [vmem:[%s995_s2 + $0x8] sm:$0xff] %v512_v28  ;;  %v519_v31 = vadd.f32 %v512_v28, %v511_v27  ;;  %v529_v32 = vmul.f32 %v512_v28, %v512_v28 }
 0x117   : > { %v532_v35 = vadd.f32 %v529_v32, %v528_v30  ;;  %v520_v36 = vadd.f32 %v519_v31, %v513_v29 }
 0x119   : > { %v533_v38 = vadd.f32 %v532_v35, %v530_v33  ;;  %v521_v39 = vadd.f32 %v520_v36, %v514_v34 }
 0x11b   : > { %v522_v40 = vrot.slane %v521_v39, 4  ;;  %v534_v41 = vadd.f32 %v533_v38, %v531_v37 }
 0x11d   : > { %v523_v42 = vadd.f32 %v522_v40, %v521_v39  ;;  %v535_v43 = vrot.slane %v534_v41, 4 }
 0x11f   : > { %v524_v44 = vrot.slane %v523_v42, 2  ;;  %v536_v45 = vadd.f32 %v535_v43, %v534_v41 }
 0x121   : > { %v525_v46 = vadd.f32 %v524_v44, %v523_v42  ;;  %v537_v47 = vrot.slane %v536_v45, 2 }
 0x123   : > { %v526_v48 = vrot.slane %v525_v46, 1  ;;  %v538_v49 = vadd.f32 %v537_v47, %v536_v45 }
 0x125   : > { %v527_v50 = vadd.f32 %v526_v48, %v525_v46  ;;  %v539_v51 = vrot.slane %v538_v49, 1 }
 0x127   : > { %541 = vst [vmem:[%s996_s3] sm:$0xff] %v527_v50  ;;  %v540_v52 = vadd.f32 %v539_v51, %v538_v49 }
 0x129   : > { %542 = vst [vmem:[%s997_s4] sm:$0xff] %v540_v52 }
 0x12a PF: > { %s15_s19 = sadd.s32 1, %s863_s19   ;;  %s998_s15 = smov %s851_s16 }
 0x12b   : > { %p12_p12 = scmp.ge.s32.totalorder %s15_s19, 5   ;;  %s999_s16 = smov %s926_s23 }
 0x12c   : > { %s1000_s17 = smov %s859_s18  ;;  %s1001_s18 = smov %s1003_s20 }
 0x12d   :  { %14 = sbr.rel (!%p12_p12) target bundleno = 3 (0x3), region = 139 }

// kernel: resnet_generator_forward.26
= control target key start
LH: loop header
LB: loop body
LE: loop exit
PB: predicated region body
PF: predicated region fallthrough
CT: control target
= control target key end

     0   :  { %s100_s0 = inlined_call_operand.vmem [shape: f32[32,128], index: 0, kind: input, shape index: {}]   ;;  %s101_s1 = inlined_call_operand.vmem [shape: f32[1,128], index: 1, kind: input, shape index: {}]   ;;  %s102_s2 = inlined_call_operand.vmem [shape: f32[1,128], index: 2, kind: input, shape index: {}]   ;;  %s103_s3 = inlined_call_operand.vmem [shape: f32[32,128], index: 3, kind: output, shape index: {}]  }
   0x1   :  { %v14_v0 = vld [vmem:[%s100_s0] sm:$0xff]  ;;  %v15_v4 = vld [vmem:[%s100_s0 + $0x8] sm:$0xff]  ;;  %v16_v5 = vld [vmem:[%s100_s0 + $0x10] sm:$0xff] }
   0x2   :  { %v48_v1 = vld [vmem:[%s101_s1] ss:$0 sm:$0xff]  ;;  %v17_v6 = vld [vmem:[%s100_s0 + $0x18] sm:$0xff] }
   0x3   :  { %v49_v2 = vld [vmem:[%s102_s2] ss:$0 sm:$0xff]  ;;  %v25_v3 = vmul.f32 %v48_v1, %v14_v0  ;;  %v26_v7 = vmul.f32 %v48_v1, %v15_v4  ;;  %v27_v8 = vmul.f32 %v48_v1, %v16_v5  ;;  %v28_v9 = vmul.f32 %v48_v1, %v17_v6 }
   0x5   :  { %v36_v10 = vadd.f32 %v49_v2, %v25_v3  ;;  %v37_v11 = vadd.f32 %v49_v2, %v26_v7  ;;  %v38_v12 = vadd.f32 %v49_v2, %v27_v8  ;;  %v39_v13 = vadd.f32 %v49_v2, %v28_v9 }
   0x7   :  { %40 = vst [vmem:[%s103_s3] sm:$0xff] %v36_v10  ;;  %41 = vst [vmem:[%s103_s3 + $0x8] sm:$0xff] %v37_v11 }
   0x8   :  { %42 = vst [vmem:[%s103_s3 + $0x10] sm:$0xff] %v38_v12  ;;  %43 = vst [vmem:[%s103_s3 + $0x18] sm:$0xff] %v39_v13 }

// kernel: resnet_generator_forward.28
= control target key start
LH: loop header
LB: loop body
LE: loop exit
PB: predicated region body
PF: predicated region fallthrough
CT: control target
= control target key end

     0   :  { %s128_s0 = inlined_call_operand.vmem [shape: f32[32,128], index: 0, kind: input, shape index: {}]   ;;  %s129_s1 = inlined_call_operand.vmem [shape: f32[1,128], index: 1, kind: input, shape index: {}]   ;;  %s130_s2 = inlined_call_operand.vmem [shape: f32[1,128], index: 2, kind: input, shape index: {}]   ;;  %s131_s3 = inlined_call_operand.vmem [shape: f32[32,128], index: 3, kind: input, shape index: {}]   ;;  %s132_s4 = inlined_call_operand.vmem [shape: f32[32,128], index: 4, kind: output, shape index: {}]  }
   0x1   :  { %v17_v0 = vld [vmem:[%s128_s0] sm:$0xff]  ;;  %v18_v4 = vld [vmem:[%s128_s0 + $0x8] sm:$0xff]  ;;  %v19_v7 = vld [vmem:[%s128_s0 + $0x10] sm:$0xff] }
   0x2   :  { %v59_v1 = vld [vmem:[%s129_s1] ss:$0 sm:$0xff]  ;;  %v20_v8 = vld [vmem:[%s128_s0 + $0x18] sm:$0xff]  ;;  %v44_v10 = vld [vmem:[%s131_s3 + $0x8] sm:$0xff] }
   0x3   :  { %v60_v2 = vld [vmem:[%s130_s2] ss:$0 sm:$0xff]  ;;  %v28_v3 = vmul.f32 %v59_v1, %v17_v0  ;;  %v29_v6 = vmul.f32 %v59_v1, %v18_v4  ;;  %v30_v11 = vmul.f32 %v59_v1, %v19_v7  ;;  %v31_v12 = vmul.f32 %v59_v1, %v20_v8  ;;  %v45_v14 = vld [vmem:[%s131_s3 + $0x10] sm:$0xff]  ;;  %v46_v15 = vld [vmem:[%s131_s3 + $0x18] sm:$0xff] }
   0x4   :  { %v43_v5 = vld [vmem:[%s131_s3] sm:$0xff] }
   0x5   :  { %v39_v9 = vadd.f32 %v60_v2, %v28_v3  ;;  %v40_v13 = vadd.f32 %v60_v2, %v29_v6  ;;  %v41_v17 = vadd.f32 %v60_v2, %v30_v11  ;;  %v42_v18 = vadd.f32 %v60_v2, %v31_v12 }
   0x7   :  { %v47_v16 = vadd.f32 %v43_v5, %v39_v9  ;;  %v48_v19 = vadd.f32 %v44_v10, %v40_v13  ;;  %v49_v20 = vadd.f32 %v45_v14, %v41_v17  ;;  %v50_v21 = vadd.f32 %v46_v15, %v42_v18 }
   0x9   :  { %51 = vst [vmem:[%s132_s4] sm:$0xff] %v47_v16  ;;  %52 = vst [vmem:[%s132_s4 + $0x8] sm:$0xff] %v48_v19 }
   0xa   :  { %53 = vst [vmem:[%s132_s4 + $0x10] sm:$0xff] %v49_v20  ;;  %54 = vst [vmem:[%s132_s4 + $0x18] sm:$0xff] %v50_v21 }

// kernel: resnet_generator_forward.33
= control target key start
LH: loop header
LB: loop body
LE: loop exit
PB: predicated region body
PF: predicated region fallthrough
CT: control target
= control target key end

     0   :  { %s1189_s15 = smov 0   ;;  %s1191_s16 = smov 0   ;;  %s1348_s0 = inlined_call_operand.vmem [shape: bf16[128,384], index: 0, kind: input, shape index: {}]   ;;  %s1349_s1 = inlined_call_operand.vmem [shape: bf16[384,128], index: 1, kind: input, shape index: {}]   ;;  %s1350_s2 = inlined_call_operand.vmem [shape: f32[128,128], index: 2, kind: output, shape index: {0}]   ;;  %s1351_s3 = inlined_call_operand.vmem [shape: f32[8,128], index: 3, kind: output, shape index: {1}]   ;;  %s1352_s4 = inlined_call_operand.vmem [shape: f32[8,128], index: 4, kind: output, shape index: {2}]  }
   0x1   :  { %s1193_s17 = smov 0   ;;  %s1195_s18 = smov 0  }
   0x2   :  { %s1197_s19 = smov 0  }
   0x3 LB: > { %s27_s20 = sadd.s32 1, %s1157_s18  ;;  %p50_p1 = scmp.ne.s32.totalorder %s1149_s16, %s1145_s15  ;;  %s1161_s19 = sphi %s1197_s19, %s15_s19   ;;  %s1157_s18 = sphi %s1195_s18, %s1356_s18   ;;  %s1153_s17 = sphi %s1193_s17, %s1355_s17   ;;  %s1149_s16 = sphi %s1191_s16, %s1354_s16   ;;  %s1145_s15 = sphi %s1189_s15, %s1353_s15  }
   0x4   : > { %p28_p0 = scmp.ge.s32.totalorder %s27_s20, 3  ;;  %p51_p2 = scmp.eq.s32.totalorder %s1161_s19, 0 }
   0x5   : > { %s43_s22 = sadd.s32 1, %s1149_s16  ;;  %p971_p5 = scmp.ge.s32.totalorder %s1161_s19, 3 }
   0x6   : > { %s1358_s20 = smov (%p28_p0, %s27_s20), 0  ;;  %p52_p3 = por %p51_p2, %p50_p1 }
   0x7   : > { %s39_s21 = ssub.s32 %s1157_s18, %s1358_s20  ;;  %188 = sbr.rel (%p971_p5) target bundleno = 26 (0x1a), region = 16 }
   0x8   : > { %p41_p4 = scmp.eq.s32.totalorder %s39_s21, 0 }
   0xa   : > { %s1224_s23 = scalar_select %p41_p4, %s1149_s16, %s43_s22  }
   0xc   : > { %191 = sbr.rel (!%p52_p3) target bundleno = 26 (0x1a), region = 20  ;;  %s193_s24 = sand.u32 (%p52_p3), 1, %s1149_s16  }
   0xd   : > { %s973_s25 = sshll.u32 (%p52_p3), %s1157_s18, 2  ;;  %s972_s26 = sshll.u32 (%p52_p3), %s193_s24, 6 }
   0xe   : > { %s1232_s29 = scalar_lea.vmem (%p52_p3), %s1348_s0, %s973_s25  ;;  %s195_s30 = scalar_lea.vmem (%p52_p3), [#allocation3], %s972_s26 }
   0xf   : > { %v217_v0 = vld [vmem:[%s1232_s29] sm:$0xf] (%p52_p3)  ;;  %v219_v1 = vld [vmem:[%s1232_s29 + $0xc] sm:$0xf] (%p52_p3)  ;;  %v221_v2 = vld [vmem:[%s1232_s29 + $0x18] sm:$0xf] (%p52_p3) }
  0x10   : > { %218 = vst [vmem:[%s195_s30] sm:$0xf] (%p52_p3), %v217_v0  ;;  %220 = vst [vmem:[%s195_s30 + $0x4] sm:$0xf] (%p52_p3), %v219_v1  ;;  %v223_v3 = vld [vmem:[%s1232_s29 + $0x24] sm:$0xf] (%p52_p3) }
  0x11   : > { %v225_v4 = vld [vmem:[%s1232_s29 + $0x30] sm:$0xf]  ;;  %222 = vst [vmem:[%s195_s30 + $0x8] sm:$0xf] %v221_v2  ;;  %224 = vst [vmem:[%s195_s30 + $0xc] sm:$0xf] %v223_v3 }
  0x12   : > { %226 = vst [vmem:[%s195_s30 + $0x10] sm:$0xf] %v225_v4  ;;  %v227_v5 = vld [vmem:[%s1232_s29 + $0x3c] sm:$0xf]  ;;  %v229_v6 = vld [vmem:[%s1232_s29 + $0x48] sm:$0xf] }
  0x13   : > { %v231_v7 = vld [vmem:[%s1232_s29 + $0x54] sm:$0xf]  ;;  %228 = vst [vmem:[%s195_s30 + $0x14] sm:$0xf] %v227_v5  ;;  %230 = vst [vmem:[%s195_s30 + $0x18] sm:$0xf] %v229_v6 }
  0x14   : > { %232 = vst [vmem:[%s195_s30 + $0x1c] sm:$0xf] %v231_v7  ;;  %v233_v8 = vld [vmem:[%s1232_s29 + $0x60] sm:$0xf]  ;;  %v235_v9 = vld [vmem:[%s1232_s29 + $0x6c] sm:$0xf] }
  0x15   : > { %v237_v10 = vld [vmem:[%s1232_s29 + $0x78] sm:$0xf]  ;;  %234 = vst [vmem:[%s195_s30 + $0x20] sm:$0xf] %v233_v8  ;;  %236 = vst [vmem:[%s195_s30 + $0x24] sm:$0xf] %v235_v9 }
  0x16   : > { %238 = vst [vmem:[%s195_s30 + $0x28] sm:$0xf] %v237_v10  ;;  %v239_v11 = vld [vmem:[%s1232_s29 + $0x84] sm:$0xf]  ;;  %v241_v12 = vld [vmem:[%s1232_s29 + $0x90] sm:$0xf] }
  0x17   : > { %v243_v13 = vld [vmem:[%s1232_s29 + $0x9c] sm:$0xf]  ;;  %240 = vst [vmem:[%s195_s30 + $0x2c] sm:$0xf] %v239_v11  ;;  %242 = vst [vmem:[%s195_s30 + $0x30] sm:$0xf] %v241_v12 }
  0x18   : > { %244 = vst [vmem:[%s195_s30 + $0x34] sm:$0xf] %v243_v13  ;;  %v245_v14 = vld [vmem:[%s1232_s29 + $0xa8] sm:$0xf]  ;;  %v247_v15 = vld [vmem:[%s1232_s29 + $0xb4] sm:$0xf] }
  0x19   : > { %246 = vst [vmem:[%s195_s30 + $0x38] sm:$0xf] %v245_v14  ;;  %248 = vst [vmem:[%s195_s30 + $0x3c] sm:$0xf] %v247_v15 }
  0x1a PF: > { %p974_p6 = scmp.ge.s32.totalorder %s1161_s19, 1  ;;  %p315_p7 = scmp.lt.s32.totalorder %s1161_s19, 4 }
  0x1c   : > { %p316_p8 = pnand %p974_p6, %p315_p7 }
  0x1d   : > { %s322_s5 = sand.u32 (!%p316_p8), 1, %s1145_s15   ;;  %s976_s6 = sshll.u32 (!%p316_p8), %s1153_s17, 4 }
  0x1e   : > { %319 = sbr.rel (%p316_p8) target bundleno = 338 (0x152), region = 65  ;;  %s975_s7 = sshll.u32 (!%p316_p8), %s322_s5, 6 }
  0x1f   : > { %p374_p9 = scmp.lt.s32.totalorder (!%p316_p8), %s976_s6, 47  ;;  %s1259_s12 = scalar_lea.vmem (!%p316_p8), [#allocation3], %s975_s7 }
  0x20   : > { %p978_p10 = scmp.ne.s32.totalorder (!%p316_p8), %s1153_s17, 0 }
  0x23   : > { %s1360_s6 = smov (!%p374_p9, %s976_s6), 47  ;;  %409 = sbr.rel (%p978_p10) target bundleno = 49 (0x31), region = 73 }
  0x24   : > { %s977_s8 = sshll.u32 %s1360_s6, 2 }
  0x25   : > { %s1257_s11 = scalar_lea.vmem %s1349_s1, %s977_s8 }
  0x28   : > { %v1163_v16 = vmov 0.0  }
  0x29   : > { %410 = vst [vmem:[#allocation2 + $0x30] sm:$0xff] %v1163_v16  ;;  %411 = vst [vmem:[#allocation2] sm:$0xff] %v1163_v16 }
  0x2a   : > { %412 = vst [vmem:[#allocation2 + $0x58] sm:$0xff] %v1163_v16  ;;  %413 = vst [vmem:[#allocation2 + $0x18] sm:$0xff] %v1163_v16 }
  0x2b   : > { %414 = vst [vmem:[#allocation2 + $0x50] sm:$0xff] %v1163_v16  ;;  %415 = vst [vmem:[#allocation2 + $0x68] sm:$0xff] %v1163_v16 }
  0x2c   : > { %416 = vst [vmem:[#allocation2 + $0x8] sm:$0xff] %v1163_v16  ;;  %417 = vst [vmem:[#allocation2 + $0x48] sm:$0xff] %v1163_v16 }
  0x2d   : > { %418 = vst [vmem:[#allocation2 + $0x40] sm:$0xff] %v1163_v16  ;;  %419 = vst [vmem:[#allocation2 + $0x20] sm:$0xff] %v1163_v16 }
  0x2e   : > { %420 = vst [vmem:[#allocation2 + $0x10] sm:$0xff] %v1163_v16  ;;  %421 = vst [vmem:[#allocation2 + $0x38] sm:$0xff] %v1163_v16 }
  0x2f   : > { %422 = vst [vmem:[#allocation2 + $0x60] sm:$0xff] %v1163_v16  ;;  %423 = vst [vmem:[#allocation2 + $0x70] sm:$0xff] %v1163_v16 }
  0x30   : > { %424 = vst [vmem:[#allocation2 + $0x78] sm:$0xff] %v1163_v16  ;;  %425 = vst [vmem:[#allocation2 + $0x28] sm:$0xff] %v1163_v16 }
  0x31 PF: > { %v1107_v17 = vld [vmem:[%s1257_s11 + $0x38] sm:$0xff]   ;;  %v1108_v18 = vld [vmem:[%s1257_s11 + $0x30] sm:$0xff]   ;;  %v1109_v19 = vld [vmem:[%s1257_s11 + $0x28] sm:$0xff]   ;;  %p995_p11 = scmp.ne.s32.totalorder %s1153_s17, 2 }
  0x32   : > { %1018 = vmatprep.subr.bf16.mxu0 %v1107_v17  ;;  %1050 = vmatprep.subr.bf16.mxu1 %v1107_v17  ;;  %v1110_v20 = vld [vmem:[%s1257_s11 + $0x20] sm:$0xff]   ;;  %v1111_v23 = vld [vmem:[%s1257_s11 + $0x18] sm:$0xff]   ;;  %v1112_v24 = vld [vmem:[%s1257_s11 + $0x10] sm:$0xff]  }
  0x33   : > { %1019 = vmatpush3.bf16.msra.mxu0 %v1107_v17  ;;  %1058 = vmatpush3.bf16.msra.mxu1 %v1107_v17  ;;  %v1115_v21 = vld [vmem:[%s1259_s12] sm:$0xff]   ;;  %v1113_v25 = vld [vmem:[%s1257_s11 + $0x8] sm:$0xff]   ;;  %v1119_v29 = vld [vmem:[%s1259_s12 + $0x10] sm:$0xff]  }
  0x34   : > { %1020 = vmatprep.subr.bf16.mxu0 %v1108_v18  ;;  %1051 = vmatprep.subr.bf16.mxu1 %v1108_v18  ;;  %v1116_v22 = vld [vmem:[%s1259_s12 + $0x20] sm:$0xff]   ;;  %v1117_v27 = vld [vmem:[%s1259_s12 + $0x8] sm:$0xff]   ;;  %v1120_v30 = vld [vmem:[%s1259_s12 + $0x30] sm:$0xff]  }
  0x35   : > { %1034 = vmatprep.mubr.bf16.mxu0 %v1115_v21  ;;  %1042 = vmatprep.mubr.bf16.mxu1 %v1116_v22  ;;  %v1114_v26 = vld [vmem:[%s1257_s11] sm:$0xff]   ;;  %v1118_v28 = vld [vmem:[%s1259_s12 + $0x28] sm:$0xff]   ;;  %v1121_v31 = vld [vmem:[%s1259_s12 + $0x18] sm:$0xff]  }
  0x36   : > { %v1122_v32 = vld [vmem:[%s1259_s12 + $0x38] sm:$0xff]   ;;  %v436_v34 = vld [vmem:[#allocation2 + $0x10] sm:$0xff]  ;;  %v434_v38 = vld [vmem:[#allocation2 + $0x40] sm:$0xff] }
  0x37   : > { %1021 = vmatpush3.bf16.msra.mxu0 %v1108_v18  ;;  %1059 = vmatpush3.bf16.msra.mxu1 %v1108_v18  ;;  %v428_v33 = vld [vmem:[#allocation2 + $0x58] sm:$0xff]  ;;  %v426_v37 = vld [vmem:[#allocation2 + $0x30] sm:$0xff]  ;;  %v427_v49 = vld [vmem:[#allocation2] sm:$0xff] }
  0x38   : > { %1022 = vmatprep.subr.bf16.mxu0 %v1109_v19  ;;  %1052 = vmatprep.subr.bf16.mxu1 %v1109_v19  ;;  %v429_v43 = vld [vmem:[#allocation2 + $0x18] sm:$0xff]  ;;  %v435_v50 = vld [vmem:[#allocation2 + $0x20] sm:$0xff]  ;;  %v432_v55 = vld [vmem:[#allocation2 + $0x8] sm:$0xff] }
  0x39   : > { %v437_v44 = vld [vmem:[#allocation2 + $0x38] sm:$0xff]  ;;  %v430_v61 = vld [vmem:[#allocation2 + $0x50] sm:$0xff]  ;;  %v438_v62 = vld [vmem:[#allocation2 + $0x60] sm:$0xff] }
  0x3a   : > { %v440_v56 = vld [vmem:[#allocation2 + $0x78] sm:$0xff]  ;;  %v433_v3 = vld [vmem:[#allocation2 + $0x48] sm:$0xff]  ;;  %v439_v10 = vld [vmem:[#allocation2 + $0x70] sm:$0xff] }
  0x3b   : > { %1023 = vmatpush3.bf16.msra.mxu0 %v1109_v19  ;;  %1060 = vmatpush3.bf16.msra.mxu1 %v1109_v19  ;;  %v441_v4 = vld [vmem:[#allocation2 + $0x28] sm:$0xff] }
  0x3c   : > { %1024 = vmatprep.subr.bf16.mxu0 %v1110_v20  ;;  %1053 = vmatprep.subr.bf16.mxu1 %v1110_v20  ;;  %v431_v9 = vld [vmem:[#allocation2 + $0x68] sm:$0xff] }
  0x3f   : > { %1025 = vmatpush3.bf16.msra.mxu0 %v1110_v20  ;;  %1061 = vmatpush3.bf16.msra.mxu1 %v1110_v20 }
  0x40   : > { %1026 = vmatprep.subr.bf16.mxu0 %v1111_v23  ;;  %1054 = vmatprep.subr.bf16.mxu1 %v1111_v23 }
  0x43   : > { %1027 = vmatpush3.bf16.msra.mxu0 %v1111_v23  ;;  %1062 = vmatpush3.bf16.msra.mxu1 %v1111_v23 }
  0x44   : > { %1028 = vmatprep.subr.bf16.mxu0 %v1112_v24  ;;  %1055 = vmatprep.subr.bf16.mxu1 %v1112_v24 }
  0x47   : > { %1029 = vmatpush3.bf16.msra.mxu0 %v1112_v24  ;;  %1063 = vmatpush3.bf16.msra.mxu1 %v1112_v24 }
  0x48   : > { %1030 = vmatprep.subr.bf16.mxu0 %v1113_v25  ;;  %1056 = vmatprep.subr.bf16.mxu1 %v1113_v25 }
  0x4b   : > { %1031 = vmatpush3.bf16.msra.mxu0 %v1113_v25  ;;  %1064 = vmatpush3.bf16.msra.mxu1 %v1113_v25 }
  0x4c   : > { %1032 = vmatprep.subr.bf16.mxu0 %v1114_v26  ;;  %1057 = vmatprep.subr.bf16.mxu1 %v1114_v26 }
  0x4f   : > { %1033 = vmatpush3.bf16.msra.mxu0 %v1114_v26  ;;  %1065 = vmatpush3.bf16.msra.mxu1 %v1114_v26 }
  0x52   : > { %1035 = vmatmul.mubr.bf16.vlgmr.msra.gmra.mxu0 %v1117_v27  ;;  %1043 = vmatmul.mubr.bf16.vlgmr.msra.gmra.mxu1 %v1118_v28 }
  0x53   : > { %1038 = vmatprep.mubr.bf16.mxu0 %v1119_v29  ;;  %1046 = vmatprep.mubr.bf16.mxu1 %v1120_v30 }
  0x5a   : > { %1039 = vmatmul.mubr.bf16.gmra.mxu0 %v1121_v31  ;;  %1047 = vmatmul.mubr.bf16.gmra.mxu1 %v1122_v32 }
 0x112   : > { %v1036_v35 = vpop.f32.mrf.mxu0  ;;  %v1044_v36 = vpop.f32.mrf.mxu1 }
 0x113   : > { %v669_v39 = vadd.f32 %v1036_v35, %v428_v33  ;;  %v677_v40 = vadd.f32 %v1044_v36, %v436_v34 }
 0x114   : > { %v604_v41 = vpop.f32.mrf.mxu0  ;;  %v636_v42 = vpop.f32.mrf.mxu1 }
 0x115   : > { %685 = vst [vmem:[#allocation2 + $0x58] sm:$0xff] %v669_v39  ;;  %693 = vst [vmem:[#allocation2 + $0x10] sm:$0xff] %v677_v40  ;;  %v667_v45 = vadd.f32 %v604_v41, %v426_v37  ;;  %v675_v46 = vadd.f32 %v636_v42, %v434_v38 }
 0x116   : > { %v1037_v47 = vpop.f32.mrf.mxu0  ;;  %v1045_v48 = vpop.f32.mrf.mxu1 }
 0x117   : > { %683 = vst [vmem:[#allocation2 + $0x30] sm:$0xff] %v667_v45  ;;  %691 = vst [vmem:[#allocation2 + $0x40] sm:$0xff] %v675_v46  ;;  %v670_v51 = vadd.f32 %v1037_v47, %v429_v43  ;;  %v678_v52 = vadd.f32 %v1045_v48, %v437_v44 }
 0x118   : > { %v607_v53 = vpop.f32.mrf.mxu0  ;;  %v639_v54 = vpop.f32.mrf.mxu1 }
 0x119   : > { %686 = vst [vmem:[#allocation2 + $0x18] sm:$0xff] %v670_v51  ;;  %694 = vst [vmem:[#allocation2 + $0x38] sm:$0xff] %v678_v52  ;;  %v668_v57 = vadd.f32 %v607_v53, %v427_v49  ;;  %v676_v58 = vadd.f32 %v639_v54, %v435_v50 }
 0x11a   : > { %v1040_v59 = vpop.f32.mrf.mxu0  ;;  %v1048_v60 = vpop.f32.mrf.mxu1 }
 0x11b   : > { %684 = vst [vmem:[#allocation2] sm:$0xff] %v668_v57  ;;  %692 = vst [vmem:[#allocation2 + $0x20] sm:$0xff] %v676_v58  ;;  %v673_v63 = vadd.f32 %v1040_v59, %v432_v55  ;;  %v681_v0 = vadd.f32 %v1048_v60, %v440_v56 }
 0x11c   : > { %v620_v1 = vpop.f32.mrf.mxu0  ;;  %v652_v2 = vpop.f32.mrf.mxu1 }
 0x11d   : > { %689 = vst [vmem:[#allocation2 + $0x8] sm:$0xff] %v673_v63  ;;  %697 = vst [vmem:[#allocation2 + $0x78] sm:$0xff] %v681_v0  ;;  %v671_v5 = vadd.f32 %v620_v1, %v430_v61  ;;  %v679_v6 = vadd.f32 %v652_v2, %v438_v62 }
 0x11e   : > { %v1041_v7 = vpop.f32.mrf.mxu0  ;;  %v1049_v8 = vpop.f32.mrf.mxu1 }
 0x11f   : > { %687 = vst [vmem:[#allocation2 + $0x50] sm:$0xff] %v671_v5  ;;  %695 = vst [vmem:[#allocation2 + $0x60] sm:$0xff] %v679_v6  ;;  %v674_v11 = vadd.f32 %v1041_v7, %v433_v3  ;;  %v682_v12 = vadd.f32 %v1049_v8, %v441_v4  ;;  %702 = sbr.rel (%p995_p11) target bundleno = 338 (0x152), region = 77 }
 0x120   : > { %v623_v13 = vpop.f32.mrf.mxu0  ;;  %v655_v14 = vpop.f32.mrf.mxu1 }
 0x121   : > { %690 = vst [vmem:[#allocation2 + $0x48] sm:$0xff] %v674_v11  ;;  %698 = vst [vmem:[#allocation2 + $0x28] sm:$0xff] %v682_v12  ;;  %v672_v15 = vadd.f32 %v623_v13, %v431_v9  ;;  %v680_v16 = vadd.f32 %v655_v14, %v439_v10 }
 0x123   : > { %688 = vst [vmem:[#allocation2 + $0x68] sm:$0xff] %v672_v15  ;;  %696 = vst [vmem:[#allocation2 + $0x70] sm:$0xff] %v680_v16 }
 0x124   : > { %v703_v17 = vld [vmem:[#allocation2 + $0x30] sm:$0xff]  ;;  %v704_v18 = vld [vmem:[#allocation2] sm:$0xff]  ;;  %v705_v19 = vld [vmem:[#allocation2 + $0x58] sm:$0xff] }
 0x125   : > { %719 = vst [vmem:[%s1350_s2] sm:$0xff] %v703_v17  ;;  %v756_v20 = vmul.f32 %v703_v17, %v703_v17  ;;  %720 = vst [vmem:[%s1350_s2 + $0x8] sm:$0xff] %v704_v18  ;;  %v735_v21 = vadd.f32 %v704_v18, %v703_v17  ;;  %v757_v22 = vmul.f32 %v704_v18, %v704_v18  ;;  %v706_v24 = vld [vmem:[#allocation2 + $0x18] sm:$0xff]  ;;  %v709_v27 = vld [vmem:[#allocation2 + $0x8] sm:$0xff] }
 0x126   : > { %721 = vst [vmem:[%s1350_s2 + $0x10] sm:$0xff] %v705_v19  ;;  %v758_v23 = vmul.f32 %v705_v19, %v705_v19  ;;  %v707_v25 = vld [vmem:[#allocation2 + $0x50] sm:$0xff]  ;;  %722 = vst [vmem:[%s1350_s2 + $0x18] sm:$0xff] %v706_v24  ;;  %v711_v29 = vld [vmem:[#allocation2 + $0x40] sm:$0xff]  ;;  %v759_v32 = vmul.f32 %v706_v24, %v706_v24  ;;  %v762_v48 = vmul.f32 %v709_v27, %v709_v27 }
 0x127   : > { %723 = vst [vmem:[%s1350_s2 + $0x20] sm:$0xff] %v707_v25  ;;  %v772_v30 = vadd.f32 %v757_v22, %v756_v20  ;;  %v736_v31 = vadd.f32 %v735_v21, %v705_v19  ;;  %725 = vst [vmem:[%s1350_s2 + $0x30] sm:$0xff] %v709_v27  ;;  %v712_v33 = vld [vmem:[#allocation2 + $0x20] sm:$0xff]  ;;  %v713_v34 = vld [vmem:[#allocation2 + $0x10] sm:$0xff]  ;;  %v760_v41 = vmul.f32 %v707_v25, %v707_v25 }
 0x128   : > { %v710_v28 = vld [vmem:[#allocation2 + $0x48] sm:$0xff]  ;;  %727 = vst [vmem:[%s1350_s2 + $0x40] sm:$0xff] %v711_v29  ;;  %v714_v35 = vld [vmem:[#allocation2 + $0x38] sm:$0xff]  ;;  %728 = vst [vmem:[%s1350_s2 + $0x48] sm:$0xff] %v712_v33  ;;  %v764_v54 = vmul.f32 %v711_v29, %v711_v29  ;;  %v765_v57 = vmul.f32 %v712_v33, %v712_v33  ;;  %v766_v60 = vmul.f32 %v713_v34, %v713_v34 }
 0x129   : > { %726 = vst [vmem:[%s1350_s2 + $0x38] sm:$0xff] %v710_v28  ;;  %729 = vst [vmem:[%s1350_s2 + $0x50] sm:$0xff] %v713_v34  ;;  %v715_v36 = vld [vmem:[#allocation2 + $0x60] sm:$0xff]  ;;  %v717_v38 = vld [vmem:[#allocation2 + $0x78] sm:$0xff]  ;;  %v773_v39 = vadd.f32 %v772_v30, %v758_v23  ;;  %v737_v40 = vadd.f32 %v736_v31, %v706_v24  ;;  %v763_v51 = vmul.f32 %v710_v28, %v710_v28 }
 0x12a   : > { %v708_v26 = vld [vmem:[#allocation2 + $0x68] sm:$0xff]  ;;  %730 = vst [vmem:[%s1350_s2 + $0x58] sm:$0xff] %v714_v35  ;;  %v716_v37 = vld [vmem:[#allocation2 + $0x70] sm:$0xff]  ;;  %731 = vst [vmem:[%s1350_s2 + $0x60] sm:$0xff] %v715_v36  ;;  %v767_v63 = vmul.f32 %v714_v35, %v714_v35  ;;  %v768_v2 = vmul.f32 %v715_v36, %v715_v36  ;;  %v770_v8 = vmul.f32 %v717_v38, %v717_v38 }
 0x12b   : > { %724 = vst [vmem:[%s1350_s2 + $0x28] sm:$0xff] %v708_v26  ;;  %732 = vst [vmem:[%s1350_s2 + $0x68] sm:$0xff] %v716_v37  ;;  %v718_v42 = vld [vmem:[#allocation2 + $0x28] sm:$0xff]  ;;  %v774_v43 = vadd.f32 %v773_v39, %v759_v32  ;;  %v738_v44 = vadd.f32 %v737_v40, %v707_v25  ;;  %v761_v45 = vmul.f32 %v708_v26, %v708_v26 }
 0x12c   : > { %733 = vst [vmem:[%s1350_s2 + $0x70] sm:$0xff] %v717_v38  ;;  %734 = vst [vmem:[%s1350_s2 + $0x78] sm:$0xff] %v718_v42  ;;  %v769_v5 = vmul.f32 %v716_v37, %v716_v37  ;;  %v771_v11 = vmul.f32 %v718_v42, %v718_v42 }
 0x12d   : > { %v775_v46 = vadd.f32 %v774_v43, %v760_v41  ;;  %v739_v47 = vadd.f32 %v738_v44, %v708_v26 }
 0x12f   : > { %v776_v49 = vadd.f32 %v775_v46, %v761_v45  ;;  %v740_v50 = vadd.f32 %v739_v47, %v709_v27 }
 0x131   : > { %v777_v52 = vadd.f32 %v776_v49, %v762_v48  ;;  %v741_v53 = vadd.f32 %v740_v50, %v710_v28 }
 0x133   : > { %v778_v55 = vadd.f32 %v777_v52, %v763_v51  ;;  %v742_v56 = vadd.f32 %v741_v53, %v711_v29 }
 0x135   : > { %v779_v58 = vadd.f32 %v778_v55, %v764_v54  ;;  %v743_v59 = vadd.f32 %v742_v56, %v712_v33 }
 0x137   : > { %v780_v61 = vadd.f32 %v779_v58, %v765_v57  ;;  %v744_v62 = vadd.f32 %v743_v59, %v713_v34 }
 0x139   : > { %v781_v0 = vadd.f32 %v780_v61, %v766_v60  ;;  %v745_v1 = vadd.f32 %v744_v62, %v714_v35 }
 0x13b   : > { %v782_v3 = vadd.f32 %v781_v0, %v767_v63  ;;  %v746_v4 = vadd.f32 %v745_v1, %v715_v36 }
 0x13d   : > { %v783_v6 = vadd.f32 %v782_v3, %v768_v2  ;;  %v747_v7 = vadd.f32 %v746_v4, %v716_v37 }
 0x13f   : > { %v784_v9 = vadd.f32 %v783_v6, %v769_v5  ;;  %v748_v10 = vadd.f32 %v747_v7, %v717_v38 }
 0x141   : > { %v785_v12 = vadd.f32 %v784_v9, %v770_v8  ;;  %v749_v13 = vadd.f32 %v748_v10, %v718_v42 }
 0x143   : > { %v750_v14 = vrot.slane %v749_v13, 4  ;;  %v786_v15 = vadd.f32 %v785_v12, %v771_v11 }
 0x145   : > { %v751_v16 = vadd.f32 %v750_v14, %v749_v13  ;;  %v787_v17 = vrot.slane %v786_v15, 4 }
 0x147   : > { %v752_v18 = vrot.slane %v751_v16, 2  ;;  %v788_v19 = vadd.f32 %v787_v17, %v786_v15 }
 0x149   : > { %v753_v20 = vadd.f32 %v752_v18, %v751_v16  ;;  %v789_v21 = vrot.slane %v788_v19, 2 }
 0x14b   : > { %v754_v22 = vrot.slane %v753_v20, 1  ;;  %v790_v23 = vadd.f32 %v789_v21, %v788_v19 }
 0x14d   : > { %v755_v24 = vadd.f32 %v754_v22, %v753_v20  ;;  %v791_v25 = vrot.slane %v790_v23, 1 }
 0x14f   : > { %793 = vst [vmem:[%s1351_s3] sm:$0xff] %v755_v24  ;;  %v792_v26 = vadd.f32 %v791_v25, %v790_v23 }
 0x151   : > { %794 = vst [vmem:[%s1352_s4] sm:$0xff] %v792_v26 }
 0x152 PF: > { %s15_s19 = sadd.s32 1, %s1161_s19   ;;  %s1353_s15 = smov %s1149_s16 }
 0x153   : > { %p12_p12 = scmp.ge.s32.totalorder %s15_s19, 5   ;;  %s1354_s16 = smov %s1224_s23 }
 0x154   : > { %s1355_s17 = smov %s1157_s18  ;;  %s1356_s18 = smov %s1358_s20 }
 0x155   :  { %14 = sbr.rel (!%p12_p12) target bundleno = 3 (0x3), region = 139 }

// kernel: resnet_generator_forward.37
= control target key start
LH: loop header
LB: loop body
LE: loop exit
PB: predicated region body
PF: predicated region fallthrough
CT: control target
= control target key end

     0   :  { %s2456_s12 = smov 0   ;;  %s2458_s13 = smov 0   ;;  %s3096_s0 = inlined_call_operand.vmem [shape: bf16[512,512], index: 0, kind: input, shape index: {}]   ;;  %s3097_s1 = inlined_call_operand.vmem [shape: bf16[512,128], index: 1, kind: input, shape index: {}]   ;;  %s3098_s2 = inlined_call_operand.vmem [shape: f32[1,128], index: 2, kind: input, shape index: {}]   ;;  %s3099_s3 = inlined_call_operand.vmem [shape: f32[512,128], index: 3, kind: output, shape index: {}]  }
   0x1   :  { %s2460_s14 = smov 0   ;;  %s2462_s15 = smov 0  }
   0x2   :  { %s2464_s16 = smov 0  }
   0x3 LB: > { %s25_s17 = sadd.s32 1, %s2428_s15  ;;  %p48_p1 = scmp.ne.s32.totalorder %s2420_s13, %s2416_s12  ;;  %s2432_s16 = sphi %s2464_s16, %s13_s16   ;;  %s2428_s15 = sphi %s2462_s15, %s3103_s15   ;;  %s2424_s14 = sphi %s2460_s14, %s3102_s14   ;;  %s2420_s13 = sphi %s2458_s13, %s3101_s13   ;;  %s2416_s12 = sphi %s2456_s12, %s3100_s12  }
   0x4   : > { %p26_p0 = scmp.ge.s32.totalorder %s25_s17, 2  ;;  %p49_p2 = scmp.eq.s32.totalorder %s2432_s16, 0 }
   0x5   : > { %s41_s19 = sadd.s32 1, %s2420_s13  ;;  %p1984_p5 = scmp.ge.s32.totalorder %s2432_s16, 2 }
   0x6   : > { %s3105_s17 = smov (%p26_p0, %s25_s17), 0  ;;  %p50_p3 = por %p49_p2, %p48_p1 }
   0x7   : > { %s37_s18 = ssub.s32 %s2428_s15, %s3105_s17  ;;  %162 = sbr.rel (%p1984_p5) target bundleno = 48 (0x30), region = 20 }
   0x8   : > { %p39_p4 = scmp.eq.s32.totalorder %s37_s18, 0 }
   0xa   : > { %s2491_s20 = scalar_select %p39_p4, %s2420_s13, %s41_s19  }
   0xc   : > { %165 = sbr.rel (!%p50_p3) target bundleno = 48 (0x30), region = 24  ;;  %s167_s21 = sand.u32 (%p50_p3), 1, %s2420_s13  }
   0xd   : > { %s2079_s22 = sshll.u32 (%p50_p3), %s2428_s15, 3  ;;  %s1985_s23 = sshll.u32 (%p50_p3), %s167_s21, 9 }
   0xe   : > { %s2499_s26 = scalar_lea.vmem (%p50_p3), %s3096_s0, %s2079_s22  ;;  %s2504_s27 = scalar_lea.vmem (%p50_p3), [#allocation3], %s1985_s23 }
   0xf   : > { %v330_v0 = vld [vmem:[%s2499_s26] sm:$0xff] (%p50_p3)  ;;  %v332_v1 = vld [vmem:[%s2499_s26 + $0x10] sm:$0xff] (%p50_p3) }
  0x10   : > { %v334_v2 = vld [vmem:[%s2499_s26 + $0x20] sm:$0xff] (%p50_p3)  ;;  %331 = vst [vmem:[%s2504_s27] sm:$0xff] (%p50_p3), %v330_v0  ;;  %333 = vst [vmem:[%s2504_s27 + $0x8] sm:$0xff] (%p50_p3), %v332_v1  ;;  %v336_v3 = vld [vmem:[%s2499_s26 + $0x30] sm:$0xff] (%p50_p3) }
  0x11   : > { %335 = vst [vmem:[%s2504_s27 + $0x10] sm:$0xff] %v334_v2  ;;  %v338_v4 = vld [vmem:[%s2499_s26 + $0x40] sm:$0xff]  ;;  %v340_v5 = vld [vmem:[%s2499_s26 + $0x50] sm:$0xff]  ;;  %337 = vst [vmem:[%s2504_s27 + $0x18] sm:$0xff] %v336_v3 }
  0x12   : > { %339 = vst [vmem:[%s2504_s27 + $0x20] sm:$0xff] %v338_v4  ;;  %341 = vst [vmem:[%s2504_s27 + $0x28] sm:$0xff] %v340_v5  ;;  %v342_v6 = vld [vmem:[%s2499_s26 + $0x60] sm:$0xff]  ;;  %v344_v7 = vld [vmem:[%s2499_s26 + $0x70] sm:$0xff] }
  0x13   : > { %v346_v8 = vld [vmem:[%s2499_s26 + $0x80] sm:$0xff]  ;;  %343 = vst [vmem:[%s2504_s27 + $0x30] sm:$0xff] %v342_v6  ;;  %345 = vst [vmem:[%s2504_s27 + $0x38] sm:$0xff] %v344_v7  ;;  %v348_v9 = vld [vmem:[%s2499_s26 + $0x90] sm:$0xff] }
  0x14   : > { %347 = vst [vmem:[%s2504_s27 + $0x40] sm:$0xff] %v346_v8  ;;  %v350_v10 = vld [vmem:[%s2499_s26 + $0xa0] sm:$0xff]  ;;  %v352_v11 = vld [vmem:[%s2499_s26 + $0xb0] sm:$0xff]  ;;  %349 = vst [vmem:[%s2504_s27 + $0x48] sm:$0xff] %v348_v9 }
  0x15   : > { %351 = vst [vmem:[%s2504_s27 + $0x50] sm:$0xff] %v350_v10  ;;  %353 = vst [vmem:[%s2504_s27 + $0x58] sm:$0xff] %v352_v11  ;;  %v354_v12 = vld [vmem:[%s2499_s26 + $0xc0] sm:$0xff]  ;;  %v356_v13 = vld [vmem:[%s2499_s26 + $0xd0] sm:$0xff] }
  0x16   : > { %v358_v14 = vld [vmem:[%s2499_s26 + $0xe0] sm:$0xff]  ;;  %355 = vst [vmem:[%s2504_s27 + $0x60] sm:$0xff] %v354_v12  ;;  %357 = vst [vmem:[%s2504_s27 + $0x68] sm:$0xff] %v356_v13  ;;  %v360_v15 = vld [vmem:[%s2499_s26 + $0xf0] sm:$0xff] }
  0x17   : > { %359 = vst [vmem:[%s2504_s27 + $0x70] sm:$0xff] %v358_v14  ;;  %v362_v16 = vld [vmem:[%s2499_s26 + $0x100] sm:$0xff]  ;;  %v364_v17 = vld [vmem:[%s2499_s26 + $0x110] sm:$0xff]  ;;  %361 = vst [vmem:[%s2504_s27 + $0x78] sm:$0xff] %v360_v15 }
  0x18   : > { %363 = vst [vmem:[%s2504_s27 + $0x80] sm:$0xff] %v362_v16  ;;  %365 = vst [vmem:[%s2504_s27 + $0x88] sm:$0xff] %v364_v17  ;;  %v366_v18 = vld [vmem:[%s2499_s26 + $0x120] sm:$0xff]  ;;  %v368_v19 = vld [vmem:[%s2499_s26 + $0x130] sm:$0xff] }
  0x19   : > { %v370_v20 = vld [vmem:[%s2499_s26 + $0x140] sm:$0xff]  ;;  %367 = vst [vmem:[%s2504_s27 + $0x90] sm:$0xff] %v366_v18  ;;  %369 = vst [vmem:[%s2504_s27 + $0x98] sm:$0xff] %v368_v19  ;;  %v372_v21 = vld [vmem:[%s2499_s26 + $0x150] sm:$0xff] }
  0x1a   : > { %371 = vst [vmem:[%s2504_s27 + $0xa0] sm:$0xff] %v370_v20  ;;  %v374_v22 = vld [vmem:[%s2499_s26 + $0x160] sm:$0xff]  ;;  %v376_v23 = vld [vmem:[%s2499_s26 + $0x170] sm:$0xff]  ;;  %373 = vst [vmem:[%s2504_s27 + $0xa8] sm:$0xff] %v372_v21 }
  0x1b   : > { %375 = vst [vmem:[%s2504_s27 + $0xb0] sm:$0xff] %v374_v22  ;;  %377 = vst [vmem:[%s2504_s27 + $0xb8] sm:$0xff] %v376_v23  ;;  %v378_v24 = vld [vmem:[%s2499_s26 + $0x180] sm:$0xff]  ;;  %v380_v25 = vld [vmem:[%s2499_s26 + $0x190] sm:$0xff] }
  0x1c   : > { %v382_v26 = vld [vmem:[%s2499_s26 + $0x1a0] sm:$0xff]  ;;  %379 = vst [vmem:[%s2504_s27 + $0xc0] sm:$0xff] %v378_v24  ;;  %381 = vst [vmem:[%s2504_s27 + $0xc8] sm:$0xff] %v380_v25  ;;  %v384_v27 = vld [vmem:[%s2499_s26 + $0x1b0] sm:$0xff] }
  0x1d   : > { %383 = vst [vmem:[%s2504_s27 + $0xd0] sm:$0xff] %v382_v26  ;;  %v386_v28 = vld [vmem:[%s2499_s26 + $0x1c0] sm:$0xff]  ;;  %v388_v29 = vld [vmem:[%s2499_s26 + $0x1d0] sm:$0xff]  ;;  %385 = vst [vmem:[%s2504_s27 + $0xd8] sm:$0xff] %v384_v27 }
  0x1e   : > { %387 = vst [vmem:[%s2504_s27 + $0xe0] sm:$0xff] %v386_v28  ;;  %389 = vst [vmem:[%s2504_s27 + $0xe8] sm:$0xff] %v388_v29  ;;  %v390_v30 = vld [vmem:[%s2499_s26 + $0x1e0] sm:$0xff]  ;;  %v392_v31 = vld [vmem:[%s2499_s26 + $0x1f0] sm:$0xff] }
  0x1f   : > { %v394_v32 = vld [vmem:[%s2499_s26 + $0x200] sm:$0xff]  ;;  %391 = vst [vmem:[%s2504_s27 + $0xf0] sm:$0xff] %v390_v30  ;;  %393 = vst [vmem:[%s2504_s27 + $0xf8] sm:$0xff] %v392_v31  ;;  %v396_v33 = vld [vmem:[%s2499_s26 + $0x210] sm:$0xff] }
  0x20   : > { %395 = vst [vmem:[%s2504_s27 + $0x100] sm:$0xff] %v394_v32  ;;  %v398_v34 = vld [vmem:[%s2499_s26 + $0x220] sm:$0xff]  ;;  %v400_v35 = vld [vmem:[%s2499_s26 + $0x230] sm:$0xff]  ;;  %397 = vst [vmem:[%s2504_s27 + $0x108] sm:$0xff] %v396_v33 }
  0x21   : > { %399 = vst [vmem:[%s2504_s27 + $0x110] sm:$0xff] %v398_v34  ;;  %401 = vst [vmem:[%s2504_s27 + $0x118] sm:$0xff] %v400_v35  ;;  %v402_v36 = vld [vmem:[%s2499_s26 + $0x240] sm:$0xff]  ;;  %v404_v37 = vld [vmem:[%s2499_s26 + $0x250] sm:$0xff] }
  0x22   : > { %v406_v38 = vld [vmem:[%s2499_s26 + $0x260] sm:$0xff]  ;;  %403 = vst [vmem:[%s2504_s27 + $0x120] sm:$0xff] %v402_v36  ;;  %405 = vst [vmem:[%s2504_s27 + $0x128] sm:$0xff] %v404_v37  ;;  %v408_v39 = vld [vmem:[%s2499_s26 + $0x270] sm:$0xff] }
  0x23   : > { %407 = vst [vmem:[%s2504_s27 + $0x130] sm:$0xff] %v406_v38  ;;  %v410_v40 = vld [vmem:[%s2499_s26 + $0x280] sm:$0xff]  ;;  %v412_v41 = vld [vmem:[%s2499_s26 + $0x290] sm:$0xff]  ;;  %409 = vst [vmem:[%s2504_s27 + $0x138] sm:$0xff] %v408_v39 }
  0x24   : > { %411 = vst [vmem:[%s2504_s27 + $0x140] sm:$0xff] %v410_v40  ;;  %413 = vst [vmem:[%s2504_s27 + $0x148] sm:$0xff] %v412_v41  ;;  %v414_v42 = vld [vmem:[%s2499_s26 + $0x2a0] sm:$0xff]  ;;  %v416_v43 = vld [vmem:[%s2499_s26 + $0x2b0] sm:$0xff] }
  0x25   : > { %v418_v44 = vld [vmem:[%s2499_s26 + $0x2c0] sm:$0xff]  ;;  %415 = vst [vmem:[%s2504_s27 + $0x150] sm:$0xff] %v414_v42  ;;  %417 = vst [vmem:[%s2504_s27 + $0x158] sm:$0xff] %v416_v43  ;;  %v420_v45 = vld [vmem:[%s2499_s26 + $0x2d0] sm:$0xff] }
  0x26   : > { %419 = vst [vmem:[%s2504_s27 + $0x160] sm:$0xff] %v418_v44  ;;  %v422_v46 = vld [vmem:[%s2499_s26 + $0x2e0] sm:$0xff]  ;;  %v424_v47 = vld [vmem:[%s2499_s26 + $0x2f0] sm:$0xff]  ;;  %421 = vst [vmem:[%s2504_s27 + $0x168] sm:$0xff] %v420_v45 }
  0x27   : > { %423 = vst [vmem:[%s2504_s27 + $0x170] sm:$0xff] %v422_v46  ;;  %425 = vst [vmem:[%s2504_s27 + $0x178] sm:$0xff] %v424_v47  ;;  %v426_v48 = vld [vmem:[%s2499_s26 + $0x300] sm:$0xff]  ;;  %v428_v49 = vld [vmem:[%s2499_s26 + $0x310] sm:$0xff] }
  0x28   : > { %v430_v50 = vld [vmem:[%s2499_s26 + $0x320] sm:$0xff]  ;;  %427 = vst [vmem:[%s2504_s27 + $0x180] sm:$0xff] %v426_v48  ;;  %429 = vst [vmem:[%s2504_s27 + $0x188] sm:$0xff] %v428_v49  ;;  %v432_v51 = vld [vmem:[%s2499_s26 + $0x330] sm:$0xff] }
  0x29   : > { %431 = vst [vmem:[%s2504_s27 + $0x190] sm:$0xff] %v430_v50  ;;  %v434_v52 = vld [vmem:[%s2499_s26 + $0x340] sm:$0xff]  ;;  %v436_v53 = vld [vmem:[%s2499_s26 + $0x350] sm:$0xff]  ;;  %433 = vst [vmem:[%s2504_s27 + $0x198] sm:$0xff] %v432_v51 }
  0x2a   : > { %435 = vst [vmem:[%s2504_s27 + $0x1a0] sm:$0xff] %v434_v52  ;;  %437 = vst [vmem:[%s2504_s27 + $0x1a8] sm:$0xff] %v436_v53  ;;  %v438_v54 = vld [vmem:[%s2499_s26 + $0x360] sm:$0xff]  ;;  %v440_v55 = vld [vmem:[%s2499_s26 + $0x370] sm:$0xff] }
  0x2b   : > { %v442_v56 = vld [vmem:[%s2499_s26 + $0x380] sm:$0xff]  ;;  %439 = vst [vmem:[%s2504_s27 + $0x1b0] sm:$0xff] %v438_v54  ;;  %441 = vst [vmem:[%s2504_s27 + $0x1b8] sm:$0xff] %v440_v55  ;;  %v444_v57 = vld [vmem:[%s2499_s26 + $0x390] sm:$0xff] }
  0x2c   : > { %443 = vst [vmem:[%s2504_s27 + $0x1c0] sm:$0xff] %v442_v56  ;;  %v446_v58 = vld [vmem:[%s2499_s26 + $0x3a0] sm:$0xff]  ;;  %v448_v59 = vld [vmem:[%s2499_s26 + $0x3b0] sm:$0xff]  ;;  %445 = vst [vmem:[%s2504_s27 + $0x1c8] sm:$0xff] %v444_v57 }
  0x2d   : > { %447 = vst [vmem:[%s2504_s27 + $0x1d0] sm:$0xff] %v446_v58  ;;  %449 = vst [vmem:[%s2504_s27 + $0x1d8] sm:$0xff] %v448_v59  ;;  %v450_v60 = vld [vmem:[%s2499_s26 + $0x3c0] sm:$0xff]  ;;  %v452_v61 = vld [vmem:[%s2499_s26 + $0x3d0] sm:$0xff] }
  0x2e   : > { %v454_v62 = vld [vmem:[%s2499_s26 + $0x3e0] sm:$0xff]  ;;  %451 = vst [vmem:[%s2504_s27 + $0x1e0] sm:$0xff] %v450_v60  ;;  %453 = vst [vmem:[%s2504_s27 + $0x1e8] sm:$0xff] %v452_v61  ;;  %v456_v63 = vld [vmem:[%s2499_s26 + $0x3f0] sm:$0xff] }
  0x2f   : > { %455 = vst [vmem:[%s2504_s27 + $0x1f0] sm:$0xff] %v454_v62  ;;  %457 = vst [vmem:[%s2504_s27 + $0x1f8] sm:$0xff] %v456_v63 }
  0x30 PF: > { %p1988_p6 = scmp.ge.s32.totalorder %s2432_s16, 1  ;;  %p474_p7 = scmp.lt.s32.totalorder %s2432_s16, 3 }
  0x32   : > { %p475_p8 = pnand %p1988_p6, %p474_p7 }
  0x33   : > { %s481_s28 = sand.u32 (!%p475_p8), 1, %s2416_s12   ;;  %s1990_s29 = sshll.u32 (!%p475_p8), %s2424_s14, 5 }
  0x34   : > { %478 = sbr.rel (%p475_p8) target bundleno = 561 (0x231), region = 66  ;;  %s1989_s30 = sshll.u32 (!%p475_p8), %s481_s28, 9 }
  0x35   : > { %p521_p9 = scmp.lt.s32.totalorder (!%p475_p8), %s1990_s29, 63  ;;  %s2640_s8 = scalar_lea.vmem (!%p475_p8), [#allocation3], %s1989_s30 }
  0x36   : > { %p1992_p10 = scmp.ne.s32.totalorder (!%p475_p8), %s2424_s14, 0 }
  0x39   : > { %s3107_s29 = smov (!%p521_p9, %s1990_s29), 63  ;;  %545 = sbr.rel (%p1992_p10) target bundleno = 95 (0x5f), region = 74 }
  0x3a   : > { %s1991_s4 = sshll.u32 %s3107_s29, 2 }
  0x3b   : > { %s2638_s7 = scalar_lea.vmem %s3097_s1, %s1991_s4 }
  0x3e   : > { %v2434_v0 = vmov 0.0  }
  0x3f   : > { %546 = vst [vmem:[#allocation2 + $0xb0] sm:$0xff] %v2434_v0  ;;  %547 = vst [vmem:[#allocation2 + $0x1b0] sm:$0xff] %v2434_v0 }
  0x40   : > { %548 = vst [vmem:[#allocation2 + $0xd8] sm:$0xff] %v2434_v0  ;;  %549 = vst [vmem:[#allocation2 + $0x18] sm:$0xff] %v2434_v0 }
  0x41   : > { %550 = vst [vmem:[#allocation2 + $0x50] sm:$0xff] %v2434_v0  ;;  %551 = vst [vmem:[#allocation2 + $0x168] sm:$0xff] %v2434_v0 }
  0x42   : > { %552 = vst [vmem:[#allocation2 + $0x130] sm:$0xff] %v2434_v0  ;;  %553 = vst [vmem:[#allocation2 + $0x48] sm:$0xff] %v2434_v0 }
  0x43   : > { %554 = vst [vmem:[#allocation2 + $0x180] sm:$0xff] %v2434_v0  ;;  %555 = vst [vmem:[#allocation2 + $0x110] sm:$0xff] %v2434_v0 }
  0x44   : > { %556 = vst [vmem:[#allocation2 + $0x118] sm:$0xff] %v2434_v0  ;;  %557 = vst [vmem:[#allocation2 + $0x98] sm:$0xff] %v2434_v0 }
  0x45   : > { %558 = vst [vmem:[#allocation2 + $0x120] sm:$0xff] %v2434_v0  ;;  %559 = vst [vmem:[#allocation2 + $0x150] sm:$0xff] %v2434_v0 }
  0x46   : > { %560 = vst [vmem:[#allocation2 + $0x108] sm:$0xff] %v2434_v0  ;;  %561 = vst [vmem:[#allocation2 + $0x60] sm:$0xff] %v2434_v0 }
  0x47   : > { %562 = vst [vmem:[#allocation2 + $0xe0] sm:$0xff] %v2434_v0  ;;  %563 = vst [vmem:[#allocation2 + $0x188] sm:$0xff] %v2434_v0 }
  0x48   : > { %564 = vst [vmem:[#allocation2 + $0x138] sm:$0xff] %v2434_v0  ;;  %565 = vst [vmem:[#allocation2 + $0x140] sm:$0xff] %v2434_v0 }
  0x49   : > { %566 = vst [vmem:[#allocation2 + $0x80] sm:$0xff] %v2434_v0  ;;  %567 = vst [vmem:[#allocation2 + $0x1a8] sm:$0xff] %v2434_v0 }
  0x4a   : > { %568 = vst [vmem:[#allocation2 + $0x1b8] sm:$0xff] %v2434_v0  ;;  %569 = vst [vmem:[#allocation2 + $0x28] sm:$0xff] %v2434_v0 }
  0x4b   : > { %570 = vst [vmem:[#allocation2 + $0x1e8] sm:$0xff] %v2434_v0  ;;  %571 = vst [vmem:[#allocation2 + $0xf8] sm:$0xff] %v2434_v0 }
  0x4c   : > { %572 = vst [vmem:[#allocation2 + $0x160] sm:$0xff] %v2434_v0  ;;  %573 = vst [vmem:[#allocation2 + $0x30] sm:$0xff] %v2434_v0 }
  0x4d   : > { %574 = vst [vmem:[#allocation2 + $0x1e0] sm:$0xff] %v2434_v0  ;;  %575 = vst [vmem:[#allocation2] sm:$0xff] %v2434_v0 }
  0x4e   : > { %576 = vst [vmem:[#allocation2 + $0xf0] sm:$0xff] %v2434_v0  ;;  %577 = vst [vmem:[#allocation2 + $0x8] sm:$0xff] %v2434_v0 }
  0x4f   : > { %578 = vst [vmem:[#allocation2 + $0x148] sm:$0xff] %v2434_v0  ;;  %579 = vst [vmem:[#allocation2 + $0x1d0] sm:$0xff] %v2434_v0 }
  0x50   : > { %580 = vst [vmem:[#allocation2 + $0x100] sm:$0xff] %v2434_v0  ;;  %581 = vst [vmem:[#allocation2 + $0xc8] sm:$0xff] %v2434_v0 }
  0x51   : > { %582 = vst [vmem:[#allocation2 + $0x40] sm:$0xff] %v2434_v0  ;;  %583 = vst [vmem:[#allocation2 + $0x1f8] sm:$0xff] %v2434_v0 }
  0x52   : > { %584 = vst [vmem:[#allocation2 + $0x20] sm:$0xff] %v2434_v0  ;;  %585 = vst [vmem:[#allocation2 + $0x128] sm:$0xff] %v2434_v0 }
  0x53   : > { %586 = vst [vmem:[#allocation2 + $0x1a0] sm:$0xff] %v2434_v0  ;;  %587 = vst [vmem:[#allocation2 + $0x1f0] sm:$0xff] %v2434_v0 }
  0x54   : > { %588 = vst [vmem:[#allocation2 + $0xe8] sm:$0xff] %v2434_v0  ;;  %589 = vst [vmem:[#allocation2 + $0x78] sm:$0xff] %v2434_v0 }
  0x55   : > { %590 = vst [vmem:[#allocation2 + $0x70] sm:$0xff] %v2434_v0  ;;  %591 = vst [vmem:[#allocation2 + $0x90] sm:$0xff] %v2434_v0 }
  0x56   : > { %592 = vst [vmem:[#allocation2 + $0x1d8] sm:$0xff] %v2434_v0  ;;  %593 = vst [vmem:[#allocation2 + $0xd0] sm:$0xff] %v2434_v0 }
  0x57   : > { %594 = vst [vmem:[#allocation2 + $0xb8] sm:$0xff] %v2434_v0  ;;  %595 = vst [vmem:[#allocation2 + $0x88] sm:$0xff] %v2434_v0 }
  0x58   : > { %596 = vst [vmem:[#allocation2 + $0xa8] sm:$0xff] %v2434_v0  ;;  %597 = vst [vmem:[#allocation2 + $0x1c8] sm:$0xff] %v2434_v0 }
  0x59   : > { %598 = vst [vmem:[#allocation2 + $0x170] sm:$0xff] %v2434_v0  ;;  %599 = vst [vmem:[#allocation2 + $0x178] sm:$0xff] %v2434_v0 }
  0x5a   : > { %600 = vst [vmem:[#allocation2 + $0x68] sm:$0xff] %v2434_v0  ;;  %601 = vst [vmem:[#allocation2 + $0x190] sm:$0xff] %v2434_v0 }
  0x5b   : > { %602 = vst [vmem:[#allocation2 + $0x198] sm:$0xff] %v2434_v0  ;;  %603 = vst [vmem:[#allocation2 + $0x38] sm:$0xff] %v2434_v0 }
  0x5c   : > { %604 = vst [vmem:[#allocation2 + $0xc0] sm:$0xff] %v2434_v0  ;;  %605 = vst [vmem:[#allocation2 + $0x1c0] sm:$0xff] %v2434_v0 }
  0x5d   : > { %606 = vst [vmem:[#allocation2 + $0x158] sm:$0xff] %v2434_v0  ;;  %607 = vst [vmem:[#allocation2 + $0x10] sm:$0xff] %v2434_v0 }
  0x5e   : > { %608 = vst [vmem:[#allocation2 + $0x58] sm:$0xff] %v2434_v0  ;;  %609 = vst [vmem:[#allocation2 + $0xa0] sm:$0xff] %v2434_v0 }
  0x5f PF: > { %v2154_v1 = vld [vmem:[%s2638_s7 + $0x38] sm:$0xff]   ;;  %v2435_v2 = vmov 0   ;;  %v2155_v3 = vld [vmem:[%s2638_s7 + $0x30] sm:$0xff]   ;;  %v2156_v4 = vld [vmem:[%s2638_s7 + $0x28] sm:$0xff]   ;;  %p2073_p11 = scmp.ne.s32.totalorder %s2424_s14, 1 }
  0x60   : > { %1186 = vmatprep.subr.bf16.mxu0 %v2435_v2  ;;  %2080 = vmatprep.subr.bf16.mxu1 %v2435_v2  ;;  %v2157_v5 = vld [vmem:[%s2638_s7 + $0x20] sm:$0xff]   ;;  %v2158_v6 = vld [vmem:[%s2638_s7 + $0x18] sm:$0xff]   ;;  %v2159_v8 = vld [vmem:[%s2638_s7 + $0x10] sm:$0xff]  }
  0x61   : > { %1187 = vmatpush1.bf16.msra.mxu0 %v2154_v1  ;;  %2096 = vmatpush1.bf16.msra.mxu1 %v2154_v1  ;;  %v2172_v7 = vld [vmem:[%s2640_s8 + $0x4] ss:$8 sps:$4 sm:$0xff]   ;;  %v2162_v12 = vld [vmem:[%s2638_s7 + $0x78] sm:$0xff]   ;;  %v2163_v13 = vld [vmem:[%s2638_s7 + $0x70] sm:$0xff]  }
  0x62   : > { %1188 = vmatprep.subr.bf16.mxu0 %v2435_v2  ;;  %2081 = vmatprep.subr.bf16.mxu1 %v2435_v2  ;;  %v2175_v9 = vld [vmem:[%s2640_s8 + $0x104] ss:$8 sps:$4 sm:$0xff]   ;;  %v2166_v16 = vld [vmem:[%s2638_s7 + $0x58] sm:$0xff]   ;;  %v2167_v17 = vld [vmem:[%s2638_s7 + $0x50] sm:$0xff]  }
  0x63   : > { %1218 = vmatprep.mubr.bf16.mxu0 %v2172_v7  ;;  %1346 = vmatprep.mubr.bf16.mxu1 %v2175_v9  ;;  %v2160_v10 = vld [vmem:[%s2638_s7 + $0x8] sm:$0xff]   ;;  %v2161_v11 = vld [vmem:[%s2638_s7] sm:$0xff]   ;;  %v2176_v22 = vld [vmem:[%s2640_s8 + $0x14] ss:$8 sps:$4 sm:$0xff]  }
  0x64   : > { %v2164_v14 = vld [vmem:[%s2638_s7 + $0x68] sm:$0xff]   ;;  %v2165_v15 = vld [vmem:[%s2638_s7 + $0x60] sm:$0xff]   ;;  %v2178_v23 = vld [vmem:[%s2640_s8 + $0x114] ss:$8 sps:$4 sm:$0xff]  }
  0x65   : > { %1189 = vmatpush1.bf16.msra.mxu0 %v2155_v3  ;;  %2097 = vmatpush1.bf16.msra.mxu1 %v2155_v3  ;;  %v2168_v18 = vld [vmem:[%s2638_s7 + $0x48] sm:$0xff]   ;;  %v2169_v19 = vld [vmem:[%s2638_s7 + $0x40] sm:$0xff]   ;;  %v2180_v24 = vld [vmem:[%s2640_s8 + $0x10] ss:$8 sps:$4 sm:$0xff]  }
  0x66   : > { %1190 = vmatprep.subr.bf16.mxu0 %v2435_v2  ;;  %2082 = vmatprep.subr.bf16.mxu1 %v2435_v2  ;;  %v2170_v20 = vld [vmem:[%s2640_s8] ss:$8 sps:$4 sm:$0xff]   ;;  %v2181_v25 = vld [vmem:[%s2640_s8 + $0x110] ss:$8 sps:$4 sm:$0xff]   ;;  %v2182_v26 = vld [vmem:[%s2640_s8 + $0x24] ss:$8 sps:$4 sm:$0xff]  }
  0x67   : > { %v2173_v21 = vld [vmem:[%s2640_s8 + $0x100] ss:$8 sps:$4 sm:$0xff]   ;;  %v2184_v27 = vld [vmem:[%s2640_s8 + $0x124] ss:$8 sps:$4 sm:$0xff]   ;;  %v2188_v30 = vld [vmem:[%s2640_s8 + $0x34] ss:$8 sps:$4 sm:$0xff]  }
  0x68   : > { %v2186_v28 = vld [vmem:[%s2640_s8 + $0x20] ss:$8 sps:$4 sm:$0xff]   ;;  %v2190_v31 = vld [vmem:[%s2640_s8 + $0x134] ss:$8 sps:$4 sm:$0xff]   ;;  %v2192_v32 = vld [vmem:[%s2640_s8 + $0x30] ss:$8 sps:$4 sm:$0xff]  }
  0x69   : > { %1191 = vmatpush1.bf16.msra.mxu0 %v2156_v4  ;;  %2098 = vmatpush1.bf16.msra.mxu1 %v2156_v4  ;;  %v2187_v29 = vld [vmem:[%s2640_s8 + $0x120] ss:$8 sps:$4 sm:$0xff]   ;;  %v2193_v33 = vld [vmem:[%s2640_s8 + $0x130] ss:$8 sps:$4 sm:$0xff]   ;;  %v2194_v34 = vld [vmem:[%s2640_s8 + $0x44] ss:$8 sps:$4 sm:$0xff]  }
  0x6a   : > { %1192 = vmatprep.subr.bf16.mxu0 %v2435_v2  ;;  %2083 = vmatprep.subr.bf16.mxu1 %v2435_v2  ;;  %v2196_v35 = vld [vmem:[%s2640_s8 + $0x144] ss:$8 sps:$4 sm:$0xff]   ;;  %v2198_v36 = vld [vmem:[%s2640_s8 + $0x40] ss:$8 sps:$4 sm:$0xff]   ;;  %v2200_v38 = vld [vmem:[%s2640_s8 + $0x54] ss:$8 sps:$4 sm:$0xff]  }
  0x6b   : > { %v2199_v37 = vld [vmem:[%s2640_s8 + $0x140] ss:$8 sps:$4 sm:$0xff]   ;;  %v2202_v39 = vld [vmem:[%s2640_s8 + $0x154] ss:$8 sps:$4 sm:$0xff]   ;;  %v2204_v40 = vld [vmem:[%s2640_s8 + $0x50] ss:$8 sps:$4 sm:$0xff]  }
  0x6c   : > { %v2205_v41 = vld [vmem:[%s2640_s8 + $0x150] ss:$8 sps:$4 sm:$0xff]   ;;  %v2206_v42 = vld [vmem:[%s2640_s8 + $0x64] ss:$8 sps:$4 sm:$0xff]   ;;  %v2210_v44 = vld [vmem:[%s2640_s8 + $0x60] ss:$8 sps:$4 sm:$0xff]  }
  0x6d   : > { %1193 = vmatpush1.bf16.msra.mxu0 %v2157_v5  ;;  %2099 = vmatpush1.bf16.msra.mxu1 %v2157_v5  ;;  %v2208_v43 = vld [vmem:[%s2640_s8 + $0x164] ss:$8 sps:$4 sm:$0xff]   ;;  %v2211_v45 = vld [vmem:[%s2640_s8 + $0x160] ss:$8 sps:$4 sm:$0xff]   ;;  %v2212_v46 = vld [vmem:[%s2640_s8 + $0x74] ss:$8 sps:$4 sm:$0xff]  }
  0x6e   : > { %1194 = vmatprep.subr.bf16.mxu0 %v2435_v2  ;;  %2084 = vmatprep.subr.bf16.mxu1 %v2435_v2  ;;  %v2214_v47 = vld [vmem:[%s2640_s8 + $0x174] ss:$8 sps:$4 sm:$0xff]   ;;  %v2216_v48 = vld [vmem:[%s2640_s8 + $0x70] ss:$8 sps:$4 sm:$0xff]   ;;  %v2218_v50 = vld [vmem:[%s2640_s8 + $0x84] ss:$8 sps:$4 sm:$0xff]  }
  0x6f   : > { %v2217_v49 = vld [vmem:[%s2640_s8 + $0x170] ss:$8 sps:$4 sm:$0xff]   ;;  %v2220_v51 = vld [vmem:[%s2640_s8 + $0x184] ss:$8 sps:$4 sm:$0xff]   ;;  %v2222_v52 = vld [vmem:[%s2640_s8 + $0x80] ss:$8 sps:$4 sm:$0xff]  }
  0x70   : > { %v2223_v53 = vld [vmem:[%s2640_s8 + $0x180] ss:$8 sps:$4 sm:$0xff]   ;;  %v2224_v54 = vld [vmem:[%s2640_s8 + $0x94] ss:$8 sps:$4 sm:$0xff]   ;;  %v2228_v56 = vld [vmem:[%s2640_s8 + $0x90] ss:$8 sps:$4 sm:$0xff]  }
  0x71   : > { %1195 = vmatpush1.bf16.msra.mxu0 %v2158_v6  ;;  %2100 = vmatpush1.bf16.msra.mxu1 %v2158_v6  ;;  %v2226_v55 = vld [vmem:[%s2640_s8 + $0x194] ss:$8 sps:$4 sm:$0xff]   ;;  %v2229_v57 = vld [vmem:[%s2640_s8 + $0x190] ss:$8 sps:$4 sm:$0xff]   ;;  %v2230_v58 = vld [vmem:[%s2640_s8 + $0xa4] ss:$8 sps:$4 sm:$0xff]  }
  0x72   : > { %1196 = vmatprep.subr.bf16.mxu0 %v2435_v2  ;;  %2085 = vmatprep.subr.bf16.mxu1 %v2435_v2  ;;  %v2232_v59 = vld [vmem:[%s2640_s8 + $0x1a4] ss:$8 sps:$4 sm:$0xff]   ;;  %v2234_v60 = vld [vmem:[%s2640_s8 + $0xa0] ss:$8 sps:$4 sm:$0xff]   ;;  %v2236_v62 = vld [vmem:[%s2640_s8 + $0xb4] ss:$8 sps:$4 sm:$0xff]  }
  0x73   : > { %v2235_v61 = vld [vmem:[%s2640_s8 + $0x1a0] ss:$8 sps:$4 sm:$0xff]   ;;  %v2238_v63 = vld [vmem:[%s2640_s8 + $0x1b4] ss:$8 sps:$4 sm:$0xff]   ;;  %v2240_v0 = vld [vmem:[%s2640_s8 + $0xb0] ss:$8 sps:$4 sm:$0xff]  }
  0x74   : > { %v2241_v1 = vld [vmem:[%s2640_s8 + $0x1b0] ss:$8 sps:$4 sm:$0xff]   ;;  %v2244_v3 = vld [vmem:[%s2640_s8 + $0x1c4] ss:$8 sps:$4 sm:$0xff]   ;;  %v2246_v4 = vld [vmem:[%s2640_s8 + $0xc0] ss:$8 sps:$4 sm:$0xff]  }
  0x75   : > { %1197 = vmatpush1.bf16.msra.mxu0 %v2159_v8  ;;  %2101 = vmatpush1.bf16.msra.mxu1 %v2159_v8  ;;  %v2247_v5 = vld [vmem:[%s2640_s8 + $0x1c0] ss:$8 sps:$4 sm:$0xff]   ;;  %v2248_v6 = vld [vmem:[%s2640_s8 + $0xd4] ss:$8 sps:$4 sm:$0xff]   ;;  %v2252_v8 = vld [vmem:[%s2640_s8 + $0xd0] ss:$8 sps:$4 sm:$0xff]  }
  0x76   : > { %1198 = vmatprep.subr.bf16.mxu0 %v2435_v2  ;;  %2086 = vmatprep.subr.bf16.mxu1 %v2435_v2  ;;  %v2250_v7 = vld [vmem:[%s2640_s8 + $0x1d4] ss:$8 sps:$4 sm:$0xff]   ;;  %v2253_v9 = vld [vmem:[%s2640_s8 + $0x1d0] ss:$8 sps:$4 sm:$0xff]  }
  0x79   : > { %1199 = vmatpush1.bf16.msra.mxu0 %v2160_v10  ;;  %2102 = vmatpush1.bf16.msra.mxu1 %v2160_v10  ;;  %v2254_v10 = vld [vmem:[%s2640_s8 + $0xe4] ss:$8 sps:$4 sm:$0xff]  }
  0x7a   : > { %1200 = vmatprep.subr.bf16.mxu0 %v2435_v2  ;;  %2087 = vmatprep.subr.bf16.mxu1 %v2435_v2 }
  0x7d   : > { %1201 = vmatpush1.bf16.msra.mxu0 %v2161_v11  ;;  %2103 = vmatpush1.bf16.msra.mxu1 %v2161_v11  ;;  %v2256_v11 = vld [vmem:[%s2640_s8 + $0x1e4] ss:$8 sps:$4 sm:$0xff]  }
  0x7e   : > { %1202 = vmatprep.subr.bf16.mxu0 %v2435_v2  ;;  %2088 = vmatprep.subr.bf16.mxu1 %v2435_v2 }
  0x81   : > { %1203 = vmatpush2.bf16.msra.mxu0 %v2162_v12  ;;  %2104 = vmatpush2.bf16.msra.mxu1 %v2162_v12  ;;  %v2258_v12 = vld [vmem:[%s2640_s8 + $0xe0] ss:$8 sps:$4 sm:$0xff]  }
  0x82   : > { %1204 = vmatprep.subr.bf16.mxu0 %v2435_v2  ;;  %2089 = vmatprep.subr.bf16.mxu1 %v2435_v2 }
  0x85   : > { %1205 = vmatpush2.bf16.msra.mxu0 %v2163_v13  ;;  %2105 = vmatpush2.bf16.msra.mxu1 %v2163_v13  ;;  %v2259_v13 = vld [vmem:[%s2640_s8 + $0x1e0] ss:$8 sps:$4 sm:$0xff]  }
  0x86   : > { %1206 = vmatprep.subr.bf16.mxu0 %v2435_v2  ;;  %2090 = vmatprep.subr.bf16.mxu1 %v2435_v2 }
  0x89   : > { %1207 = vmatpush2.bf16.msra.mxu0 %v2164_v14  ;;  %2106 = vmatpush2.bf16.msra.mxu1 %v2164_v14  ;;  %v2260_v14 = vld [vmem:[%s2640_s8 + $0xf4] ss:$8 sps:$4 sm:$0xff]  }
  0x8a   : > { %1208 = vmatprep.subr.bf16.mxu0 %v2435_v2  ;;  %2091 = vmatprep.subr.bf16.mxu1 %v2435_v2 }
  0x8d   : > { %1209 = vmatpush2.bf16.msra.mxu0 %v2165_v15  ;;  %2107 = vmatpush2.bf16.msra.mxu1 %v2165_v15  ;;  %v2262_v15 = vld [vmem:[%s2640_s8 + $0x1f4] ss:$8 sps:$4 sm:$0xff]  }
  0x8e   : > { %1210 = vmatprep.subr.bf16.mxu0 %v2435_v2  ;;  %2092 = vmatprep.subr.bf16.mxu1 %v2435_v2 }
  0x91   : > { %1211 = vmatpush2.bf16.msra.mxu0 %v2166_v16  ;;  %2108 = vmatpush2.bf16.msra.mxu1 %v2166_v16  ;;  %v2264_v16 = vld [vmem:[%s2640_s8 + $0xf0] ss:$8 sps:$4 sm:$0xff]  }
  0x92   : > { %1212 = vmatprep.subr.bf16.mxu0 %v2435_v2  ;;  %2093 = vmatprep.subr.bf16.mxu1 %v2435_v2 }
  0x95   : > { %1213 = vmatpush2.bf16.msra.mxu0 %v2167_v17  ;;  %2109 = vmatpush2.bf16.msra.mxu1 %v2167_v17  ;;  %v2265_v17 = vld [vmem:[%s2640_s8 + $0x1f0] ss:$8 sps:$4 sm:$0xff]  }
  0x96   : > { %1214 = vmatprep.subr.bf16.mxu0 %v2435_v2  ;;  %2094 = vmatprep.subr.bf16.mxu1 %v2435_v2 }
  0x99   : > { %1215 = vmatpush2.bf16.msra.mxu0 %v2168_v18  ;;  %2110 = vmatpush2.bf16.msra.mxu1 %v2168_v18  ;;  %v610_v18 = vld [vmem:[#allocation2 + $0xb0] sm:$0xff] }
  0x9a   : > { %1216 = vmatprep.subr.bf16.mxu0 %v2435_v2  ;;  %2095 = vmatprep.subr.bf16.mxu1 %v2435_v2  ;;  %v2242_v2 = vld [vmem:[%s2640_s8 + $0xc4] ss:$8 sps:$4 sm:$0xff]  }
  0x9d   : > { %1217 = vmatpush2.bf16.msra.mxu0 %v2169_v19  ;;  %2111 = vmatpush2.bf16.msra.mxu1 %v2169_v19  ;;  %v642_v19 = vld [vmem:[#allocation2 + $0x148] sm:$0xff] }
  0xa0   : > { %1219 = vmatmul.mubr.bf16.vlgmr.msra.gmra.mxu0 %v2170_v20  ;;  %1347 = vmatmul.mubr.bf16.vlgmr.msra.gmra.mxu1 %v2173_v21 }
  0xa1   : > { %1226 = vmatprep.mubr.bf16.mxu0 %v2176_v22  ;;  %1354 = vmatprep.mubr.bf16.mxu1 %v2178_v23 }
  0xa8   : > { %1227 = vmatmul.mubr.bf16.gmra.mxu0 %v2180_v24  ;;  %1355 = vmatmul.mubr.bf16.gmra.mxu1 %v2181_v25 }
  0xa9   : > { %1234 = vmatprep.mubr.bf16.mxu0 %v2182_v26  ;;  %1362 = vmatprep.mubr.bf16.mxu1 %v2184_v27  ;;  %v611_v26 = vld [vmem:[#allocation2 + $0x1b0] sm:$0xff] }
  0xaa   : > { %v643_v27 = vld [vmem:[#allocation2 + $0x1d0] sm:$0xff] }
  0xb0   : > { %1235 = vmatmul.mubr.bf16.gmra.mxu0 %v2186_v28  ;;  %1363 = vmatmul.mubr.bf16.gmra.mxu1 %v2187_v29 }
  0xb1   : > { %1242 = vmatprep.mubr.bf16.mxu0 %v2188_v30  ;;  %1370 = vmatprep.mubr.bf16.mxu1 %v2190_v31 }
  0xb8   : > { %1243 = vmatmul.mubr.bf16.gmra.mxu0 %v2192_v32  ;;  %1371 = vmatmul.mubr.bf16.gmra.mxu1 %v2193_v33 }
  0xb9   : > { %1250 = vmatprep.mubr.bf16.mxu0 %v2194_v34  ;;  %1378 = vmatprep.mubr.bf16.mxu1 %v2196_v35  ;;  %v612_v34 = vld [vmem:[#allocation2 + $0xd8] sm:$0xff]  ;;  %v644_v35 = vld [vmem:[#allocation2 + $0x100] sm:$0xff] }
  0xc0   : > { %1251 = vmatmul.mubr.bf16.gmra.mxu0 %v2198_v36  ;;  %1379 = vmatmul.mubr.bf16.gmra.mxu1 %v2199_v37 }
  0xc1   : > { %1258 = vmatprep.mubr.bf16.mxu0 %v2200_v38  ;;  %1386 = vmatprep.mubr.bf16.mxu1 %v2202_v39 }
  0xc8   : > { %1259 = vmatmul.mubr.bf16.gmra.mxu0 %v2204_v40  ;;  %1387 = vmatmul.mubr.bf16.gmra.mxu1 %v2205_v41 }
  0xc9   : > { %1266 = vmatprep.mubr.bf16.mxu0 %v2206_v42  ;;  %1394 = vmatprep.mubr.bf16.mxu1 %v2208_v43  ;;  %v613_v42 = vld [vmem:[#allocation2 + $0x18] sm:$0xff]  ;;  %v645_v43 = vld [vmem:[#allocation2 + $0xc8] sm:$0xff] }
  0xd0   : > { %1267 = vmatmul.mubr.bf16.gmra.mxu0 %v2210_v44  ;;  %1395 = vmatmul.mubr.bf16.gmra.mxu1 %v2211_v45 }
  0xd1   : > { %1274 = vmatprep.mubr.bf16.mxu0 %v2212_v46  ;;  %1402 = vmatprep.mubr.bf16.mxu1 %v2214_v47 }
  0xd8   : > { %1275 = vmatmul.mubr.bf16.gmra.mxu0 %v2216_v48  ;;  %1403 = vmatmul.mubr.bf16.gmra.mxu1 %v2217_v49 }
  0xd9   : > { %1282 = vmatprep.mubr.bf16.mxu0 %v2218_v50  ;;  %1410 = vmatprep.mubr.bf16.mxu1 %v2220_v51  ;;  %v614_v50 = vld [vmem:[#allocation2 + $0x50] sm:$0xff]  ;;  %v646_v51 = vld [vmem:[#allocation2 + $0x40] sm:$0xff] }
  0xe0   : > { %1283 = vmatmul.mubr.bf16.gmra.mxu0 %v2222_v52  ;;  %1411 = vmatmul.mubr.bf16.gmra.mxu1 %v2223_v53 }
  0xe1   : > { %1290 = vmatprep.mubr.bf16.mxu0 %v2224_v54  ;;  %1418 = vmatprep.mubr.bf16.mxu1 %v2226_v55 }
  0xe8   : > { %1291 = vmatmul.mubr.bf16.gmra.mxu0 %v2228_v56  ;;  %1419 = vmatmul.mubr.bf16.gmra.mxu1 %v2229_v57 }
  0xe9   : > { %1298 = vmatprep.mubr.bf16.mxu0 %v2230_v58  ;;  %1426 = vmatprep.mubr.bf16.mxu1 %v2232_v59  ;;  %v615_v58 = vld [vmem:[#allocation2 + $0x168] sm:$0xff]  ;;  %v647_v59 = vld [vmem:[#allocation2 + $0x1f8] sm:$0xff] }
  0xf0   : > { %1299 = vmatmul.mubr.bf16.gmra.mxu0 %v2234_v60  ;;  %1427 = vmatmul.mubr.bf16.gmra.mxu1 %v2235_v61 }
  0xf1   : > { %1306 = vmatprep.mubr.bf16.mxu0 %v2236_v62  ;;  %1434 = vmatprep.mubr.bf16.mxu1 %v2238_v63 }
  0xf8   : > { %1307 = vmatmul.mubr.bf16.gmra.mxu0 %v2240_v0  ;;  %1435 = vmatmul.mubr.bf16.gmra.mxu1 %v2241_v1 }
  0xf9   : > { %1314 = vmatprep.mubr.bf16.mxu0 %v2242_v2  ;;  %1442 = vmatprep.mubr.bf16.mxu1 %v2244_v3  ;;  %v616_v2 = vld [vmem:[#allocation2 + $0x130] sm:$0xff]  ;;  %v648_v3 = vld [vmem:[#allocation2 + $0x20] sm:$0xff] }
 0x100   : > { %1315 = vmatmul.mubr.bf16.gmra.mxu0 %v2246_v4  ;;  %1443 = vmatmul.mubr.bf16.gmra.mxu1 %v2247_v5 }
 0x101   : > { %1322 = vmatprep.mubr.bf16.mxu0 %v2248_v6  ;;  %1450 = vmatprep.mubr.bf16.mxu1 %v2250_v7 }
 0x108   : > { %1323 = vmatmul.mubr.bf16.gmra.mxu0 %v2252_v8  ;;  %1451 = vmatmul.mubr.bf16.gmra.mxu1 %v2253_v9 }
 0x109   : > { %1330 = vmatprep.mubr.bf16.mxu0 %v2254_v10  ;;  %1458 = vmatprep.mubr.bf16.mxu1 %v2256_v11  ;;  %v617_v10 = vld [vmem:[#allocation2 + $0x48] sm:$0xff] }
 0x10a   : > { %v649_v11 = vld [vmem:[#allocation2 + $0x128] sm:$0xff] }
 0x110   : > { %1331 = vmatmul.mubr.bf16.gmra.mxu0 %v2258_v12  ;;  %1459 = vmatmul.mubr.bf16.gmra.mxu1 %v2259_v13 }
 0x111   : > { %1338 = vmatprep.mubr.bf16.mxu0 %v2260_v14  ;;  %1466 = vmatprep.mubr.bf16.mxu1 %v2262_v15 }
 0x118   : > { %1339 = vmatmul.mubr.bf16.gmra.mxu0 %v2264_v16  ;;  %1467 = vmatmul.mubr.bf16.gmra.mxu1 %v2265_v17 }
 0x160   : > { %v1220_v20 = vpop.f32.mrf.mxu0  ;;  %v1348_v21 = vpop.f32.mrf.mxu1 }
 0x161   : > { %v1475_v22 = vadd.f32 %v1220_v20, %v610_v18  ;;  %v1507_v23 = vadd.f32 %v1348_v21, %v642_v19  ;;  %v618_v18 = vld [vmem:[#allocation2 + $0x180] sm:$0xff] }
 0x162   : > { %v1222_v24 = vpop.f32.mrf.mxu0  ;;  %v1350_v25 = vpop.f32.mrf.mxu1  ;;  %v650_v19 = vld [vmem:[#allocation2 + $0x1a0] sm:$0xff] }
 0x163   : > { %1539 = vst [vmem:[#allocation2 + $0xb0] sm:$0xff] %v1475_v22  ;;  %1571 = vst [vmem:[#allocation2 + $0x148] sm:$0xff] %v1507_v23 }
 0x164   : > { %v1223_v28 = vpop.f32.mrf.mxu0  ;;  %v1351_v29 = vpop.f32.mrf.mxu1 }
 0x165   : > { %v1476_v30 = vadd.f32 %v1223_v28, %v611_v26  ;;  %v1508_v31 = vadd.f32 %v1351_v29, %v643_v27  ;;  %v619_v26 = vld [vmem:[#allocation2 + $0x110] sm:$0xff] }
 0x166   : > { %v1225_v32 = vpop.f32.mrf.mxu0  ;;  %v1353_v33 = vpop.f32.mrf.mxu1  ;;  %v651_v27 = vld [vmem:[#allocation2 + $0x1f0] sm:$0xff] }
 0x167   : > { %1540 = vst [vmem:[#allocation2 + $0x1b0] sm:$0xff] %v1476_v30  ;;  %1572 = vst [vmem:[#allocation2 + $0x1d0] sm:$0xff] %v1508_v31 }
 0x168   : > { %v1228_v36 = vpop.f32.mrf.mxu0  ;;  %v1356_v37 = vpop.f32.mrf.mxu1 }
 0x169   : > { %v1477_v38 = vadd.f32 %v1228_v36, %v612_v34  ;;  %v1509_v39 = vadd.f32 %v1356_v37, %v644_v35  ;;  %v620_v34 = vld [vmem:[#allocation2 + $0x118] sm:$0xff]  ;;  %v652_v35 = vld [vmem:[#allocation2 + $0xe8] sm:$0xff] }
 0x16a   : > { %v1230_v40 = vpop.f32.mrf.mxu0  ;;  %v1358_v41 = vpop.f32.mrf.mxu1 }
 0x16b   : > { %1541 = vst [vmem:[#allocation2 + $0xd8] sm:$0xff] %v1477_v38  ;;  %1573 = vst [vmem:[#allocation2 + $0x100] sm:$0xff] %v1509_v39 }
 0x16c   : > { %v1231_v44 = vpop.f32.mrf.mxu0  ;;  %v1359_v45 = vpop.f32.mrf.mxu1 }
 0x16d   : > { %v1478_v46 = vadd.f32 %v1231_v44, %v613_v42  ;;  %v1510_v47 = vadd.f32 %v1359_v45, %v645_v43  ;;  %v621_v42 = vld [vmem:[#allocation2 + $0x98] sm:$0xff] }
 0x16e   : > { %v1233_v48 = vpop.f32.mrf.mxu0  ;;  %v1361_v49 = vpop.f32.mrf.mxu1  ;;  %v653_v43 = vld [vmem:[#allocation2 + $0x78] sm:$0xff] }
 0x16f   : > { %1542 = vst [vmem:[#allocation2 + $0x18] sm:$0xff] %v1478_v46  ;;  %1574 = vst [vmem:[#allocation2 + $0xc8] sm:$0xff] %v1510_v47 }
 0x170   : > { %v1236_v52 = vpop.f32.mrf.mxu0  ;;  %v1364_v53 = vpop.f32.mrf.mxu1 }
 0x171   : > { %v1479_v54 = vadd.f32 %v1236_v52, %v614_v50  ;;  %v1511_v55 = vadd.f32 %v1364_v53, %v646_v51  ;;  %v622_v50 = vld [vmem:[#allocation2 + $0x120] sm:$0xff]  ;;  %v654_v51 = vld [vmem:[#allocation2 + $0x70] sm:$0xff] }
 0x172   : > { %v1238_v56 = vpop.f32.mrf.mxu0  ;;  %v1366_v57 = vpop.f32.mrf.mxu1 }
 0x173   : > { %1543 = vst [vmem:[#allocation2 + $0x50] sm:$0xff] %v1479_v54  ;;  %1575 = vst [vmem:[#allocation2 + $0x40] sm:$0xff] %v1511_v55 }
 0x174   : > { %v1239_v60 = vpop.f32.mrf.mxu0  ;;  %v1367_v61 = vpop.f32.mrf.mxu1 }
 0x175   : > { %v1480_v62 = vadd.f32 %v1239_v60, %v615_v58  ;;  %v1512_v63 = vadd.f32 %v1367_v61, %v647_v59  ;;  %v623_v58 = vld [vmem:[#allocation2 + $0x150] sm:$0xff] }
 0x176   : > { %v1241_v0 = vpop.f32.mrf.mxu0  ;;  %v1369_v1 = vpop.f32.mrf.mxu1  ;;  %v655_v59 = vld [vmem:[#allocation2 + $0x90] sm:$0xff] }
 0x177   : > { %1544 = vst [vmem:[#allocation2 + $0x168] sm:$0xff] %v1480_v62  ;;  %1576 = vst [vmem:[#allocation2 + $0x1f8] sm:$0xff] %v1512_v63 }
 0x178   : > { %v1244_v4 = vpop.f32.mrf.mxu0  ;;  %v1372_v5 = vpop.f32.mrf.mxu1 }
 0x179   : > { %v1481_v6 = vadd.f32 %v1244_v4, %v616_v2  ;;  %v1513_v7 = vadd.f32 %v1372_v5, %v648_v3  ;;  %v624_v2 = vld [vmem:[#allocation2 + $0x108] sm:$0xff]  ;;  %v656_v3 = vld [vmem:[#allocation2 + $0x1d8] sm:$0xff] }
 0x17a   : > { %v1246_v8 = vpop.f32.mrf.mxu0  ;;  %v1374_v9 = vpop.f32.mrf.mxu1 }
 0x17b   : > { %1545 = vst [vmem:[#allocation2 + $0x130] sm:$0xff] %v1481_v6  ;;  %1577 = vst [vmem:[#allocation2 + $0x20] sm:$0xff] %v1513_v7 }
 0x17c   : > { %v1247_v12 = vpop.f32.mrf.mxu0  ;;  %v1375_v13 = vpop.f32.mrf.mxu1 }
 0x17d   : > { %v1482_v14 = vadd.f32 %v1247_v12, %v617_v10  ;;  %v1514_v15 = vadd.f32 %v1375_v13, %v649_v11  ;;  %v625_v10 = vld [vmem:[#allocation2 + $0x60] sm:$0xff]  ;;  %v657_v11 = vld [vmem:[#allocation2 + $0xd0] sm:$0xff] }
 0x17e   : > { %v1249_v16 = vpop.f32.mrf.mxu0  ;;  %v1377_v17 = vpop.f32.mrf.mxu1 }
 0x17f   : > { %1546 = vst [vmem:[#allocation2 + $0x48] sm:$0xff] %v1482_v14  ;;  %1578 = vst [vmem:[#allocation2 + $0x128] sm:$0xff] %v1514_v15 }
 0x180   : > { %v1252_v20 = vpop.f32.mrf.mxu0  ;;  %v1380_v21 = vpop.f32.mrf.mxu1 }
 0x181   : > { %v1483_v22 = vadd.f32 %v1252_v20, %v618_v18  ;;  %v1515_v23 = vadd.f32 %v1380_v21, %v650_v19  ;;  %v626_v18 = vld [vmem:[#allocation2 + $0xe0] sm:$0xff]  ;;  %v658_v19 = vld [vmem:[#allocation2 + $0xb8] sm:$0xff] }
 0x182   : > { %v1254_v24 = vpop.f32.mrf.mxu0  ;;  %v1382_v25 = vpop.f32.mrf.mxu1 }
 0x183   : > { %1547 = vst [vmem:[#allocation2 + $0x180] sm:$0xff] %v1483_v22  ;;  %1579 = vst [vmem:[#allocation2 + $0x1a0] sm:$0xff] %v1515_v23 }
 0x184   : > { %v1255_v28 = vpop.f32.mrf.mxu0  ;;  %v1383_v29 = vpop.f32.mrf.mxu1 }
 0x185   : > { %v1484_v30 = vadd.f32 %v1255_v28, %v619_v26  ;;  %v1516_v31 = vadd.f32 %v1383_v29, %v651_v27  ;;  %v627_v26 = vld [vmem:[#allocation2 + $0x188] sm:$0xff] }
 0x186   : > { %v1257_v32 = vpop.f32.mrf.mxu0  ;;  %v1385_v33 = vpop.f32.mrf.mxu1  ;;  %v659_v27 = vld [vmem:[#allocation2 + $0x88] sm:$0xff] }
 0x187   : > { %1548 = vst [vmem:[#allocation2 + $0x110] sm:$0xff] %v1484_v30  ;;  %1580 = vst [vmem:[#allocation2 + $0x1f0] sm:$0xff] %v1516_v31 }
 0x188   : > { %v1260_v36 = vpop.f32.mrf.mxu0  ;;  %v1388_v37 = vpop.f32.mrf.mxu1 }
 0x189   : > { %v1485_v38 = vadd.f32 %v1260_v36, %v620_v34  ;;  %v1517_v39 = vadd.f32 %v1388_v37, %v652_v35  ;;  %v628_v34 = vld [vmem:[#allocation2 + $0x138] sm:$0xff]  ;;  %v660_v35 = vld [vmem:[#allocation2 + $0xa8] sm:$0xff] }
 0x18a   : > { %v1262_v40 = vpop.f32.mrf.mxu0  ;;  %v1390_v41 = vpop.f32.mrf.mxu1 }
 0x18b   : > { %1549 = vst [vmem:[#allocation2 + $0x118] sm:$0xff] %v1485_v38  ;;  %1581 = vst [vmem:[#allocation2 + $0xe8] sm:$0xff] %v1517_v39 }
 0x18c   : > { %v1263_v44 = vpop.f32.mrf.mxu0  ;;  %v1391_v45 = vpop.f32.mrf.mxu1 }
 0x18d   : > { %v1486_v46 = vadd.f32 %v1263_v44, %v621_v42  ;;  %v1518_v47 = vadd.f32 %v1391_v45, %v653_v43  ;;  %v629_v42 = vld [vmem:[#allocation2 + $0x140] sm:$0xff]  ;;  %v661_v43 = vld [vmem:[#allocation2 + $0x1c8] sm:$0xff] }
 0x18e   : > { %v1265_v48 = vpop.f32.mrf.mxu0  ;;  %v1393_v49 = vpop.f32.mrf.mxu1 }
 0x18f   : > { %1550 = vst [vmem:[#allocation2 + $0x98] sm:$0xff] %v1486_v46  ;;  %1582 = vst [vmem:[#allocation2 + $0x78] sm:$0xff] %v1518_v47 }
 0x190   : > { %v1268_v52 = vpop.f32.mrf.mxu0  ;;  %v1396_v53 = vpop.f32.mrf.mxu1 }
 0x191   : > { %v1487_v54 = vadd.f32 %v1268_v52, %v622_v50  ;;  %v1519_v55 = vadd.f32 %v1396_v53, %v654_v51  ;;  %v630_v50 = vld [vmem:[#allocation2 + $0x80] sm:$0xff]  ;;  %v662_v51 = vld [vmem:[#allocation2 + $0x170] sm:$0xff] }
 0x192   : > { %v1270_v56 = vpop.f32.mrf.mxu0  ;;  %v1398_v57 = vpop.f32.mrf.mxu1 }
 0x193   : > { %1551 = vst [vmem:[#allocation2 + $0x120] sm:$0xff] %v1487_v54  ;;  %1583 = vst [vmem:[#allocation2 + $0x70] sm:$0xff] %v1519_v55 }
 0x194   : > { %v1271_v60 = vpop.f32.mrf.mxu0  ;;  %v1399_v61 = vpop.f32.mrf.mxu1 }
 0x195   : > { %v1488_v62 = vadd.f32 %v1271_v60, %v623_v58  ;;  %v1520_v63 = vadd.f32 %v1399_v61, %v655_v59  ;;  %v631_v58 = vld [vmem:[#allocation2 + $0x1a8] sm:$0xff]  ;;  %v663_v59 = vld [vmem:[#allocation2 + $0x178] sm:$0xff] }
 0x196   : > { %v1273_v0 = vpop.f32.mrf.mxu0  ;;  %v1401_v1 = vpop.f32.mrf.mxu1 }
 0x197   : > { %1552 = vst [vmem:[#allocation2 + $0x150] sm:$0xff] %v1488_v62  ;;  %1584 = vst [vmem:[#allocation2 + $0x90] sm:$0xff] %v1520_v63 }
 0x198   : > { %v1276_v4 = vpop.f32.mrf.mxu0  ;;  %v1404_v5 = vpop.f32.mrf.mxu1 }
 0x199   : > { %v1489_v6 = vadd.f32 %v1276_v4, %v624_v2  ;;  %v1521_v7 = vadd.f32 %v1404_v5, %v656_v3  ;;  %v632_v2 = vld [vmem:[#allocation2 + $0x1b8] sm:$0xff]  ;;  %v664_v3 = vld [vmem:[#allocation2 + $0x68] sm:$0xff] }
 0x19a   : > { %v1278_v8 = vpop.f32.mrf.mxu0  ;;  %v1406_v9 = vpop.f32.mrf.mxu1 }
 0x19b   : > { %1553 = vst [vmem:[#allocation2 + $0x108] sm:$0xff] %v1489_v6  ;;  %1585 = vst [vmem:[#allocation2 + $0x1d8] sm:$0xff] %v1521_v7 }
 0x19c   : > { %v1279_v12 = vpop.f32.mrf.mxu0  ;;  %v1407_v13 = vpop.f32.mrf.mxu1 }
 0x19d   : > { %v1490_v14 = vadd.f32 %v1279_v12, %v625_v10  ;;  %v1522_v15 = vadd.f32 %v1407_v13, %v657_v11  ;;  %v633_v10 = vld [vmem:[#allocation2 + $0x28] sm:$0xff]  ;;  %v665_v11 = vld [vmem:[#allocation2 + $0x190] sm:$0xff] }
 0x19e   : > { %v1281_v16 = vpop.f32.mrf.mxu0  ;;  %v1409_v17 = vpop.f32.mrf.mxu1 }
 0x19f   : > { %1554 = vst [vmem:[#allocation2 + $0x60] sm:$0xff] %v1490_v14  ;;  %1586 = vst [vmem:[#allocation2 + $0xd0] sm:$0xff] %v1522_v15 }
 0x1a0   : > { %v1284_v20 = vpop.f32.mrf.mxu0  ;;  %v1412_v21 = vpop.f32.mrf.mxu1 }
 0x1a1   : > { %v1491_v22 = vadd.f32 %v1284_v20, %v626_v18  ;;  %v1523_v23 = vadd.f32 %v1412_v21, %v658_v19  ;;  %v634_v18 = vld [vmem:[#allocation2 + $0x1e8] sm:$0xff]  ;;  %v666_v19 = vld [vmem:[#allocation2 + $0x198] sm:$0xff] }
 0x1a2   : > { %v1286_v24 = vpop.f32.mrf.mxu0  ;;  %v1414_v25 = vpop.f32.mrf.mxu1 }
 0x1a3   : > { %1555 = vst [vmem:[#allocation2 + $0xe0] sm:$0xff] %v1491_v22  ;;  %1587 = vst [vmem:[#allocation2 + $0xb8] sm:$0xff] %v1523_v23 }
 0x1a4   : > { %v1287_v28 = vpop.f32.mrf.mxu0  ;;  %v1415_v29 = vpop.f32.mrf.mxu1 }
 0x1a5   : > { %v1492_v30 = vadd.f32 %v1287_v28, %v627_v26  ;;  %v1524_v31 = vadd.f32 %v1415_v29, %v659_v27  ;;  %v635_v26 = vld [vmem:[#allocation2 + $0xf8] sm:$0xff] }
 0x1a6   : > { %v1289_v32 = vpop.f32.mrf.mxu0  ;;  %v1417_v33 = vpop.f32.mrf.mxu1  ;;  %v667_v27 = vld [vmem:[#allocation2 + $0x38] sm:$0xff] }
 0x1a7   : > { %1556 = vst [vmem:[#allocation2 + $0x188] sm:$0xff] %v1492_v30  ;;  %1588 = vst [vmem:[#allocation2 + $0x88] sm:$0xff] %v1524_v31 }
 0x1a8   : > { %v1292_v36 = vpop.f32.mrf.mxu0  ;;  %v1420_v37 = vpop.f32.mrf.mxu1 }
 0x1a9   : > { %v1493_v38 = vadd.f32 %v1292_v36, %v628_v34  ;;  %v1525_v39 = vadd.f32 %v1420_v37, %v660_v35  ;;  %v636_v34 = vld [vmem:[#allocation2 + $0x160] sm:$0xff] }
 0x1aa   : > { %v1294_v40 = vpop.f32.mrf.mxu0  ;;  %v1422_v41 = vpop.f32.mrf.mxu1  ;;  %v668_v35 = vld [vmem:[#allocation2 + $0xc0] sm:$0xff] }
 0x1ab   : > { %1557 = vst [vmem:[#allocation2 + $0x138] sm:$0xff] %v1493_v38  ;;  %1589 = vst [vmem:[#allocation2 + $0xa8] sm:$0xff] %v1525_v39 }
 0x1ac   : > { %v1295_v44 = vpop.f32.mrf.mxu0  ;;  %v1423_v45 = vpop.f32.mrf.mxu1 }
 0x1ad   : > { %v1494_v46 = vadd.f32 %v1295_v44, %v629_v42  ;;  %v1526_v47 = vadd.f32 %v1423_v45, %v661_v43  ;;  %v637_v42 = vld [vmem:[#allocation2 + $0x30] sm:$0xff]  ;;  %v669_v43 = vld [vmem:[#allocation2 + $0x1c0] sm:$0xff] }
 0x1ae   : > { %v1297_v48 = vpop.f32.mrf.mxu0  ;;  %v1425_v49 = vpop.f32.mrf.mxu1 }
 0x1af   : > { %1558 = vst [vmem:[#allocation2 + $0x140] sm:$0xff] %v1494_v46  ;;  %1590 = vst [vmem:[#allocation2 + $0x1c8] sm:$0xff] %v1526_v47 }
 0x1b0   : > { %v1300_v52 = vpop.f32.mrf.mxu0  ;;  %v1428_v53 = vpop.f32.mrf.mxu1 }
 0x1b1   : > { %v1495_v54 = vadd.f32 %v1300_v52, %v630_v50  ;;  %v1527_v55 = vadd.f32 %v1428_v53, %v662_v51  ;;  %v638_v50 = vld [vmem:[#allocation2 + $0x1e0] sm:$0xff]  ;;  %v670_v51 = vld [vmem:[#allocation2 + $0x158] sm:$0xff] }
 0x1b2   : > { %v1302_v56 = vpop.f32.mrf.mxu0  ;;  %v1430_v57 = vpop.f32.mrf.mxu1 }
 0x1b3   : > { %1559 = vst [vmem:[#allocation2 + $0x80] sm:$0xff] %v1495_v54  ;;  %1591 = vst [vmem:[#allocation2 + $0x170] sm:$0xff] %v1527_v55 }
 0x1b4   : > { %v1303_v60 = vpop.f32.mrf.mxu0  ;;  %v1431_v61 = vpop.f32.mrf.mxu1 }
 0x1b5   : > { %v1496_v62 = vadd.f32 %v1303_v60, %v631_v58  ;;  %v1528_v63 = vadd.f32 %v1431_v61, %v663_v59  ;;  %v639_v58 = vld [vmem:[#allocation2] sm:$0xff]  ;;  %v671_v59 = vld [vmem:[#allocation2 + $0x10] sm:$0xff] }
 0x1b6   : > { %v1305_v0 = vpop.f32.mrf.mxu0  ;;  %v1433_v1 = vpop.f32.mrf.mxu1 }
 0x1b7   : > { %1560 = vst [vmem:[#allocation2 + $0x1a8] sm:$0xff] %v1496_v62  ;;  %1592 = vst [vmem:[#allocation2 + $0x178] sm:$0xff] %v1528_v63 }
 0x1b8   : > { %v1308_v4 = vpop.f32.mrf.mxu0  ;;  %v1436_v5 = vpop.f32.mrf.mxu1 }
 0x1b9   : > { %v1497_v6 = vadd.f32 %v1308_v4, %v632_v2  ;;  %v1529_v7 = vadd.f32 %v1436_v5, %v664_v3  ;;  %v640_v2 = vld [vmem:[#allocation2 + $0xf0] sm:$0xff]  ;;  %v672_v3 = vld [vmem:[#allocation2 + $0x58] sm:$0xff] }
 0x1ba   : > { %v1310_v8 = vpop.f32.mrf.mxu0  ;;  %v1438_v9 = vpop.f32.mrf.mxu1 }
 0x1bb   : > { %1561 = vst [vmem:[#allocation2 + $0x1b8] sm:$0xff] %v1497_v6  ;;  %1593 = vst [vmem:[#allocation2 + $0x68] sm:$0xff] %v1529_v7 }
 0x1bc   : > { %v1311_v12 = vpop.f32.mrf.mxu0  ;;  %v1439_v13 = vpop.f32.mrf.mxu1 }
 0x1bd   : > { %v1498_v14 = vadd.f32 %v1311_v12, %v633_v10  ;;  %v1530_v15 = vadd.f32 %v1439_v13, %v665_v11  ;;  %v641_v10 = vld [vmem:[#allocation2 + $0x8] sm:$0xff]  ;;  %v673_v11 = vld [vmem:[#allocation2 + $0xa0] sm:$0xff] }
 0x1be   : > { %v1313_v16 = vpop.f32.mrf.mxu0  ;;  %v1441_v17 = vpop.f32.mrf.mxu1 }
 0x1bf   : > { %1562 = vst [vmem:[#allocation2 + $0x28] sm:$0xff] %v1498_v14  ;;  %1594 = vst [vmem:[#allocation2 + $0x190] sm:$0xff] %v1530_v15 }
 0x1c0   : > { %v1316_v20 = vpop.f32.mrf.mxu0  ;;  %v1444_v21 = vpop.f32.mrf.mxu1 }
 0x1c1   : > { %v1499_v22 = vadd.f32 %v1316_v20, %v634_v18  ;;  %v1531_v23 = vadd.f32 %v1444_v21, %v666_v19 }
 0x1c2   : > { %v1318_v24 = vpop.f32.mrf.mxu0  ;;  %v1446_v25 = vpop.f32.mrf.mxu1 }
 0x1c3   : > { %1563 = vst [vmem:[#allocation2 + $0x1e8] sm:$0xff] %v1499_v22  ;;  %1595 = vst [vmem:[#allocation2 + $0x198] sm:$0xff] %v1531_v23 }
 0x1c4   : > { %v1319_v28 = vpop.f32.mrf.mxu0  ;;  %v1447_v29 = vpop.f32.mrf.mxu1 }
 0x1c5   : > { %v1500_v30 = vadd.f32 %v1319_v28, %v635_v26  ;;  %v1532_v31 = vadd.f32 %v1447_v29, %v667_v27 }
 0x1c6   : > { %v1321_v32 = vpop.f32.mrf.mxu0  ;;  %v1449_v33 = vpop.f32.mrf.mxu1 }
 0x1c7   : > { %1564 = vst [vmem:[#allocation2 + $0xf8] sm:$0xff] %v1500_v30  ;;  %1596 = vst [vmem:[#allocation2 + $0x38] sm:$0xff] %v1532_v31 }
 0x1c8   : > { %v1324_v36 = vpop.f32.mrf.mxu0  ;;  %v1452_v37 = vpop.f32.mrf.mxu1 }
 0x1c9   : > { %v1501_v38 = vadd.f32 %v1324_v36, %v636_v34  ;;  %v1533_v39 = vadd.f32 %v1452_v37, %v668_v35 }
 0x1ca   : > { %v1326_v40 = vpop.f32.mrf.mxu0  ;;  %v1454_v41 = vpop.f32.mrf.mxu1 }
 0x1cb   : > { %1565 = vst [vmem:[#allocation2 + $0x160] sm:$0xff] %v1501_v38  ;;  %1597 = vst [vmem:[#allocation2 + $0xc0] sm:$0xff] %v1533_v39 }
 0x1cc   : > { %v1327_v44 = vpop.f32.mrf.mxu0  ;;  %v1455_v45 = vpop.f32.mrf.mxu1 }
 0x1cd   : > { %v1502_v46 = vadd.f32 %v1327_v44, %v637_v42  ;;  %v1534_v47 = vadd.f32 %v1455_v45, %v669_v43 }
 0x1ce   : > { %v1329_v48 = vpop.f32.mrf.mxu0  ;;  %v1457_v49 = vpop.f32.mrf.mxu1 }
 0x1cf   : > { %1566 = vst [vmem:[#allocation2 + $0x30] sm:$0xff] %v1502_v46  ;;  %1598 = vst [vmem:[#allocation2 + $0x1c0] sm:$0xff] %v1534_v47 }
 0x1d0   : > { %v1332_v52 = vpop.f32.mrf.mxu0  ;;  %v1460_v53 = vpop.f32.mrf.mxu1 }
 0x1d1   : > { %v1503_v54 = vadd.f32 %v1332_v52, %v638_v50  ;;  %v1535_v55 = vadd.f32 %v1460_v53, %v670_v51 }
 0x1d2   : > { %v1334_v56 = vpop.f32.mrf.mxu0  ;;  %v1462_v57 = vpop.f32.mrf.mxu1 }
 0x1d3   : > { %1567 = vst [vmem:[#allocation2 + $0x1e0] sm:$0xff] %v1503_v54  ;;  %1599 = vst [vmem:[#allocation2 + $0x158] sm:$0xff] %v1535_v55 }
 0x1d4   : > { %v1335_v60 = vpop.f32.mrf.mxu0  ;;  %v1463_v61 = vpop.f32.mrf.mxu1 }
 0x1d5   : > { %v1504_v62 = vadd.f32 %v1335_v60, %v639_v58  ;;  %v1536_v63 = vadd.f32 %v1463_v61, %v671_v59 }
 0x1d6   : > { %v1337_v0 = vpop.f32.mrf.mxu0  ;;  %v1465_v1 = vpop.f32.mrf.mxu1 }
 0x1d7   : > { %1568 = vst [vmem:[#allocation2] sm:$0xff] %v1504_v62  ;;  %1600 = vst [vmem:[#allocation2 + $0x10] sm:$0xff] %v1536_v63 }
 0x1d8   : > { %v1340_v4 = vpop.f32.mrf.mxu0  ;;  %v1468_v5 = vpop.f32.mrf.mxu1 }
 0x1d9   : > { %v1505_v6 = vadd.f32 %v1340_v4, %v640_v2  ;;  %v1537_v7 = vadd.f32 %v1468_v5, %v672_v3 }
 0x1da   : > { %v1342_v8 = vpop.f32.mrf.mxu0  ;;  %v1470_v9 = vpop.f32.mrf.mxu1 }
 0x1db   : > { %1569 = vst [vmem:[#allocation2 + $0xf0] sm:$0xff] %v1505_v6  ;;  %1601 = vst [vmem:[#allocation2 + $0x58] sm:$0xff] %v1537_v7  ;;  %1606 = sbr.rel (%p2073_p11) target bundleno = 561 (0x231), region = 78 }
 0x1dc   : > { %v1343_v12 = vpop.f32.mrf.mxu0  ;;  %v1471_v13 = vpop.f32.mrf.mxu1 }
 0x1dd   : > { %v1506_v14 = vadd.f32 %v1343_v12, %v641_v10  ;;  %v1538_v15 = vadd.f32 %v1471_v13, %v673_v11 }
 0x1de   : > { %v1345_v16 = vpop.f32.mrf.mxu0  ;;  %v1473_v17 = vpop.f32.mrf.mxu1 }
 0x1df   : > { %1570 = vst [vmem:[#allocation2 + $0x8] sm:$0xff] %v1506_v14  ;;  %1602 = vst [vmem:[#allocation2 + $0xa0] sm:$0xff] %v1538_v15 }
 0x1e0   : > { %v1607_v18 = vld [vmem:[#allocation2 + $0xb0] sm:$0xff]  ;;  %v2823_v19 = vld [vmem:[%s3098_s2] ss:$0 sm:$0xff]  ;;  %v1609_v23 = vld [vmem:[#allocation2 + $0xd8] sm:$0xff] }
 0x1e1   : > { %v1608_v20 = vld [vmem:[#allocation2 + $0x1b0] sm:$0xff]  ;;  %v1678_v21 = vadd.f32 %v2823_v19, %v1607_v18  ;;  %v1610_v24 = vld [vmem:[#allocation2 + $0x18] sm:$0xff]  ;;  %v1680_v26 = vadd.f32 %v2823_v19, %v1609_v23  ;;  %v1612_v28 = vld [vmem:[#allocation2 + $0x168] sm:$0xff] }
 0x1e2   : > { %v1679_v22 = vadd.f32 %v2823_v19, %v1608_v20  ;;  %v1611_v25 = vld [vmem:[#allocation2 + $0x50] sm:$0xff]  ;;  %v1681_v27 = vadd.f32 %v2823_v19, %v1610_v24  ;;  %v1614_v31 = vld [vmem:[#allocation2 + $0x48] sm:$0xff]  ;;  %v1683_v32 = vadd.f32 %v2823_v19, %v1612_v28  ;;  %v1615_v33 = vld [vmem:[#allocation2 + $0x180] sm:$0xff] }
 0x1e3   : > { %v1613_v29 = vld [vmem:[#allocation2 + $0x130] sm:$0xff]  ;;  %2266 = vtanh.f32 %v1678_v21  ;;  %v1682_v30 = vadd.f32 %v2823_v19, %v1611_v25  ;;  %v1685_v36 = vadd.f32 %v2823_v19, %v1614_v31  ;;  %v1617_v37 = vld [vmem:[#allocation2 + $0x118] sm:$0xff]  ;;  %v1686_v38 = vadd.f32 %v2823_v19, %v1615_v33  ;;  %v1619_v41 = vld [vmem:[#allocation2 + $0x120] sm:$0xff] }
 0x1e4   : > { %2268 = vtanh.f32 %v1679_v22  ;;  %v1684_v34 = vadd.f32 %v2823_v19, %v1613_v29  ;;  %v1616_v35 = vld [vmem:[#allocation2 + $0x110] sm:$0xff]  ;;  %v1618_v39 = vld [vmem:[#allocation2 + $0x98] sm:$0xff]  ;;  %v1688_v42 = vadd.f32 %v2823_v19, %v1617_v37  ;;  %v1621_v45 = vld [vmem:[#allocation2 + $0x108] sm:$0xff]  ;;  %v1690_v46 = vadd.f32 %v2823_v19, %v1619_v41 }
 0x1e5   : > { %2270 = vtanh.f32 %v1680_v26  ;;  %v1687_v40 = vadd.f32 %v2823_v19, %v1616_v35  ;;  %v1620_v43 = vld [vmem:[#allocation2 + $0x150] sm:$0xff]  ;;  %v1689_v44 = vadd.f32 %v2823_v19, %v1618_v39  ;;  %v1622_v47 = vld [vmem:[#allocation2 + $0x60] sm:$0xff]  ;;  %v1692_v50 = vadd.f32 %v2823_v19, %v1621_v45  ;;  %v1624_v51 = vld [vmem:[#allocation2 + $0x188] sm:$0xff] }
 0x1e6   : > { %2272 = vtanh.f32 %v1681_v27  ;;  %v1691_v48 = vadd.f32 %v2823_v19, %v1620_v43  ;;  %v1623_v49 = vld [vmem:[#allocation2 + $0xe0] sm:$0xff]  ;;  %v1693_v52 = vadd.f32 %v2823_v19, %v1622_v47  ;;  %v1625_v53 = vld [vmem:[#allocation2 + $0x138] sm:$0xff]  ;;  %v1695_v57 = vadd.f32 %v2823_v19, %v1624_v51  ;;  %v1628_v61 = vld [vmem:[#allocation2 + $0x1a8] sm:$0xff] }
 0x1e7   : > { %2274 = vtanh.f32 %v1682_v30  ;;  %v1694_v54 = vadd.f32 %v2823_v19, %v1623_v49  ;;  %v1626_v55 = vld [vmem:[#allocation2 + $0x140] sm:$0xff]  ;;  %v1696_v60 = vadd.f32 %v2823_v19, %v1625_v53  ;;  %v1629_v0 = vld [vmem:[#allocation2 + $0x1b8] sm:$0xff]  ;;  %v1630_v3 = vld [vmem:[#allocation2 + $0x28] sm:$0xff]  ;;  %v1699_v5 = vadd.f32 %v2823_v19, %v1628_v61 }
 0x1e8   : > { %2276 = vtanh.f32 %v1683_v32  ;;  %v1627_v58 = vld [vmem:[#allocation2 + $0x80] sm:$0xff]  ;;  %v1697_v63 = vadd.f32 %v2823_v19, %v1626_v55  ;;  %v1631_v6 = vld [vmem:[#allocation2 + $0x1e8] sm:$0xff]  ;;  %v1700_v8 = vadd.f32 %v2823_v19, %v1629_v0  ;;  %v1632_v9 = vld [vmem:[#allocation2 + $0xf8] sm:$0xff]  ;;  %v1701_v11 = vadd.f32 %v2823_v19, %v1630_v3 }
 0x1e9   : > { %2278 = vtanh.f32 %v1684_v34  ;;  %v1698_v2 = vadd.f32 %v2823_v19, %v1627_v58  ;;  %v1633_v12 = vld [vmem:[#allocation2 + $0x160] sm:$0xff]  ;;  %v1702_v14 = vadd.f32 %v2823_v19, %v1631_v6  ;;  %v1634_v15 = vld [vmem:[#allocation2 + $0x30] sm:$0xff]  ;;  %v1703_v17 = vadd.f32 %v2823_v19, %v1632_v9  ;;  %v1638_v28 = vld [vmem:[#allocation2 + $0x8] sm:$0xff] }
 0x1ea   : > { %2280 = vtanh.f32 %v1685_v36  ;;  %v1635_v18 = vld [vmem:[#allocation2 + $0x1e0] sm:$0xff]  ;;  %v1704_v21 = vadd.f32 %v2823_v19, %v1633_v12  ;;  %v1705_v24 = vadd.f32 %v2823_v19, %v1634_v15  ;;  %v1637_v25 = vld [vmem:[#allocation2 + $0xf0] sm:$0xff]  ;;  %v1639_v31 = vld [vmem:[#allocation2 + $0x148] sm:$0xff]  ;;  %v1709_v36 = vadd.f32 %v2823_v19, %v1638_v28 }
 0x1eb   : > { %2282 = vtanh.f32 %v1686_v38  ;;  %v1636_v22 = vld [vmem:[#allocation2] sm:$0xff]  ;;  %v1706_v27 = vadd.f32 %v2823_v19, %v1635_v18  ;;  %v1708_v33 = vadd.f32 %v2823_v19, %v1637_v25  ;;  %v1640_v34 = vld [vmem:[#allocation2 + $0x1d0] sm:$0xff]  ;;  %v1710_v39 = vadd.f32 %v2823_v19, %v1639_v31  ;;  %v1649_v61 = vld [vmem:[#allocation2 + $0xe8] sm:$0xff] }
 0x1ec   : > { %2284 = vtanh.f32 %v1687_v40  ;;  %v1707_v30 = vadd.f32 %v2823_v19, %v1636_v22  ;;  %v1641_v37 = vld [vmem:[#allocation2 + $0x100] sm:$0xff]  ;;  %v1642_v40 = vld [vmem:[#allocation2 + $0xc8] sm:$0xff]  ;;  %v1648_v58 = vld [vmem:[#allocation2 + $0x1f0] sm:$0xff] }
 0x1ed   : > { %2286 = vtanh.f32 %v1688_v42  ;;  %v1711_v42 = vadd.f32 %v2823_v19, %v1640_v34  ;;  %v1643_v43 = vld [vmem:[#allocation2 + $0x40] sm:$0xff]  ;;  %v1712_v45 = vadd.f32 %v2823_v19, %v1641_v37  ;;  %v1650_v0 = vld [vmem:[#allocation2 + $0x78] sm:$0xff]  ;;  %v1651_v3 = vld [vmem:[#allocation2 + $0x70] sm:$0xff] }
 0x1ee   : > { %2288 = vtanh.f32 %v1689_v44  ;;  %v1645_v49 = vld [vmem:[#allocation2 + $0x20] sm:$0xff]  ;;  %v1714_v51 = vadd.f32 %v2823_v19, %v1643_v43  ;;  %v1652_v6 = vld [vmem:[#allocation2 + $0x90] sm:$0xff]  ;;  %v1653_v9 = vld [vmem:[#allocation2 + $0x1d8] sm:$0xff] }
 0x1ef   : > { %2290 = vtanh.f32 %v1690_v46  ;;  %v1644_v46 = vld [vmem:[#allocation2 + $0x1f8] sm:$0xff]  ;;  %v1647_v55 = vld [vmem:[#allocation2 + $0x1a0] sm:$0xff]  ;;  %v1654_v12 = vld [vmem:[#allocation2 + $0xd0] sm:$0xff] }
 0x1f0   : > { %v2267_v56 = vpop.eup %2266  ;;  %2292 = vtanh.f32 %v1691_v48  ;;  %v1713_v48 = vadd.f32 %v2823_v19, %v1642_v40  ;;  %v1655_v15 = vld [vmem:[#allocation2 + $0xb8] sm:$0xff]  ;;  %v1656_v18 = vld [vmem:[#allocation2 + $0x88] sm:$0xff]  ;;  %v1659_v28 = vld [vmem:[#allocation2 + $0x170] sm:$0xff] }
 0x1f1   : > { %v2269_v59 = vpop.eup %2268  ;;  %1806 = vst [vmem:[%s3099_s3] sm:$0xff] %v2267_v56  ;;  %2294 = vtanh.f32 %v1692_v50  ;;  %v1657_v22 = vld [vmem:[#allocation2 + $0xa8] sm:$0xff]  ;;  %v1660_v31 = vld [vmem:[#allocation2 + $0x178] sm:$0xff]  ;;  %v1662_v37 = vld [vmem:[#allocation2 + $0x190] sm:$0xff] }
 0x1f2   : > { %v2271_v62 = vpop.eup %2270  ;;  %1807 = vst [vmem:[%s3099_s3 + $0x8] sm:$0xff] %v2269_v59  ;;  %2296 = vtanh.f32 %v1693_v52  ;;  %v1646_v52 = vld [vmem:[#allocation2 + $0x128] sm:$0xff]  ;;  %v1663_v40 = vld [vmem:[#allocation2 + $0x198] sm:$0xff] }
 0x1f3   : > { %v2273_v1 = vpop.eup %2272  ;;  %1808 = vst [vmem:[%s3099_s3 + $0x10] sm:$0xff] %v2271_v62  ;;  %2298 = vtanh.f32 %v1694_v54  ;;  %v1715_v54 = vadd.f32 %v2823_v19, %v1644_v46  ;;  %v1658_v25 = vld [vmem:[#allocation2 + $0x1c8] sm:$0xff]  ;;  %v1664_v43 = vld [vmem:[#allocation2 + $0x38] sm:$0xff]  ;;  %v1665_v46 = vld [vmem:[#allocation2 + $0xc0] sm:$0xff] }
 0x1f4   : > { %v2275_v4 = vpop.eup %2274  ;;  %1809 = vst [vmem:[%s3099_s3 + $0x18] sm:$0xff] %v2273_v1  ;;  %2300 = vtanh.f32 %v1695_v57  ;;  %v1716_v57 = vadd.f32 %v2823_v19, %v1645_v49  ;;  %v1661_v34 = vld [vmem:[#allocation2 + $0x68] sm:$0xff]  ;;  %v1666_v49 = vld [vmem:[#allocation2 + $0x1c0] sm:$0xff] }
 0x1f5   : > { %v2277_v7 = vpop.eup %2276  ;;  %1810 = vst [vmem:[%s3099_s3 + $0x20] sm:$0xff] %v2275_v4  ;;  %2302 = vtanh.f32 %v1696_v60  ;;  %v1717_v60 = vadd.f32 %v2823_v19, %v1646_v52  ;;  %v1667_v52 = vld [vmem:[#allocation2 + $0x158] sm:$0xff] }
 0x1f6   : > { %v2279_v10 = vpop.eup %2278  ;;  %1811 = vst [vmem:[%s3099_s3 + $0x28] sm:$0xff] %v2277_v7  ;;  %2304 = vtanh.f32 %v1697_v63  ;;  %v1718_v63 = vadd.f32 %v2823_v19, %v1647_v55  ;;  %v1668_v55 = vld [vmem:[#allocation2 + $0x10] sm:$0xff] }
 0x1f7   : > { %v2281_v13 = vpop.eup %2280  ;;  %1812 = vst [vmem:[%s3099_s3 + $0x30] sm:$0xff] %v2279_v10  ;;  %2306 = vtanh.f32 %v1698_v2  ;;  %v1719_v2 = vadd.f32 %v2823_v19, %v1648_v58  ;;  %v1669_v58 = vld [vmem:[#allocation2 + $0x58] sm:$0xff] }
 0x1f8   : > { %v2283_v16 = vpop.eup %2282  ;;  %1813 = vst [vmem:[%s3099_s3 + $0x38] sm:$0xff] %v2281_v13  ;;  %2308 = vtanh.f32 %v1699_v5  ;;  %v1720_v5 = vadd.f32 %v2823_v19, %v1649_v61  ;;  %v1670_v61 = vld [vmem:[#allocation2 + $0xa0] sm:$0xff] }
 0x1f9   : > { %v2285_v20 = vpop.eup %2284  ;;  %1814 = vst [vmem:[%s3099_s3 + $0x40] sm:$0xff] %v2283_v16  ;;  %2310 = vtanh.f32 %v1700_v8  ;;  %v1721_v8 = vadd.f32 %v2823_v19, %v1650_v0 }
 0x1fa   : > { %v2287_v23 = vpop.eup %2286  ;;  %1815 = vst [vmem:[%s3099_s3 + $0x48] sm:$0xff] %v2285_v20  ;;  %2312 = vtanh.f32 %v1701_v11  ;;  %v1722_v11 = vadd.f32 %v2823_v19, %v1651_v3  ;;  %v1741_v3 = vadd.f32 %v2823_v19, %v1670_v61 }
 0x1fb   : > { %v2289_v26 = vpop.eup %2288  ;;  %1816 = vst [vmem:[%s3099_s3 + $0x50] sm:$0xff] %v2287_v23  ;;  %2314 = vtanh.f32 %v1702_v14  ;;  %v1723_v14 = vadd.f32 %v2823_v19, %v1652_v6 }
 0x1fc   : > { %v2291_v29 = vpop.eup %2290  ;;  %1817 = vst [vmem:[%s3099_s3 + $0x58] sm:$0xff] %v2289_v26  ;;  %2316 = vtanh.f32 %v1703_v17  ;;  %v1724_v17 = vadd.f32 %v2823_v19, %v1653_v9 }
 0x1fd   : > { %v2293_v32 = vpop.eup %2292  ;;  %1818 = vst [vmem:[%s3099_s3 + $0x60] sm:$0xff] %v2291_v29  ;;  %2318 = vtanh.f32 %v1704_v21  ;;  %v1725_v21 = vadd.f32 %v2823_v19, %v1654_v12 }
 0x1fe   : > { %v2295_v35 = vpop.eup %2294  ;;  %1819 = vst [vmem:[%s3099_s3 + $0x68] sm:$0xff] %v2293_v32  ;;  %2320 = vtanh.f32 %v1705_v24  ;;  %v1726_v24 = vadd.f32 %v2823_v19, %v1655_v15 }
 0x1ff   : > { %v2297_v38 = vpop.eup %2296  ;;  %1820 = vst [vmem:[%s3099_s3 + $0x70] sm:$0xff] %v2295_v35  ;;  %2322 = vtanh.f32 %v1706_v27  ;;  %v1727_v27 = vadd.f32 %v2823_v19, %v1656_v18 }
 0x200   : > { %v2299_v41 = vpop.eup %2298  ;;  %1821 = vst [vmem:[%s3099_s3 + $0x78] sm:$0xff] %v2297_v38  ;;  %2324 = vtanh.f32 %v1707_v30  ;;  %v1728_v30 = vadd.f32 %v2823_v19, %v1657_v22 }
 0x201   : > { %v2301_v44 = vpop.eup %2300  ;;  %1822 = vst [vmem:[%s3099_s3 + $0x80] sm:$0xff] %v2299_v41  ;;  %2326 = vtanh.f32 %v1708_v33  ;;  %v1729_v33 = vadd.f32 %v2823_v19, %v1658_v25 }
 0x202   : > { %v2303_v47 = vpop.eup %2302  ;;  %1823 = vst [vmem:[%s3099_s3 + $0x88] sm:$0xff] %v2301_v44  ;;  %2328 = vtanh.f32 %v1709_v36  ;;  %v1730_v36 = vadd.f32 %v2823_v19, %v1659_v28 }
 0x203   : > { %v2305_v50 = vpop.eup %2304  ;;  %1824 = vst [vmem:[%s3099_s3 + $0x90] sm:$0xff] %v2303_v47  ;;  %2330 = vtanh.f32 %v1710_v39  ;;  %v1731_v39 = vadd.f32 %v2823_v19, %v1660_v31 }
 0x204   : > { %v2307_v53 = vpop.eup %2306  ;;  %1825 = vst [vmem:[%s3099_s3 + $0x98] sm:$0xff] %v2305_v50  ;;  %2332 = vtanh.f32 %v1711_v42  ;;  %v1732_v42 = vadd.f32 %v2823_v19, %v1661_v34 }
 0x205   : > { %v2309_v56 = vpop.eup %2308  ;;  %1826 = vst [vmem:[%s3099_s3 + $0xa0] sm:$0xff] %v2307_v53  ;;  %2334 = vtanh.f32 %v1712_v45  ;;  %v1733_v45 = vadd.f32 %v2823_v19, %v1662_v37 }
 0x206   : > { %v2311_v59 = vpop.eup %2310  ;;  %1827 = vst [vmem:[%s3099_s3 + $0xa8] sm:$0xff] %v2309_v56  ;;  %2336 = vtanh.f32 %v1713_v48  ;;  %v1734_v48 = vadd.f32 %v2823_v19, %v1663_v40 }
 0x207   : > { %v2313_v62 = vpop.eup %2312  ;;  %1828 = vst [vmem:[%s3099_s3 + $0xb0] sm:$0xff] %v2311_v59  ;;  %2338 = vtanh.f32 %v1714_v51  ;;  %v1735_v51 = vadd.f32 %v2823_v19, %v1664_v43 }
 0x208   : > { %v2315_v1 = vpop.eup %2314  ;;  %1829 = vst [vmem:[%s3099_s3 + $0xb8] sm:$0xff] %v2313_v62  ;;  %2340 = vtanh.f32 %v1715_v54  ;;  %v1736_v54 = vadd.f32 %v2823_v19, %v1665_v46 }
 0x209   : > { %v2317_v4 = vpop.eup %2316  ;;  %1830 = vst [vmem:[%s3099_s3 + $0xc0] sm:$0xff] %v2315_v1  ;;  %2342 = vtanh.f32 %v1716_v57  ;;  %v1737_v57 = vadd.f32 %v2823_v19, %v1666_v49  ;;  %v1740_v1 = vadd.f32 %v2823_v19, %v1669_v58 }
 0x20a   : > { %v2319_v7 = vpop.eup %2318  ;;  %1831 = vst [vmem:[%s3099_s3 + $0xc8] sm:$0xff] %v2317_v4  ;;  %2344 = vtanh.f32 %v1717_v60  ;;  %v1738_v60 = vadd.f32 %v2823_v19, %v1667_v52 }
 0x20b   : > { %v2321_v10 = vpop.eup %2320  ;;  %1832 = vst [vmem:[%s3099_s3 + $0xd0] sm:$0xff] %v2319_v7  ;;  %2346 = vtanh.f32 %v1718_v63  ;;  %v1739_v63 = vadd.f32 %v2823_v19, %v1668_v55 }
 0x20c   : > { %v2323_v13 = vpop.eup %2322  ;;  %1833 = vst [vmem:[%s3099_s3 + $0xd8] sm:$0xff] %v2321_v10  ;;  %2348 = vtanh.f32 %v1719_v2 }
 0x20d   : > { %v2325_v16 = vpop.eup %2324  ;;  %1834 = vst [vmem:[%s3099_s3 + $0xe0] sm:$0xff] %v2323_v13  ;;  %2350 = vtanh.f32 %v1720_v5 }
 0x20e   : > { %v2327_v20 = vpop.eup %2326  ;;  %1835 = vst [vmem:[%s3099_s3 + $0xe8] sm:$0xff] %v2325_v16  ;;  %2352 = vtanh.f32 %v1721_v8 }
 0x20f   : > { %v2329_v23 = vpop.eup %2328  ;;  %1836 = vst [vmem:[%s3099_s3 + $0xf0] sm:$0xff] %v2327_v20  ;;  %2354 = vtanh.f32 %v1722_v11 }
 0x210   : > { %v2331_v26 = vpop.eup %2330  ;;  %1837 = vst [vmem:[%s3099_s3 + $0xf8] sm:$0xff] %v2329_v23  ;;  %2356 = vtanh.f32 %v1723_v14 }
 0x211   : > { %v2333_v29 = vpop.eup %2332  ;;  %1838 = vst [vmem:[%s3099_s3 + $0x100] sm:$0xff] %v2331_v26  ;;  %2358 = vtanh.f32 %v1724_v17 }
 0x212   : > { %v2335_v32 = vpop.eup %2334  ;;  %1839 = vst [vmem:[%s3099_s3 + $0x108] sm:$0xff] %v2333_v29  ;;  %2360 = vtanh.f32 %v1725_v21 }
 0x213   : > { %v2337_v35 = vpop.eup %2336  ;;  %1840 = vst [vmem:[%s3099_s3 + $0x110] sm:$0xff] %v2335_v32  ;;  %2362 = vtanh.f32 %v1726_v24 }
 0x214   : > { %v2339_v38 = vpop.eup %2338  ;;  %1841 = vst [vmem:[%s3099_s3 + $0x118] sm:$0xff] %v2337_v35  ;;  %2364 = vtanh.f32 %v1727_v27 }
 0x215   : > { %v2341_v41 = vpop.eup %2340  ;;  %1842 = vst [vmem:[%s3099_s3 + $0x120] sm:$0xff] %v2339_v38  ;;  %2366 = vtanh.f32 %v1728_v30 }
 0x216   : > { %v2343_v44 = vpop.eup %2342  ;;  %1843 = vst [vmem:[%s3099_s3 + $0x128] sm:$0xff] %v2341_v41  ;;  %2368 = vtanh.f32 %v1729_v33 }
 0x217   : > { %v2345_v47 = vpop.eup %2344  ;;  %1844 = vst [vmem:[%s3099_s3 + $0x130] sm:$0xff] %v2343_v44  ;;  %2370 = vtanh.f32 %v1730_v36 }
 0x218   : > { %v2347_v50 = vpop.eup %2346  ;;  %1845 = vst [vmem:[%s3099_s3 + $0x138] sm:$0xff] %v2345_v47  ;;  %2372 = vtanh.f32 %v1731_v39 }
 0x219   : > { %v2349_v53 = vpop.eup %2348  ;;  %1846 = vst [vmem:[%s3099_s3 + $0x140] sm:$0xff] %v2347_v50  ;;  %2374 = vtanh.f32 %v1732_v42 }
 0x21a   : > { %v2351_v56 = vpop.eup %2350  ;;  %1847 = vst [vmem:[%s3099_s3 + $0x148] sm:$0xff] %v2349_v53  ;;  %2376 = vtanh.f32 %v1733_v45 }
 0x21b   : > { %v2353_v59 = vpop.eup %2352  ;;  %1848 = vst [vmem:[%s3099_s3 + $0x150] sm:$0xff] %v2351_v56  ;;  %2378 = vtanh.f32 %v1734_v48 }
 0x21c   : > { %v2355_v62 = vpop.eup %2354  ;;  %1849 = vst [vmem:[%s3099_s3 + $0x158] sm:$0xff] %v2353_v59  ;;  %2380 = vtanh.f32 %v1735_v51 }
 0x21d   : > { %v2357_v0 = vpop.eup %2356  ;;  %1850 = vst [vmem:[%s3099_s3 + $0x160] sm:$0xff] %v2355_v62  ;;  %2382 = vtanh.f32 %v1736_v54 }
 0x21e   : > { %v2359_v2 = vpop.eup %2358  ;;  %1851 = vst [vmem:[%s3099_s3 + $0x168] sm:$0xff] %v2357_v0  ;;  %2384 = vtanh.f32 %v1737_v57 }
 0x21f   : > { %v2361_v4 = vpop.eup %2360  ;;  %1852 = vst [vmem:[%s3099_s3 + $0x170] sm:$0xff] %v2359_v2  ;;  %2386 = vtanh.f32 %v1738_v60 }
 0x220   : > { %v2363_v5 = vpop.eup %2362  ;;  %1853 = vst [vmem:[%s3099_s3 + $0x178] sm:$0xff] %v2361_v4  ;;  %2388 = vtanh.f32 %v1739_v63 }
 0x221   : > { %v2365_v6 = vpop.eup %2364  ;;  %1854 = vst [vmem:[%s3099_s3 + $0x180] sm:$0xff] %v2363_v5  ;;  %2390 = vtanh.f32 %v1740_v1 }
 0x222   : > { %v2367_v7 = vpop.eup %2366  ;;  %1855 = vst [vmem:[%s3099_s3 + $0x188] sm:$0xff] %v2365_v6  ;;  %2392 = vtanh.f32 %v1741_v3 }
 0x223   : > { %v2369_v19 = vpop.eup %2368  ;;  %1856 = vst [vmem:[%s3099_s3 + $0x190] sm:$0xff] %v2367_v7 }
 0x224   : > { %v2371_v8 = vpop.eup %2370  ;;  %1857 = vst [vmem:[%s3099_s3 + $0x198] sm:$0xff] %v2369_v19 }
 0x225   : > { %v2373_v9 = vpop.eup %2372  ;;  %1858 = vst [vmem:[%s3099_s3 + $0x1a0] sm:$0xff] %v2371_v8 }
 0x226   : > { %v2375_v10 = vpop.eup %2374  ;;  %1859 = vst [vmem:[%s3099_s3 + $0x1a8] sm:$0xff] %v2373_v9 }
 0x227   : > { %v2377_v11 = vpop.eup %2376  ;;  %1860 = vst [vmem:[%s3099_s3 + $0x1b0] sm:$0xff] %v2375_v10 }
 0x228   : > { %v2379_v12 = vpop.eup %2378  ;;  %1861 = vst [vmem:[%s3099_s3 + $0x1b8] sm:$0xff] %v2377_v11 }
 0x229   : > { %v2381_v13 = vpop.eup %2380  ;;  %1862 = vst [vmem:[%s3099_s3 + $0x1c0] sm:$0xff] %v2379_v12 }
 0x22a   : > { %v2383_v14 = vpop.eup %2382  ;;  %1863 = vst [vmem:[%s3099_s3 + $0x1c8] sm:$0xff] %v2381_v13 }
 0x22b   : > { %v2385_v15 = vpop.eup %2384  ;;  %1864 = vst [vmem:[%s3099_s3 + $0x1d0] sm:$0xff] %v2383_v14 }
 0x22c   : > { %v2387_v16 = vpop.eup %2386  ;;  %1865 = vst [vmem:[%s3099_s3 + $0x1d8] sm:$0xff] %v2385_v15 }
 0x22d   : > { %v2389_v17 = vpop.eup %2388  ;;  %1866 = vst [vmem:[%s3099_s3 + $0x1e0] sm:$0xff] %v2387_v16 }
 0x22e   : > { %v2391_v18 = vpop.eup %2390  ;;  %1867 = vst [vmem:[%s3099_s3 + $0x1e8] sm:$0xff] %v2389_v17 }
 0x22f   : > { %v2393_v20 = vpop.eup %2392  ;;  %1868 = vst [vmem:[%s3099_s3 + $0x1f0] sm:$0xff] %v2391_v18 }
 0x230   : > { %1869 = vst [vmem:[%s3099_s3 + $0x1f8] sm:$0xff] %v2393_v20 }
 0x231 PF: > { %s13_s16 = sadd.s32 1, %s2432_s16   ;;  %s3100_s12 = smov %s2420_s13 }
 0x232   : > { %p10_p12 = scmp.ge.s32.totalorder %s13_s16, 4   ;;  %s3101_s13 = smov %s2491_s20 }
 0x233   : > { %s3102_s14 = smov %s2428_s15  ;;  %s3103_s15 = smov %s3105_s17 }
 0x234   :  { %12 = sbr.rel (!%p10_p12) target bundleno = 3 (0x3), region = 119 }

</bundles_post_ra>
